<compile_context>
chip_gen: v7x
topology: tpu7x:2x2x1
jax: 0.10.0
libtpu: 0.0.40
codegen_flags: <defaults>
</compile_context>

<pallas_src>
import functools

import jax
import jax.numpy as jnp
from jax.experimental import pallas as pl
from jax.experimental.pallas import tpu as pltpu


def _se_conv_bn_kernel(x_ref, s_ref, w_ref, gamma_ref, beta_ref, o_ref,
                       *, num_k, m_total, eps):
    k = pl.program_id(0)

    # Fold the SE gate into the small weight tile instead of gating the large
    # activation tile (mathematically identical, ~10x fewer VPU multiplies).
    # Sigmoid / gate math stays f32 (v5e VPU/EUP have no bf16); only the tiny
    # gated tile is cast to x's dtype so a bf16 activation stream uses the
    # native bf16 MXU path.
    w_gated = (w_ref[...] * jax.nn.sigmoid(s_ref[...])).astype(x_ref.dtype)

    # 1x1 conv == matmul; contract on Cin (axis 0 of both) -> [Cout, M].
    partial = jax.lax.dot_general(
        w_gated, x_ref[...],
        dimension_numbers=(((0,), (0,)), ((), ())),
        preferred_element_type=jnp.float32,
    )

    def _bn(y):
        # BatchNorm training-mode forward over the lane-dense M axis.
        inv_m = 1.0 / m_total
        mean = jnp.sum(y, axis=1, keepdims=True) * inv_m          # [Cout, 1]
        d = y - mean
        var = jnp.sum(d * d, axis=1, keepdims=True) * inv_m       # two-pass, biased
        g = gamma_ref[...] * jax.lax.rsqrt(var + eps)             # [Cout, 1]
        return d * g + beta_ref[...]

    if num_k == 1:
        # Single Cin tile: no accumulator traffic at all.
        o_ref[...] = _bn(partial)
    else:
        @pl.when(k == 0)
        def _():
            # First tile: direct store (no zero-init, no read-modify-write).
            o_ref[...] = partial

        @pl.when(jnp.logical_and(k > 0, k < num_k - 1))
        def _():
            o_ref[...] += partial

        @pl.when(k == num_k - 1)
        def _():
            # Last tile: fuse the final partial into the BN epilogue so the
            # accumulator is read once and written once on this step.
            o_ref[...] = _bn(o_ref[...] + partial)


def _pick_block_cin(cin):
    """Generation-aware Cin tile: fewer, larger steps on v7x; 160 elsewhere."""
    kind = ""
    try:
        kind = jax.devices()[0].device_kind.lower()
    except Exception:
        pass
    if "v7" in kind and cin % 240 == 0:
        return 240          # per-step overhead dominates at 3.2 TB/s HBM
    if cin % 160 == 0:
        return 160
    if cin % 96 == 0:
        return 96
    return cin              # fall back to a single grid step


def se_conv_bn(x_nchw, scale_nc11, w_oi11, gamma, beta, *,
               eps=1e-3, block_cin=None):
    """x_nchw: [1, Cin, H, W]; scale: [1, Cin, 1, 1]; w: [Cout, Cin, 1, 1]."""
    N, Cin, H, W = x_nchw.shape
    Cout = w_oi11.shape[0]
    # The gate is folded into the conv weights, which only commutes when a
    # single gate applies to all rows (per-sample gates would need per-sample
    # weight tiles).
    assert N == 1, "kernel assumes a single sample (module spec has N=1)"
    if block_cin is None:
        block_cin = _pick_block_cin(Cin)
    assert Cin % block_cin == 0 and (block_cin % 8 == 0 or block_cin == Cin)
    M = N * H * W
    num_k = Cin // block_cin

    # Channel-major layout: for N == 1 the NCHW buffer is already contiguous
    # as [Cin, H*W] -> reshape only, no transpose / extra HBM pass. x keeps
    # its incoming dtype (f32 here; a bf16 producer would halve the dominant
    # HBM stream with no wrapper cast pass).
    x2d = x_nchw.reshape(Cin, M)                                  # [Cin, M]
    s2d = scale_nc11.reshape(Cin, 1).astype(jnp.float32)          # [Cin, 1]
    w2d = jnp.transpose(w_oi11.reshape(Cout, Cin), (1, 0)).astype(jnp.float32)  # [Cin, Cout]
    g2d = gamma.reshape(Cout, 1).astype(jnp.float32)
    b2d = beta.reshape(Cout, 1).astype(jnp.float32)

    kernel = functools.partial(_se_conv_bn_kernel,
                               num_k=num_k, m_total=float(M), eps=float(eps))

    out2d = pl.pallas_call(
        kernel,
        out_shape=jax.ShapeDtypeStruct((Cout, M), jnp.float32),
        grid_spec=pltpu.PrefetchScalarGridSpec(
            num_scalar_prefetch=0,
            grid=(num_k,),                                        # Cin reduction
            in_specs=[
                pl.BlockSpec((block_cin, M), lambda k: (k, 0)),       # x tile
                pl.BlockSpec((block_cin, 1), lambda k: (k, 0)),       # gate tile
                pl.BlockSpec((block_cin, Cout), lambda k: (k, 0)),    # w tile
                pl.BlockSpec((Cout, 1), lambda k: (0, 0)),            # gamma
                pl.BlockSpec((Cout, 1), lambda k: (0, 0)),            # beta
            ],
            out_specs=pl.BlockSpec((Cout, M), lambda k: (0, 0)),      # resident acc
        ),
        compiler_params=pltpu.CompilerParams(
            dimension_semantics=("arbitrary",),
        ),
    )(x2d, s2d, w2d, g2d, b2d)

    # [Cout, M] -> [1, Cout, H, W]: reshape only (no transpose) for N == 1.
    return out2d.reshape(N, Cout, H, W)


def _reference(x_nchw, scale_nc11, w_oi11, gamma, beta):
    """Pure-JAX reference for correctness checking."""
    gated = jax.nn.sigmoid(scale_nc11) * x_nchw                     # [N,Cin,H,W]
    y = jnp.einsum("nchw,oc->nohw", gated, w_oi11[:, :, 0, 0])      # 1x1 conv
    mean = jnp.mean(y, axis=(0, 2, 3), keepdims=True)
    var = jnp.mean((y - mean) ** 2, axis=(0, 2, 3), keepdims=True)
    gn = (y - mean) * jax.lax.rsqrt(var + 0.001)
    return gn * gamma.reshape(1, -1, 1, 1) + beta.reshape(1, -1, 1, 1)


if __name__ == "__main__":
    N, Cin, H, W, Cout = 1, 480, 28, 28, 80

    key = jax.random.PRNGKey(0)
    k_x, k_s, k_w = jax.random.split(key, 3)

    x183 = jax.random.normal(k_x, (N, Cin, H, W), dtype=jnp.float32)
    x187 = jax.random.normal(k_s, (N, Cin, 1, 1), dtype=jnp.float32)

    # Conv2d(480, 80, 1, bias=False) weight, deterministic init.
    w = jax.random.normal(k_w, (Cout, Cin, 1, 1), dtype=jnp.float32) * 0.05
    # BatchNorm2d(80) affine params (PyTorch default init: weight=1, bias=0).
    gamma = jnp.ones((Cout,), dtype=jnp.float32)
    beta = jnp.zeros((Cout,), dtype=jnp.float32)

    out = se_conv_bn(x183, x187, w, gamma, beta)
    out = jax.block_until_ready(out)

    ref = _reference(x183, x187, w, gamma, beta)
    assert out.shape == (N, Cout, H, W)
    assert jnp.allclose(out, ref, atol=1e-3, rtol=1e-3), "mismatch vs reference"

    print("KERNEL_OK")
</pallas_src>

<mosaic_0001>
module attributes {stable_mosaic.version = 11 : i64} {
  func.func @_se_conv_bn_kernel(%arg0: i32, %arg1: memref<160x784xf32, #tpu.memory_space<vmem>>, %arg2: memref<160x1xf32, #tpu.memory_space<vmem>>, %arg3: memref<160x80xf32, #tpu.memory_space<vmem>>, %arg4: memref<80x1xf32, #tpu.memory_space<vmem>>, %arg5: memref<80x1xf32, #tpu.memory_space<vmem>>, %arg6: memref<80x784xf32, #tpu.memory_space<vmem>>) attributes {dimension_semantics = [#tpu.dimension_semantics<arbitrary>], iteration_bounds = array<i64: 3>, scalar_prefetch = 0 : i64, scratch_operands = 0 : i64, tpu.core_type = #tpu.core_type<tc>, window_params = [{transform_indices = @transform_0, window_bounds = array<i64: 160, 784>}, {transform_indices = @transform_1, window_bounds = array<i64: 160, 1>}, {transform_indices = @transform_2, window_bounds = array<i64: 160, 80>}, {pipeline_mode = #tpu.pipeline_mode<synchronous>, transform_indices = @transform_3, window_bounds = array<i64: 80, 1>}, {pipeline_mode = #tpu.pipeline_mode<synchronous>, transform_indices = @transform_4, window_bounds = array<i64: 80, 1>}, {pipeline_mode = #tpu.pipeline_mode<synchronous>, transform_indices = @transform_5, window_bounds = array<i64: 80, 784>}]} {
    %c0 = arith.constant 0 : index
    %c0_0 = arith.constant 0 : index
    %0 = vector.load %arg3[%c0, %c0_0] : memref<160x80xf32, #tpu.memory_space<vmem>>, vector<160x80xf32>
    %c0_1 = arith.constant 0 : index
    %c0_2 = arith.constant 0 : index
    %1 = vector.load %arg2[%c0_1, %c0_2] : memref<160x1xf32, #tpu.memory_space<vmem>>, vector<160x1xf32>
    %2 = arith.negf %1 : vector<160x1xf32>
    %3 = math.exp %2 : vector<160x1xf32>
    %cst = arith.constant 1.000000e+00 : f32
    %4 = vector.broadcast %cst : f32 to vector<160x1xf32>
    %5 = arith.addf %4, %3 : vector<160x1xf32>
    %6 = arith.divf %4, %5 : vector<160x1xf32>
    %7 = vector.broadcast %6 : vector<160x1xf32> to vector<160x80xf32>
    %8 = arith.mulf %0, %7 : vector<160x80xf32>
    %c0_3 = arith.constant 0 : index
    %c0_4 = arith.constant 0 : index
    %9 = vector.load %arg1[%c0_3, %c0_4] : memref<160x784xf32, #tpu.memory_space<vmem>>, vector<160x784xf32>
    %cst_5 = arith.constant dense<0.000000e+00> : vector<80x784xf32>
    %10 = tpu.matmul %8, %9, %cst_5 {dimension_numbers = #tpu.dot_dimension_numbers<[0], [0], [1], [1], [0, 1, 1, 1], [], []>} : vector<160x80xf32>, vector<160x784xf32>, vector<80x784xf32> -> vector<80x784xf32>
    %c0_i32 = arith.constant 0 : i32
    %11 = arith.cmpi eq, %arg0, %c0_i32 : i32
    %12 = arith.extui %11 : i1 to i32
    %c0_i32_6 = arith.constant 0 : i32
    %13 = arith.cmpi ne, %12, %c0_i32_6 : i32
    scf.if %13 {
      %c0_11 = arith.constant 0 : index
      %c0_12 = arith.constant 0 : index
      %22 = vector.load %arg6[%c0_11, %c0_12] : memref<80x784xf32, #tpu.memory_space<vmem>>, vector<80x784xf32>
      tpu.vector_store %arg6[%c0_11, %c0_12], %10 {strides = array<i32>} : memref<80x784xf32, #tpu.memory_space<vmem>>, vector<80x784xf32>,
    } else {
    }
    %c0_i32_7 = arith.constant 0 : i32
    %14 = arith.cmpi sgt, %arg0, %c0_i32_7 : i32
    %c2_i32 = arith.constant 2 : i32
    %15 = arith.cmpi slt, %arg0, %c2_i32 : i32
    %16 = arith.andi %14, %15 : i1
    %17 = arith.extui %16 : i1 to i32
    %c0_i32_8 = arith.constant 0 : i32
    %18 = arith.cmpi ne, %17, %c0_i32_8 : i32
    scf.if %18 {
      %c0_11 = arith.constant 0 : index
      %c0_12 = arith.constant 0 : index
      %22 = vector.load %arg6[%c0_11, %c0_12] : memref<80x784xf32, #tpu.memory_space<vmem>>, vector<80x784xf32>
      %23 = arith.addf %22, %10 : vector<80x784xf32>
      %c0_13 = arith.constant 0 : index
      %c0_14 = arith.constant 0 : index
      %24 = vector.load %arg6[%c0_13, %c0_14] : memref<80x784xf32, #tpu.memory_space<vmem>>, vector<80x784xf32>
      tpu.vector_store %arg6[%c0_13, %c0_14], %23 {strides = array<i32>} : memref<80x784xf32, #tpu.memory_space<vmem>>, vector<80x784xf32>,
    } else {
    }
    %c2_i32_9 = arith.constant 2 : i32
    %19 = arith.cmpi eq, %arg0, %c2_i32_9 : i32
    %20 = arith.extui %19 : i1 to i32
    %c0_i32_10 = arith.constant 0 : i32
    %21 = arith.cmpi ne, %20, %c0_i32_10 : i32
    scf.if %21 {
      %c0_11 = arith.constant 0 : index
      %c0_12 = arith.constant 0 : index
      %22 = vector.load %arg6[%c0_11, %c0_12] : memref<80x784xf32, #tpu.memory_space<vmem>>, vector<80x784xf32>
      %23 = arith.addf %22, %10 : vector<80x784xf32>
      %cst_13 = arith.constant dense<0.000000e+00> : vector<80xf32>
      %24 = vector.multi_reduction <add>, %23, %cst_13 [1] : vector<80x784xf32> to vector<80xf32>
      %25 = vector.shape_cast %24 : vector<80xf32> to vector<80x1xf32>
      %cst_14 = arith.constant 0.00127551018 : f32
      %26 = vector.broadcast %cst_14 : f32 to vector<80x1xf32>
      %27 = arith.mulf %25, %26 : vector<80x1xf32>
      %28 = vector.broadcast %27 : vector<80x1xf32> to vector<80x784xf32>
      %29 = arith.subf %23, %28 : vector<80x784xf32>
      %30 = arith.mulf %29, %29 : vector<80x784xf32>
      %cst_15 = arith.constant dense<0.000000e+00> : vector<80xf32>
      %31 = vector.multi_reduction <add>, %30, %cst_15 [1] : vector<80x784xf32> to vector<80xf32>
      %32 = vector.shape_cast %31 : vector<80xf32> to vector<80x1xf32>
      %cst_16 = arith.constant 0.00127551018 : f32
      %33 = vector.broadcast %cst_16 : f32 to vector<80x1xf32>
      %34 = arith.mulf %32, %33 : vector<80x1xf32>
      %c0_17 = arith.constant 0 : index
      %c0_18 = arith.constant 0 : index
      %35 = vector.load %arg4[%c0_17, %c0_18] : memref<80x1xf32, #tpu.memory_space<vmem>>, vector<80x1xf32>
      %cst_19 = arith.constant 1.000000e-03 : f32
      %36 = vector.broadcast %cst_19 : f32 to vector<80x1xf32>
      %37 = arith.addf %34, %36 : vector<80x1xf32>
      %38 = math.rsqrt %37 : vector<80x1xf32>
      %39 = arith.mulf %35, %38 : vector<80x1xf32>
      %40 = vector.broadcast %39 : vector<80x1xf32> to vector<80x784xf32>
      %41 = arith.mulf %29, %40 : vector<80x784xf32>
      %c0_20 = arith.constant 0 : index
      %c0_21 = arith.constant 0 : index
      %42 = vector.load %arg5[%c0_20, %c0_21] : memref<80x1xf32, #tpu.memory_space<vmem>>, vector<80x1xf32>
      %43 = vector.broadcast %42 : vector<80x1xf32> to vector<80x784xf32>
      %44 = arith.addf %41, %43 : vector<80x784xf32>
      %c0_22 = arith.constant 0 : index
      %c0_23 = arith.constant 0 : index
      %45 = vector.load %arg6[%c0_22, %c0_23] : memref<80x784xf32, #tpu.memory_space<vmem>>, vector<80x784xf32>
      tpu.vector_store %arg6[%c0_22, %c0_23], %44 {strides = array<i32>} : memref<80x784xf32, #tpu.memory_space<vmem>>, vector<80x784xf32>,
    } else {
    }
    return
  }
  func.func @transform_0(%arg0: i32) -> (i32, i32) {
    %c0_i32 = arith.constant 0 : i32
    %c0_i32_0 = arith.constant 0 : i32
    return %arg0, %c0_i32 : i32, i32
  }
  func.func @transform_1(%arg0: i32) -> (i32, i32) {
    %c0_i32 = arith.constant 0 : i32
    %c0_i32_0 = arith.constant 0 : i32
    return %arg0, %c0_i32 : i32, i32
  }
  func.func @transform_2(%arg0: i32) -> (i32, i32) {
    %c0_i32 = arith.constant 0 : i32
    %c0_i32_0 = arith.constant 0 : i32
    return %arg0, %c0_i32 : i32, i32
  }
  func.func @transform_3(%arg0: i32) -> (i32, i32) {
    %c0_i32 = arith.constant 0 : i32
    %c0_i32_0 = arith.constant 0 : i32
    %c0_i32_1 = arith.constant 0 : i32
    return %c0_i32, %c0_i32_0 : i32, i32
  }
  func.func @transform_4(%arg0: i32) -> (i32, i32) {
    %c0_i32 = arith.constant 0 : i32
    %c0_i32_0 = arith.constant 0 : i32
    %c0_i32_1 = arith.constant 0 : i32
    return %c0_i32, %c0_i32_0 : i32, i32
  }
  func.func @transform_5(%arg0: i32) -> (i32, i32) {
    %c0_i32 = arith.constant 0 : i32
    %c0_i32_0 = arith.constant 0 : i32
    %c0_i32_1 = arith.constant 0 : i32
    return %c0_i32, %c0_i32_0 : i32, i32
  }
}

</mosaic_0001>

<bundles_post_ra>
// kernel: tpu_custom_call.1
= control target key start
LH: loop header
LB: loop body
LE: loop exit
PB: predicated region body
PF: predicated region fallthrough
CT: control target
= control target key end

     0   :  { %10 = vsyncpa [#allocation3], 0  ;;  %s2897_s18 = smov 0   ;;  %s4464_s0 = inlined_call_operand.vmem [shape: f32[480,784], index: 0, kind: input, shape index: {}]   ;;  %s4465_s1 = inlined_call_operand.vmem [shape: f32[480,1], index: 1, kind: input, shape index: {}]   ;;  %s4466_s2 = inlined_call_operand.vmem [shape: f32[480,80], index: 2, kind: input, shape index: {}]   ;;  %s4467_s3 = inlined_call_operand.vmem [shape: f32[80,1], index: 3, kind: input, shape index: {}]   ;;  %s4468_s4 = inlined_call_operand.vmem [shape: f32[80,1], index: 4, kind: input, shape index: {}]   ;;  %s4469_s5 = inlined_call_operand.hbm [shape: f32[80,784], index: 5, kind: output, shape index: {}]  }
   0x1 LB: > { %s2903_s19 = sadd.s32 4294967295, %s2859_s18   ;;  %p2477_p0 = scmp.ge.s32.totalorder %s2859_s18, 1  ;;  %s2859_s18 = sphi %s2897_s18, %s16_s18  }
   0x2   : > { %p207_p1 = scmp.lt.s32.totalorder %s2859_s18, 4 }
   0x4   : > { %p208_p2 = pnand %p2477_p0, %p207_p1 }
   0x6   : > { %211 = sbr.rel (%p208_p2) target bundleno = 1229 (0x4cd), region = 40 }
   0xd   : > { %s241_s20 = smul.u32 20, %s2903_s19  ;;  %v2861_v0 = vmov 0   ;;  %vm744_vm0 = vcmask 261120   ;;  %p2541_p4 = scmp.ne.s32.totalorder %s2903_s19, 0 }
   0xe   : > { %2720 = vset.pattern.permute.xlu1 %v2861_v0  ;;  %2719 = vset.pattern.permute.xlu0 %v2861_v0  ;;  %vm1275_vm1 = vcmask (!%p2541_p4), 130048  }
   0xf   : > { %p242_p3 = scmp.lt.s32.totalorder %s241_s20, 59 }
  0x11   : > { %s4747_s20 = smov (!%p242_p3, %s241_s20), 59 }
  0x12   : > { %s2479_s21 = sshll.u32 %s4747_s20, 3  ;;  %s2697_s25 = smul.u32 56, %s4747_s20 }
  0x13   : > { %s2916_s24 = scalar_lea.vmem %s4465_s1, %s2479_s21  ;;  %s3029_s6 = scalar_lea.vmem %s4466_s2, %s2479_s21 }
  0x14   : > { %v282_v1 = vld [vmem:[%s2916_s24 + $0x10] sm:$0xff]  ;;  %v280_v2 = vld [vmem:[%s2916_s24] sm:$0xff]  ;;  %v283_v3 = vld [vmem:[%s2916_s24 + $0x18] sm:$0xff]  ;;  %s2942_s28 = scalar_lea.vmem %s4464_s0, %s2697_s25 }
  0x15   : > { %v2483_v4 = vmul.f32 -1.442695, %v282_v1  ;;  %v2481_v5 = vmul.f32 -1.442695, %v280_v2  ;;  %v2484_v6 = vmul.f32 -1.442695, %v283_v3 }
  0x16   : > { %v281_v7 = vld [vmem:[%s2916_s24 + $0x8] sm:$0xff]  ;;  %v284_v9 = vld [vmem:[%s2916_s24 + $0x20] sm:$0xff]  ;;  %v287_v13 = vld [vmem:[%s2916_s24 + $0x38] sm:$0xff] }
  0x17   : > { %v285_v8 = vld [vmem:[%s2916_s24 + $0x28] sm:$0xff]  ;;  %2721 = vpow2.f32 %v2483_v4  ;;  %v2482_v10 = vmul.f32 -1.442695, %v281_v7  ;;  %v2485_v12 = vmul.f32 -1.442695, %v284_v9  ;;  %v286_v14 = vld [vmem:[%s2916_s24 + $0x30] sm:$0xff] }
  0x18   : > { %v2486_v11 = vmul.f32 -1.442695, %v285_v8  ;;  %2723 = vpow2.f32 %v2481_v5  ;;  %v289_v15 = vld [vmem:[%s2916_s24 + $0x48] sm:$0xff]  ;;  %v2488_v16 = vmul.f32 -1.442695, %v287_v13  ;;  %v288_v18 = vld [vmem:[%s2916_s24 + $0x40] sm:$0xff] }
  0x19   : > { %2725 = vpow2.f32 %v2484_v6  ;;  %v2487_v17 = vmul.f32 -1.442695, %v286_v14  ;;  %v291_v19 = vld [vmem:[%s2916_s24 + $0x58] sm:$0xff]  ;;  %v2490_v20 = vmul.f32 -1.442695, %v289_v15  ;;  %v290_v21 = vld [vmem:[%s2916_s24 + $0x50] sm:$0xff] }
  0x1a   : > { %2727 = vpow2.f32 %v2482_v10  ;;  %v2489_v22 = vmul.f32 -1.442695, %v288_v18  ;;  %v2492_v23 = vmul.f32 -1.442695, %v291_v19  ;;  %v2491_v24 = vmul.f32 -1.442695, %v290_v21 }
  0x1b   : > { %2729 = vpow2.f32 %v2486_v11  ;;  %v292_v26 = vld [vmem:[%s2916_s24 + $0x60] sm:$0xff]  ;;  %v293_v49 = vld [vmem:[%s2916_s24 + $0x68] sm:$0xff]  ;;  %v294_v55 = vld [vmem:[%s2916_s24 + $0x70] sm:$0xff] }
  0x1c   : > { %2731 = vpow2.f32 %v2485_v12  ;;  %v2493_v33 = vmul.f32 -1.442695, %v292_v26  ;;  %v296_v46 = vld [vmem:[%s2916_s24 + $0x80] sm:$0xff]  ;;  %v297_v52 = vld [vmem:[%s2916_s24 + $0x88] sm:$0xff]  ;;  %v2494_v57 = vmul.f32 -1.442695, %v293_v49 }
  0x1d   : > { %2733 = vpow2.f32 %v2488_v16  ;;  %v2497_v54 = vmul.f32 -1.442695, %v296_v46  ;;  %v298_v58 = vld [vmem:[%s2916_s24 + $0x90] sm:$0xff]  ;;  %v2498_v60 = vmul.f32 -1.442695, %v297_v52  ;;  %v295_v61 = vld [vmem:[%s2916_s24 + $0x78] sm:$0xff] }
  0x1e   : > { %2735 = vpow2.f32 %v2487_v17  ;;  %v2495_v63 = vmul.f32 -1.442695, %v294_v55  ;;  %v299_v0 = vld [vmem:[%s2916_s24 + $0x98] sm:$0xff]  ;;  %v2499_v2 = vmul.f32 -1.442695, %v298_v58  ;;  %v542_v46 = vld [vmem:[%s2942_s28 + $0x10] sm:$0xff] }
  0x1f   : > { %2737 = vpow2.f32 %v2490_v20  ;;  %v2496_v4 = vmul.f32 -1.442695, %v295_v61  ;;  %v2500_v6 = vmul.f32 -1.442695, %v299_v0  ;;  %v564_v52 = vld [vmem:[%s2942_s28 + $0xc0] sm:$0xff]  ;;  %v554_v55 = vld [vmem:[%s2942_s28 + $0x70] sm:$0xff] }
  0x20   : > { %2739 = vpow2.f32 %v2489_v22  ;;  %v576_v61 = vld [vmem:[%s2942_s28 + $0x120] sm:$0xff]  ;;  %v571_v0 = vld [vmem:[%s2942_s28 + $0xf8] sm:$0xff] }
  0x21   : > { %v2722_v25 = vpop.eup %2721  ;;  %2741 = vpow2.f32 %v2492_v23 }
  0x22   : > { %v2724_v27 = vpop.eup %2723  ;;  %v362_v28 = vadd.f32 1.0, %v2722_v25  ;;  %2743 = vpow2.f32 %v2491_v24 }
  0x23   : > { %v2726_v29 = vpop.eup %2725  ;;  %v360_v30 = vadd.f32 1.0, %v2724_v27 }
  0x24   : > { %v2728_v31 = vpop.eup %2727  ;;  %2745 = vrcp.f32 %v362_v28  ;;  %v363_v32 = vadd.f32 1.0, %v2726_v29 }
  0x25   : > { %v2730_v34 = vpop.eup %2729  ;;  %2747 = vrcp.f32 %v360_v30  ;;  %v361_v35 = vadd.f32 1.0, %v2728_v31 }
  0x26   : > { %v2732_v36 = vpop.eup %2731  ;;  %2749 = vrcp.f32 %v363_v32  ;;  %v365_v37 = vadd.f32 1.0, %v2730_v34 }
  0x27   : > { %v2734_v38 = vpop.eup %2733  ;;  %2751 = vrcp.f32 %v361_v35  ;;  %v364_v39 = vadd.f32 1.0, %v2732_v36 }
  0x28   : > { %v2736_v40 = vpop.eup %2735  ;;  %v367_v41 = vadd.f32 1.0, %v2734_v38  ;;  %2753 = vpow2.f32 %v2493_v33  ;;  %v548_v38 = vld [vmem:[%s2942_s28 + $0x40] sm:$0xff] }
  0x29   : > { %v2738_v42 = vpop.eup %2737  ;;  %2755 = vrcp.f32 %v365_v37  ;;  %v366_v43 = vadd.f32 1.0, %v2736_v40  ;;  %v541_v37 = vld [vmem:[%s2942_s28 + $0x8] sm:$0xff] }
  0x2a   : > { %v2740_v44 = vpop.eup %2739  ;;  %2757 = vrcp.f32 %v364_v39  ;;  %v369_v45 = vadd.f32 1.0, %v2738_v42  ;;  %v543_v39 = vld [vmem:[%s2942_s28 + $0x18] sm:$0xff]  ;;  %v2547_v40 = vpack.c.bf16 %v548_v38, %v541_v37  ;;  %v540_v42 = vld [vmem:[%s2942_s28] sm:$0xff]  ;;  %v610_v38 = vld [vmem:[%s2942_s28 + $0x230] sm:$0xff] }
  0x2b   : > { %v2742_v47 = vpop.eup %2741  ;;  %2759 = vrcp.f32 %v367_v41  ;;  %v368_v48 = vadd.f32 1.0, %v2740_v44  ;;  %v550_v41 = vld [vmem:[%s2942_s28 + $0x50] sm:$0xff] }
  0x2c   : > { %v2744_v50 = vpop.eup %2743  ;;  %2761 = vrcp.f32 %v366_v43  ;;  %v371_v51 = vadd.f32 1.0, %v2742_v47  ;;  %v547_v43 = vld [vmem:[%s2942_s28 + $0x38] sm:$0xff]  ;;  %v2587_v44 = vpack.c.bf16 %v550_v41, %v543_v39  ;;  %v549_v47 = vld [vmem:[%s2942_s28 + $0x48] sm:$0xff]  ;;  %2548 = vmatprep.subr.bf16.mxu0 %v2547_v40  ;;  %v612_v40 = vld [vmem:[%s2942_s28 + $0x240] sm:$0xff] }
  0x2d   : > { %2763 = vrcp.f32 %v369_v45  ;;  %v370_v53 = vadd.f32 1.0, %v2744_v50  ;;  %v2549_v45 = vpack.c.bf16 %v547_v43, %v540_v42  ;;  %v2589_v49 = vpack.c.bf16 %v549_v47, %v542_v46  ;;  %v562_v50 = vld [vmem:[%s2942_s28 + $0xb0] sm:$0xff]  ;;  %v617_v39 = vld [vmem:[%s2942_s28 + $0x268] sm:$0xff]  ;;  %v619_v42 = vld [vmem:[%s2942_s28 + $0x278] sm:$0xff] }
  0x2e   : > { %v2746_v56 = vpop.eup %2745  ;;  %2765 = vrcp.f32 %v368_v48  ;;  %v555_v48 = vld [vmem:[%s2942_s28 + $0x78] sm:$0xff]  ;;  %2588 = vmatprep.subr.bf16.mxu1 %v2587_v44  ;;  %v625_v43 = vld [vmem:[%s2942_s28 + $0x2a8] sm:$0xff]  ;;  %v632_v44 = vld [vmem:[%s2942_s28 + $0x2e0] sm:$0xff]  ;;  %v2569_v47 = vpack.c.bf16 %v617_v39, %v610_v38 }
  0x2f   : > { %v2748_v59 = vpop.eup %2747  ;;  %432 = vperm.xlu1 %2720, %v2746_v56   ;;  %2767 = vrcp.f32 %v371_v51  ;;  %v557_v51 = vld [vmem:[%s2942_s28 + $0x88] sm:$0xff]  ;;  %2550 = vmatpush1.bf16.msra.mxu0 %v2549_v45  ;;  %v627_v45 = vld [vmem:[%s2942_s28 + $0x2b8] sm:$0xff]  ;;  %v634_v46 = vld [vmem:[%s2942_s28 + $0x2f0] sm:$0xff] }
  0x30   : > { %v2750_v62 = vpop.eup %2749  ;;  %422 = vperm.xlu0 %2719, %v2748_v59   ;;  %2769 = vrcp.f32 %v370_v53  ;;  %v2551_v53 = vpack.c.bf16 %v562_v50, %v555_v48  ;;  %v561_v56 = vld [vmem:[%s2942_s28 + $0xa8] sm:$0xff]  ;;  %2590 = vmatpush1.bf16.msra.mxu1 %v2589_v49  ;;  %v563_v59 = vld [vmem:[%s2942_s28 + $0xb8] sm:$0xff]  ;;  %v2609_v48 = vpack.c.bf16 %v619_v42, %v612_v40  ;;  %v2571_v49 = vpack.c.bf16 %v632_v44, %v625_v43  ;;  %v624_v50 = vld [vmem:[%s2942_s28 + $0x2a0] sm:$0xff] }
  0x31   : > { %v2752_v1 = vpop.eup %2751  ;;  %2771 = vpow2.f32 %v2497_v54  ;;  %v2591_v54 = vpack.c.bf16 %v564_v52, %v557_v51  ;;  %v2553_v58 = vpack.c.bf16 %v561_v56, %v554_v55  ;;  %v631_v51 = vld [vmem:[%s2942_s28 + $0x2d8] sm:$0xff]  ;;  %v626_v52 = vld [vmem:[%s2942_s28 + $0x2b0] sm:$0xff]  ;;  %v264_v43 = vld [vmem:[%s3029_s6 + $0x20] sm:$0xff] }
  0x32   : > { %v2754_v3 = vpop.eup %2753  ;;  %2773 = vpow2.f32 %v2494_v57  ;;  %v556_v57 = vld [vmem:[%s2942_s28 + $0x80] sm:$0xff]  ;;  %2552 = vmatprep.subr.bf16.mxu0 %v2551_v53  ;;  %v2611_v53 = vpack.c.bf16 %v634_v46, %v627_v45  ;;  %v639_v55 = vld [vmem:[%s2942_s28 + $0x318] sm:$0xff]  ;;  %v646_v56 = vld [vmem:[%s2942_s28 + $0x350] sm:$0xff] }
  0x33   : > { %v2756_v5 = vpop.eup %2755  ;;  %437 = vperm.xlu1 %2720, %v2750_v62   ;;  %2775 = vpow2.f32 %v2498_v60  ;;  %v372_v10 = vadd.f32 1.0, %v2754_v3  ;;  %v569_v60 = vld [vmem:[%s2942_s28 + $0xe8] sm:$0xff]  ;;  %2592 = vmatprep.subr.bf16.mxu1 %v2591_v54  ;;  %v2593_v62 = vpack.c.bf16 %v563_v59, %v556_v57  ;;  %v2573_v59 = vpack.c.bf16 %v631_v51, %v624_v50  ;;  %v263_v38 = vld [vmem:[%s3029_s6 + $0x18] sm:$0xff]  ;;  %v266_v51 = vld [vmem:[%s3029_s6 + $0x30] sm:$0xff] }
  0x34   : > { %v2758_v7 = vpop.eup %2757  ;;  %427 = vperm.xlu0 %2719, %v2752_v1   ;;  %2777 = vpow2.f32 %v2495_v63  ;;  %v2555_v63 = vpack.c.bf16 %v576_v61, %v569_v60  ;;  %v578_v1 = vld [vmem:[%s2942_s28 + $0x130] sm:$0xff]  ;;  %2554 = vmatpush1.bf16.msra.mxu0 %v2553_v58  ;;  %v633_v54 = vld [vmem:[%s2942_s28 + $0x2e8] sm:$0xff]  ;;  %v648_v58 = vld [vmem:[%s2942_s28 + $0x360] sm:$0xff]  ;;  %v2575_v61 = vpack.c.bf16 %v646_v56, %v639_v55 }
  0x35   : > { %v2760_v8 = vpop.eup %2759  ;;  %2779 = vpow2.f32 %v2499_v2  ;;  %v568_v2 = vld [vmem:[%s2942_s28 + $0xe0] sm:$0xff]  ;;  %v2595_v3 = vpack.c.bf16 %v578_v1, %v571_v0  ;;  %2594 = vmatpush1.bf16.msra.mxu1 %v2593_v62  ;;  %v641_v57 = vld [vmem:[%s2942_s28 + $0x328] sm:$0xff]  ;;  %v2613_v60 = vpack.c.bf16 %v633_v54, %v626_v52  ;;  %v638_v62 = vld [vmem:[%s2942_s28 + $0x310] sm:$0xff] }
  0x36   : > { %v2762_v9 = vpop.eup %2761  ;;  %2781 = vpow2.f32 %v2496_v4  ;;  %v575_v4 = vld [vmem:[%s2942_s28 + $0x118] sm:$0xff]  ;;  %2556 = vmatprep.subr.bf16.mxu0 %v2555_v63  ;;  %v645_v63 = vld [vmem:[%s2942_s28 + $0x348] sm:$0xff]  ;;  %v640_v0 = vld [vmem:[%s2942_s28 + $0x320] sm:$0xff]  ;;  %v2615_v1 = vpack.c.bf16 %v648_v58, %v641_v57 }
  0x37   : > { %v2764_v11 = vpop.eup %2763  ;;  %447 = vperm.xlu1 %2720, %v2756_v5   ;;  %2783 = vpow2.f32 %v2500_v6  ;;  %v570_v5 = vld [vmem:[%s2942_s28 + $0xf0] sm:$0xff]  ;;  %v577_v6 = vld [vmem:[%s2942_s28 + $0x128] sm:$0xff]  ;;  %2596 = vmatprep.subr.bf16.mxu1 %v2595_v3  ;;  %v276_v52 = vld [vmem:[%s3029_s6 + $0x80] sm:$0xff] }
  0x38   : > { %v2766_v12 = vpop.eup %2765  ;;  %442 = vperm.xlu0 %2719, %v2758_v7   ;;  %2785 = vrcp.f32 %v372_v10  ;;  %v2557_v7 = vpack.c.bf16 %v575_v4, %v568_v2  ;;  %v585_v10 = vld [vmem:[%s2942_s28 + $0x168] sm:$0xff]  ;;  %v647_v2 = vld [vmem:[%s2942_s28 + $0x358] sm:$0xff]  ;;  %v660_v4 = vld [vmem:[%s2942_s28 + $0x3c0] sm:$0xff] }
  0x39   : > { %v2768_v13 = vpop.eup %2767  ;;  %v653_v3 = vld [vmem:[%s2942_s28 + $0x388] sm:$0xff] }
  0x3a   : > { %v2770_v14 = vpop.eup %2769  ;;  %2558 = vmatpush1.bf16.msra.mxu0 %v2557_v7  ;;  %v2577_v7 = vpack.c.bf16 %v645_v63, %v638_v62  ;;  %v265_v44 = vld [vmem:[%s3029_s6 + $0x28] sm:$0xff] }
  0x3b   : > { %v2772_v15 = vpop.eup %2771  ;;  %457 = vperm.xlu1 %2720, %v2760_v8   ;;  %v583_v8 = vld [vmem:[%s2942_s28 + $0x158] sm:$0xff]  ;;  %v277_v58 = vld [vmem:[%s3029_s6 + $0x88] sm:$0xff] }
  0x3c   : > { %v2774_v16 = vpop.eup %2773  ;;  %452 = vperm.xlu0 %2719, %v2762_v9   ;;  %v376_v17 = vadd.f32 1.0, %v2772_v15  ;;  %v590_v9 = vld [vmem:[%s2942_s28 + $0x190] sm:$0xff]  ;;  %v589_v15 = vld [vmem:[%s2942_s28 + $0x188] sm:$0xff] }
  0x3d   : > { %v2776_v18 = vpop.eup %2775  ;;  %v373_v19 = vadd.f32 1.0, %v2774_v16 }
  0x3e   : > { %v2778_v20 = vpop.eup %2777  ;;  %2787 = vrcp.f32 %v376_v17  ;;  %v377_v21 = vadd.f32 1.0, %v2776_v18  ;;  %v584_v17 = vld [vmem:[%s2942_s28 + $0x160] sm:$0xff]  ;;  %v591_v18 = vld [vmem:[%s2942_s28 + $0x198] sm:$0xff] }
  0x3f   : > { %v2780_v22 = vpop.eup %2779  ;;  %467 = vperm.xlu1 %2720, %v2764_v11   ;;  %2789 = vrcp.f32 %v373_v19  ;;  %v374_v23 = vadd.f32 1.0, %v2778_v20  ;;  %v2597_v11 = vpack.c.bf16 %v577_v6, %v570_v5  ;;  %v597_v19 = vld [vmem:[%s2942_s28 + $0x1c8] sm:$0xff]  ;;  %v604_v20 = vld [vmem:[%s2942_s28 + $0x200] sm:$0xff]  ;;  %v655_v5 = vld [vmem:[%s2942_s28 + $0x398] sm:$0xff] }
  0x40   : > { %v2782_v24 = vpop.eup %2781  ;;  %462 = vperm.xlu0 %2719, %v2766_v12   ;;  %2791 = vrcp.f32 %v377_v21  ;;  %v378_v25 = vadd.f32 1.0, %v2780_v22  ;;  %v2559_v12 = vpack.c.bf16 %v590_v9, %v583_v8  ;;  %v599_v21 = vld [vmem:[%s2942_s28 + $0x1d8] sm:$0xff]  ;;  %v606_v22 = vld [vmem:[%s2942_s28 + $0x210] sm:$0xff]  ;;  %v2617_v8 = vpack.c.bf16 %v647_v2, %v640_v0  ;;  %v268_v0 = vld [vmem:[%s3029_s6 + $0x40] sm:$0xff] }
  0x41   : > { %v2784_v26 = vpop.eup %2783  ;;  %2793 = vrcp.f32 %v374_v23  ;;  %v375_v27 = vadd.f32 1.0, %v2782_v24  ;;  %2598 = vmatpush1.bf16.msra.mxu1 %v2597_v11  ;;  %v2601_v24 = vpack.c.bf16 %v591_v18, %v584_v17  ;;  %v662_v6 = vld [vmem:[%s2942_s28 + $0x3d0] sm:$0xff]  ;;  %v2579_v9 = vpack.c.bf16 %v660_v4, %v653_v3  ;;  %v659_v11 = vld [vmem:[%s2942_s28 + $0x3b8] sm:$0xff]  ;;  %v669_v17 = vld [vmem:[%s2942_s28 + $0x408] sm:$0xff] }
  0x42   : > { %v2786_v28 = vpop.eup %2785  ;;  %2795 = vrcp.f32 %v378_v25  ;;  %v379_v29 = vadd.f32 1.0, %v2784_v26  ;;  %2560 = vmatprep.subr.bf16.mxu0 %v2559_v12  ;;  %v2563_v25 = vpack.c.bf16 %v604_v20, %v597_v19  ;;  %v596_v26 = vld [vmem:[%s2942_s28 + $0x1c0] sm:$0xff]  ;;  %v654_v12 = vld [vmem:[%s2942_s28 + $0x390] sm:$0xff]  ;;  %v2862_v2 = vmov 0.0|0.0  }
  0x43   : > { %477 = vperm.xlu1 %2720, %v2768_v13   ;;  %2797 = vrcp.f32 %v375_v27  ;;  %v592_v13 = vld [vmem:[%s2942_s28 + $0x1a0] sm:$0xff]  ;;  %v603_v27 = vld [vmem:[%s2942_s28 + $0x1f8] sm:$0xff]  ;;  %v278_v3 = vld [vmem:[%s3029_s6 + $0x90] sm:$0xff] }
  0x44   : > { %472 = vperm.xlu0 %2719, %v2770_v14   ;;  %2799 = vrcp.f32 %v379_v29  ;;  %v582_v14 = vld [vmem:[%s2942_s28 + $0x150] sm:$0xff]  ;;  %v2599_v16 = vpack.c.bf16 %v592_v13, %v585_v10  ;;  %v2603_v29 = vpack.c.bf16 %v606_v22, %v599_v21  ;;  %v652_v10 = vld [vmem:[%s2942_s28 + $0x380] sm:$0xff]  ;;  %v2619_v13 = vpack.c.bf16 %v662_v6, %v655_v5  ;;  %v269_v6 = vld [vmem:[%s3029_s6 + $0x48] sm:$0xff] }
  0x45   : > { %v2561_v23 = vpack.c.bf16 %v589_v15, %v582_v14  ;;  %v661_v14 = vld [vmem:[%s2942_s28 + $0x3c8] sm:$0xff]  ;;  %v667_v15 = vld [vmem:[%s2942_s28 + $0x3f8] sm:$0xff]  ;;  %v676_v18 = vld [vmem:[%s2942_s28 + $0x440] sm:$0xff]  ;;  %v2581_v19 = vpack.c.bf16 %v659_v11, %v652_v10 }
  0x46   : > { %2600 = vmatprep.subr.bf16.mxu1 %v2599_v16  ;;  %v674_v16 = vld [vmem:[%s2942_s28 + $0x430] sm:$0xff]  ;;  %v2621_v20 = vpack.c.bf16 %v661_v14, %v654_v12 }
  0x47   : > { %482 = vperm.xlu1 %2720, %v2786_v28   ;;  %v598_v28 = vld [vmem:[%s2942_s28 + $0x1d0] sm:$0xff]  ;;  %2562 = vmatpush1.bf16.msra.mxu0 %v2561_v23  ;;  %v2583_v21 = vpack.c.bf16 %v674_v16, %v667_v15  ;;  %v673_v23 = vld [vmem:[%s2942_s28 + $0x428] sm:$0xff]  ;;  %v271_v16 = vld [vmem:[%s3029_s6 + $0x58] sm:$0xff] }
  0x48   : > { %v2788_v30 = vpop.eup %2787  ;;  %2602 = vmatpush1.bf16.msra.mxu1 %v2601_v24  ;;  %2564 = vmatprep.subr.bf16.mxu0 %v2563_v25  ;;  %v666_v22 = vld [vmem:[%s2942_s28 + $0x3f0] sm:$0xff]  ;;  %v2623_v24 = vpack.c.bf16 %v676_v18, %v669_v17  ;;  %v668_v25 = vld [vmem:[%s2942_s28 + $0x400] sm:$0xff] }
  0x49   : > { %v2790_v31 = vpop.eup %2789  ;;  %502 = vperm.xlu0 %2719, %v2788_v30   ;;  %v605_v30 = vld [vmem:[%s2942_s28 + $0x208] sm:$0xff]  ;;  %2604 = vmatprep.subr.bf16.mxu1 %v2603_v29  ;;  %v260_v29 = vld [vmem:[%s3029_s6] sm:$0xff]  ;;  %v270_v12 = vld [vmem:[%s3029_s6 + $0x50] sm:$0xff] }
  0x4a   : > { %v2792_v32 = vpop.eup %2791  ;;  %v272_v18 = vld [vmem:[%s3029_s6 + $0x60] sm:$0xff] }
  0x4b   : > { %487 = vperm.xlu1 %2720, %v2790_v31   ;;  %v2794_v33 = vpop.eup %2793  ;;  %v611_v31 = vld [vmem:[%s2942_s28 + $0x238] sm:$0xff] }
  0x4c   : > { %v2796_v34 = vpop.eup %2795 }
  0x4d   : > { %507 = vperm.xlu0 %2719, %v2792_v32   ;;  %v2798_v35 = vpop.eup %2797  ;;  %v618_v32 = vld [vmem:[%s2942_s28 + $0x270] sm:$0xff] }
  0x4e   : > { %v2800_v36 = vpop.eup %2799  ;;  %v2567_v37 = vpack.c.bf16 %v618_v32, %v611_v31  ;;  %v261_v32 = vld [vmem:[%s3029_s6 + $0x8] sm:$0xff] }
  0x4f   : > { %492 = vperm.xlu1 %2720, %v2794_v33   ;;  %v613_v33 = vld [vmem:[%s2942_s28 + $0x248] sm:$0xff] }
  0x51   : > { %512 = vperm.xlu0 %2719, %v2796_v34   ;;  %v620_v34 = vld [vmem:[%s2942_s28 + $0x280] sm:$0xff] }
  0x52   : > { %v2607_v41 = vpack.c.bf16 %v620_v34, %v613_v33  ;;  %v262_v33 = vld [vmem:[%s3029_s6 + $0x10] sm:$0xff] }
  0x53   : > { %497 = vperm.xlu1 %2720, %v2798_v35   ;;  %v2565_v35 = vpack.c.bf16 %v603_v27, %v596_v26  ;;  %v675_v26 = vld [vmem:[%s2942_s28 + $0x438] sm:$0xff]  ;;  %v2585_v27 = vpack.c.bf16 %v673_v23, %v666_v22 }
  0x55   : > { %517 = vperm.xlu0 %2719, %v2800_v36   ;;  %v2605_v36 = vpack.c.bf16 %v605_v30, %v598_v28  ;;  %2566 = vmatpush1.bf16.msra.mxu0 %v2565_v35  ;;  %v2625_v28 = vpack.c.bf16 %v675_v26, %v668_v25  ;;  %v275_v26 = vld [vmem:[%s3029_s6 + $0x78] sm:$0xff] }
  0x56   : > { %2568 = vmatprep.subr.bf16.mxu0 %v2567_v37 }
  0x57   : > { %2606 = vmatpush1.bf16.msra.mxu1 %v2605_v36 }
  0x58   : > { %2608 = vmatprep.subr.bf16.mxu1 %v2607_v41 }
  0x59   : > { %2570 = vmatpush1.bf16.msra.mxu0 %v2569_v47 }
  0x5a   : > { %2572 = vmatprep.subr.bf16.mxu0 %v2571_v49 }
  0x5b   : > { %2610 = vmatpush1.bf16.msra.mxu1 %v2609_v48 }
  0x5c   : > { %2612 = vmatprep.subr.bf16.mxu1 %v2611_v53  ;;  %v267_v53 = vld [vmem:[%s3029_s6 + $0x38] sm:$0xff] }
  0x5d   : > { %2574 = vmatpush1.bf16.msra.mxu0 %v2573_v59  ;;  %v545_v59 = vld [vmem:[%s2942_s28 + $0x28] sm:$0xff] }
  0x5e   : > { %2576 = vmatprep.subr.bf16.mxu0 %v2575_v61 }
  0x5f   : > { %2614 = vmatpush1.bf16.msra.mxu1 %v2613_v60  ;;  %v552_v60 = vld [vmem:[%s2942_s28 + $0x60] sm:$0xff] }
  0x60   : > { %2616 = vmatprep.subr.bf16.mxu1 %v2615_v1  ;;  %v2627_v62 = vpack.c.bf16 %v552_v60, %v545_v59 }
  0x61   : > { %2578 = vmatpush1.bf16.msra.mxu0 %v2577_v7 }
  0x62   : > { %2580 = vmatprep.subr.bf16.mxu0 %v2579_v9  ;;  %v279_v9 = vld [vmem:[%s3029_s6 + $0x98] sm:$0xff] }
  0x63   : > { %2618 = vmatpush1.bf16.msra.mxu1 %v2617_v8 }
  0x64   : > { %2620 = vmatprep.subr.bf16.mxu1 %v2619_v13 }
  0x65   : > { %2582 = vmatpush1.bf16.msra.mxu0 %v2581_v19 }
  0x66   : > { %2584 = vmatprep.subr.bf16.mxu0 %v2583_v21  ;;  %v273_v21 = vld [vmem:[%s3029_s6 + $0x68] sm:$0xff] }
  0x67   : > { %2622 = vmatpush1.bf16.msra.mxu1 %v2621_v20 }
  0x68   : > { %2624 = vmatprep.subr.bf16.mxu1 %v2623_v24  ;;  %v274_v24 = vld [vmem:[%s3029_s6 + $0x70] sm:$0xff] }
  0x69   : > { %2586 = vmatpush1.bf16.msra.mxu0 %v2585_v27 }
  0x6a   : > { %2628 = vmatprep.subr.bf16.mxu0 %v2627_v62  ;;  %v586_v62 = vld [vmem:[%s2942_s28 + $0x170] sm:$0xff] }
  0x6b   : > { %2626 = vmatpush1.bf16.msra.mxu1 %v2625_v28 }
  0x6c   : > { %2667 = vmatprep.subr.bf16.mxu1 %v2862_v2 }
  0xae   : > { %v433_v34 = vpop.permute.xlu1 %432 }
  0xaf   : > { %v423_v30 = vpop.permute.xlu0 %422  ;;  %v522_v37 = vmul.f32 %v433_v34, %v262_v33  ;;  %v551_v33 = vld [vmem:[%s2942_s28 + $0x58] sm:$0xff]  ;;  %v546_v34 = vld [vmem:[%s2942_s28 + $0x30] sm:$0xff] }
  0xb0   : > { %v520_v31 = vmul.f32 %v423_v30, %v260_v29 }
  0xb2   : > { %680 = vxpose.xlu1.b32.start [1/16] (narrow) %v520_v31, 80  ;;  %v438_v40 = vpop.permute.xlu1 %437 }
  0xb3   : > { %v428_v35 = vpop.permute.xlu0 %427  ;;  %v523_v41 = vmul.f32 %v438_v40, %v263_v38  ;;  %v558_v40 = vld [vmem:[%s2942_s28 + $0x90] sm:$0xff] }
  0xb4   : > { %v521_v36 = vmul.f32 %v428_v35, %v261_v32  ;;  %v544_v32 = vld [vmem:[%s2942_s28 + $0x20] sm:$0xff]  ;;  %v553_v35 = vld [vmem:[%s2942_s28 + $0x68] sm:$0xff] }
  0xb5   : > { %v2629_v38 = vpack.c.bf16 %v551_v33, %v544_v32 }
  0xb6   : > { %681 = vxpose.xlu1.b32.cont [2/16] (narrow) %v521_v36, 80  ;;  %v448_v45 = vpop.permute.xlu1 %447  ;;  %v559_v36 = vld [vmem:[%s2942_s28 + $0x98] sm:$0xff] }
  0xb7   : > { %v443_v39 = vpop.permute.xlu0 %442  ;;  %v525_v48 = vmul.f32 %v448_v45, %v265_v44  ;;  %v565_v44 = vld [vmem:[%s2942_s28 + $0xc8] sm:$0xff]  ;;  %v560_v45 = vld [vmem:[%s2942_s28 + $0xa0] sm:$0xff] }
  0xb8   : > { %v524_v47 = vmul.f32 %v443_v39, %v264_v43  ;;  %v2668_v39 = vpack.c.bf16 %v553_v35, %v546_v34  ;;  %v628_v34 = vld [vmem:[%s2942_s28 + $0x2c0] sm:$0xff] }
  0xba   : > { %682 = vxpose.xlu1.b32.cont [3/16] (narrow) %v522_v37, 80  ;;  %v458_v50 = vpop.permute.xlu1 %457  ;;  %v566_v37 = vld [vmem:[%s2942_s28 + $0xd0] sm:$0xff] }
  0xbb   : > { %v453_v42 = vpop.permute.xlu0 %452  ;;  %v527_v57 = vmul.f32 %v458_v50, %v267_v53  ;;  %v2631_v43 = vpack.c.bf16 %v566_v37, %v559_v36  ;;  %v635_v37 = vld [vmem:[%s2942_s28 + $0x2f8] sm:$0xff] }
  0xbc   : > { %v526_v54 = vmul.f32 %v453_v42, %v266_v51  ;;  %v572_v51 = vld [vmem:[%s2942_s28 + $0x100] sm:$0xff] }
  0xbe   : > { %683 = vxpose.xlu1.b32.cont [4/16] (narrow) %v523_v41, 80  ;;  %v468_v61 = vpop.permute.xlu1 %467 }
  0xbf   : > { %v463_v46 = vpop.permute.xlu0 %462  ;;  %v529_v10 = vmul.f32 %v468_v61, %v269_v6  ;;  %v608_v6 = vld [vmem:[%s2942_s28 + $0x220] sm:$0xff] }
  0xc0   : > { %v528_v4 = vmul.f32 %v463_v46, %v268_v0  ;;  %v567_v46 = vld [vmem:[%s2942_s28 + $0xd8] sm:$0xff] }
  0xc1   : > { %v2671_v50 = vpack.c.bf16 %v567_v46, %v560_v45 }
  0xc2   : > { %684 = vxpose.xlu1.b32.cont [5/16] (narrow) %v524_v47, 80  ;;  %v478_v7 = vpop.permute.xlu1 %477  ;;  %v573_v47 = vld [vmem:[%s2942_s28 + $0x108] sm:$0xff] }
  0xc3   : > { %v473_v49 = vpop.permute.xlu0 %472  ;;  %v531_v17 = vmul.f32 %v478_v7, %v271_v16  ;;  %v615_v16 = vld [vmem:[%s2942_s28 + $0x258] sm:$0xff] }
  0xc4   : > { %v530_v15 = vmul.f32 %v473_v49, %v270_v12  ;;  %v2633_v49 = vpack.c.bf16 %v565_v44, %v558_v40  ;;  %v643_v40 = vld [vmem:[%s2942_s28 + $0x338] sm:$0xff]  ;;  %v2653_v44 = vpack.c.bf16 %v635_v37, %v628_v34 }
  0xc6   : > { %685 = vxpose.xlu1.b32.cont [6/16] (narrow) %v525_v48, 80  ;;  %v483_v14 = vpop.permute.xlu1 %482  ;;  %v580_v48 = vld [vmem:[%s2942_s28 + $0x140] sm:$0xff] }
  0xc7   : > { %v532_v20 = vmul.f32 %v483_v14, %v272_v18  ;;  %v2635_v53 = vpack.c.bf16 %v580_v48, %v573_v47  ;;  %v602_v14 = vld [vmem:[%s2942_s28 + $0x1f0] sm:$0xff] }
  0xc8   : > { %v503_v55 = vpop.permute.xlu0 %502  ;;  %v642_v47 = vld [vmem:[%s2942_s28 + $0x330] sm:$0xff] }
  0xc9   : > { %v536_v56 = vmul.f32 %v503_v55, %v276_v52  ;;  %v574_v55 = vld [vmem:[%s2942_s28 + $0x110] sm:$0xff] }
  0xca   : > { %686 = vxpose.xlu1.b32.cont [7/16] (narrow) %v526_v54, 80  ;;  %v488_v19 = vpop.permute.xlu1 %487  ;;  %v579_v54 = vld [vmem:[%s2942_s28 + $0x138] sm:$0xff] }
  0xcb   : > { %712 = vxpose.xlu0.b32.start [1/4] (short) (narrow) %v536_v56, 80  ;;  %v533_v23 = vmul.f32 %v488_v19, %v273_v21  ;;  %v581_v56 = vld [vmem:[%s2942_s28 + $0x148] sm:$0xff]  ;;  %v2637_v60 = vpack.c.bf16 %v579_v54, %v572_v51  ;;  %v644_v51 = vld [vmem:[%s2942_s28 + $0x340] sm:$0xff] }
  0xcc   : > { %v508_v63 = vpop.permute.xlu0 %507  ;;  %v2674_v61 = vpack.c.bf16 %v581_v56, %v574_v55  ;;  %v657_v54 = vld [vmem:[%s2942_s28 + $0x3a8] sm:$0xff]  ;;  %v664_v55 = vld [vmem:[%s2942_s28 + $0x3e0] sm:$0xff] }
  0xcd   : > { %v537_v1 = vmul.f32 %v508_v63, %v277_v58  ;;  %v594_v58 = vld [vmem:[%s2942_s28 + $0x1b0] sm:$0xff] }
  0xce   : > { %687 = vxpose.xlu1.b32.cont [8/16] (narrow) %v527_v57, 80  ;;  %v493_v22 = vpop.permute.xlu1 %492  ;;  %v587_v57 = vld [vmem:[%s2942_s28 + $0x178] sm:$0xff] }
  0xcf   : > { %713 = vxpose.xlu0.b32.cont [2/4] (short) (narrow) %v537_v1, 80  ;;  %v534_v25 = vmul.f32 %v493_v22, %v274_v24  ;;  %v2639_v0 = vpack.c.bf16 %v594_v58, %v587_v57  ;;  %v593_v1 = vld [vmem:[%s2942_s28 + $0x1a8] sm:$0xff]  ;;  %v616_v24 = vld [vmem:[%s2942_s28 + $0x260] sm:$0xff] }
  0xd0   : > { %v513_v5 = vpop.permute.xlu0 %512  ;;  %v2641_v7 = vpack.c.bf16 %v593_v1, %v586_v62  ;;  %v656_v58 = vld [vmem:[%s2942_s28 + $0x3a0] sm:$0xff]  ;;  %v663_v62 = vld [vmem:[%s2942_s28 + $0x3d8] sm:$0xff]  ;;  %v665_v1 = vld [vmem:[%s2942_s28 + $0x3e8] sm:$0xff] }
  0xd1   : > { %v538_v8 = vmul.f32 %v513_v5, %v278_v3  ;;  %v588_v3 = vld [vmem:[%s2942_s28 + $0x180] sm:$0xff]  ;;  %v601_v5 = vld [vmem:[%s2942_s28 + $0x1e8] sm:$0xff] }
  0xd2   : > { %688 = vxpose.xlu1.b32.cont [9/16] (narrow) %v528_v4, 80  ;;  %v498_v27 = vpop.permute.xlu1 %497  ;;  %v595_v4 = vld [vmem:[%s2942_s28 + $0x1b8] sm:$0xff]  ;;  %v2643_v12 = vpack.c.bf16 %v608_v6, %v601_v5  ;;  %v678_v5 = vld [vmem:[%s2942_s28 + $0x450] sm:$0xff]  ;;  %v2661_v6 = vpack.c.bf16 %v663_v62, %v656_v58 }
  0xd3   : > { %714 = vxpose.xlu0.b32.cont [3/4] (short) (narrow) %v538_v8, 80  ;;  %v535_v28 = vmul.f32 %v498_v27, %v275_v26  ;;  %v2677_v8 = vpack.c.bf16 %v595_v4, %v588_v3  ;;  %v629_v27 = vld [vmem:[%s2942_s28 + $0x2c8] sm:$0xff]  ;;  %v671_v4 = vld [vmem:[%s2942_s28 + $0x418] sm:$0xff] }
  0xd4   : > { %v518_v11 = vpop.permute.xlu0 %517 }
  0xd5   : > { %v539_v13 = vmul.f32 %v518_v11, %v279_v9  ;;  %v600_v9 = vld [vmem:[%s2942_s28 + $0x1e0] sm:$0xff] }
  0xd6   : > { %689 = vxpose.xlu1.b32.cont [10/16] (narrow) %v529_v10, 80 }
  0xd7   : > { %715 = vxpose.xlu0.b32.end [4/4] (short) (narrow) %v539_v13, 80  ;;  %v607_v13 = vld [vmem:[%s2942_s28 + $0x218] sm:$0xff] }
  0xd8   : > { %v2645_v18 = vpack.c.bf16 %v607_v13, %v600_v9  ;;  %v677_v13 = vld [vmem:[%s2942_s28 + $0x448] sm:$0xff] }
  0xda   : > { %690 = vxpose.xlu1.b32.cont [11/16] (narrow) %v530_v15, 80  ;;  %v609_v15 = vld [vmem:[%s2942_s28 + $0x228] sm:$0xff] }
  0xdb   : > { %v2680_v19 = vpack.c.bf16 %v609_v15, %v602_v14  ;;  %v672_v14 = vld [vmem:[%s2942_s28 + $0x420] sm:$0xff]  ;;  %v679_v15 = vld [vmem:[%s2942_s28 + $0x458] sm:$0xff] }
  0xde   : > { %691 = vxpose.xlu1.b32.cont [12/16] (narrow) %v531_v17, 80  ;;  %v622_v17 = vld [vmem:[%s2942_s28 + $0x290] sm:$0xff] }
  0xdf   : > { %v2647_v22 = vpack.c.bf16 %v622_v17, %v615_v16 }
  0xe2   : > { %692 = vxpose.xlu1.b32.cont [13/16] (narrow) %v532_v20, 80  ;;  %v614_v20 = vld [vmem:[%s2942_s28 + $0x250] sm:$0xff] }
  0xe6   : > { %693 = vxpose.xlu1.b32.cont [14/16] (narrow) %v533_v23, 80  ;;  %v621_v23 = vld [vmem:[%s2942_s28 + $0x288] sm:$0xff] }
  0xe7   : > { %v2649_v32 = vpack.c.bf16 %v621_v23, %v614_v20 }
  0xea   : > { %694 = vxpose.xlu1.b32.cont [15/16] (narrow) %v534_v25, 80  ;;  %v623_v25 = vld [vmem:[%s2942_s28 + $0x298] sm:$0xff] }
  0xeb   : > { %v2683_v33 = vpack.c.bf16 %v623_v25, %v616_v24 }
  0xee   : > { %695 = vxpose.xlu1.b32.end [16/16] (narrow) %v535_v28, 80  ;;  %v636_v28 = vld [vmem:[%s2942_s28 + $0x300] sm:$0xff] }
  0xef   : > { %v2651_v36 = vpack.c.bf16 %v636_v28, %v629_v27 }
 0x132   : > { %v3054_v29 = vpop.trf.xlu1 }
 0x136   : > { %v3056_v30 = vpop.trf.xlu1 }
 0x13a   : > { %v3058_v31 = vpop.trf.xlu1 }
 0x13e   : > { %v3067_v41 = vpop.trf.xlu1 }
 0x142   : > { %v3095_v59 = vpop.trf.xlu1 }
 0x146   : > { %v3115_v10 = vpop.trf.xlu1 }
 0x14a   : > { %v3142_v26 = vpop.trf.xlu1 }
 0x14b   : > { %v3069_v42 = vpop.trf.xlu0 }
 0x14c   : > { %2501 = vmatprep.mubr.msk.f32.mxu0 %vm744_vm0, %v3069_v42  ;;  %2511 = vmatprep.mubr.msk.f32.mxu1 %vm744_vm0, %v3069_v42 }
 0x14d   : > { %840 = vmatmul.mubr.f32.vlgmr.msra.gmra.mrb[0].mxu0 %v3054_v29  ;;  %965 = vmatmul.mubr.f32.vlgmr.msra.gmra.mrb[0].mxu1 %v3054_v29 }
 0x14e   : > { %2630 = vmatpush1.bf16.msra.mxu0 %v2629_v38  ;;  %2669 = vmatpush1.bf16.msra.mxu1 %v2668_v39  ;;  %v630_v38 = vld [vmem:[%s2942_s28 + $0x2d0] sm:$0xff]  ;;  %v637_v39 = vld [vmem:[%s2942_s28 + $0x308] sm:$0xff]  ;;  %v3163_v46 = vpop.trf.xlu1 }
 0x14f   : > { %v3083_v52 = vpop.trf.xlu0  ;;  %2632 = vmatprep.subr.bf16.mxu0 %v2631_v43  ;;  %2670 = vmatprep.subr.bf16.mxu1 %v2862_v2  ;;  %v650_v43 = vld [vmem:[%s2942_s28 + $0x370] sm:$0xff]  ;;  %v2686_v45 = vpack.c.bf16 %v637_v39, %v630_v38 }
 0x150   : > { %2502 = vmatprep.mubr.msk.f32.mxu0 %vm744_vm0, %v3083_v52  ;;  %2512 = vmatprep.mubr.msk.f32.mxu1 %vm744_vm0, %v3083_v52 }
 0x151   : > { %846 = vmatmul.mubr.f32.gmra.mrb[2].mxu0 %v3056_v30  ;;  %971 = vmatmul.mubr.f32.gmra.mrb[2].mxu1 %v3056_v30 }
 0x152   : > { %2634 = vmatpush1.bf16.msra.mxu0 %v2633_v49  ;;  %2672 = vmatpush1.bf16.msra.mxu1 %v2671_v50  ;;  %v2655_v49 = vpack.c.bf16 %v650_v43, %v643_v40  ;;  %v649_v50 = vld [vmem:[%s2942_s28 + $0x368] sm:$0xff]  ;;  %v3191_v3 = vpop.trf.xlu1 }
 0x153   : > { %v3100_v63 = vpop.trf.xlu0  ;;  %2636 = vmatprep.subr.bf16.mxu0 %v2635_v53  ;;  %2673 = vmatprep.subr.bf16.mxu1 %v2862_v2  ;;  %v651_v53 = vld [vmem:[%s2942_s28 + $0x378] sm:$0xff]  ;;  %v2657_v56 = vpack.c.bf16 %v649_v50, %v642_v47 }
 0x154   : > { %2503 = vmatprep.mubr.msk.f32.mxu0 %vm744_vm0, %v3100_v63  ;;  %2513 = vmatprep.mubr.msk.f32.mxu1 %vm744_vm0, %v3100_v63  ;;  %v2689_v57 = vpack.c.bf16 %v651_v53, %v644_v51 }
 0x155   : > { %852 = vmatmul.mubr.f32.gmra.mrb[4].mxu0 %v3058_v31  ;;  %977 = vmatmul.mubr.f32.gmra.mrb[4].mxu1 %v3058_v31 }
 0x156   : > { %2638 = vmatpush1.bf16.msra.mxu0 %v2637_v60  ;;  %2675 = vmatpush1.bf16.msra.mxu1 %v2674_v61  ;;  %v2659_v61 = vpack.c.bf16 %v664_v55, %v657_v54  ;;  %v705_v16 = vpop.trf.xlu1 }
 0x157   : > { %v3117_v11 = vpop.trf.xlu0  ;;  %2640 = vmatprep.subr.bf16.mxu0 %v2639_v0  ;;  %2676 = vmatprep.subr.bf16.mxu1 %v2862_v2  ;;  %v658_v0 = vld [vmem:[%s2942_s28 + $0x3b0] sm:$0xff] }
 0x158   : > { %2504 = vmatprep.mubr.msk.f32.mxu0 %vm744_vm0, %v3117_v11  ;;  %2514 = vmatprep.mubr.msk.f32.mxu1 %vm744_vm0, %v3117_v11 }
 0x159   : > { %858 = vmatmul.mubr.f32.gmra.mrb[6].mxu0 %v3067_v41  ;;  %983 = vmatmul.mubr.f32.gmra.mrb[6].mxu1 %v3067_v41 }
 0x15a   : > { %2642 = vmatpush1.bf16.msra.mxu0 %v2641_v7  ;;  %2678 = vmatpush1.bf16.msra.mxu1 %v2677_v8  ;;  %v2692_v7 = vpack.c.bf16 %v665_v1, %v658_v0  ;;  %v670_v8 = vld [vmem:[%s2942_s28 + $0x410] sm:$0xff] }
 0x15b   : > { %v3132_v21 = vpop.trf.xlu0  ;;  %2644 = vmatprep.subr.bf16.mxu0 %v2643_v12  ;;  %2679 = vmatprep.subr.bf16.mxu1 %v2862_v2  ;;  %v2663_v12 = vpack.c.bf16 %v678_v5, %v671_v4  ;;  %v2665_v17 = vpack.c.bf16 %v677_v13, %v670_v8 }
 0x15c   : > { %2505 = vmatprep.mubr.msk.f32.mxu0 %vm744_vm0, %v3132_v21  ;;  %2515 = vmatprep.mubr.msk.f32.mxu1 %vm744_vm0, %v3132_v21 }
 0x15d   : > { %864 = vmatmul.mubr.f32.gmra.mrb[8].mxu0 %v3095_v59  ;;  %989 = vmatmul.mubr.f32.gmra.mrb[8].mxu1 %v3095_v59 }
 0x15e   : > { %2646 = vmatpush1.bf16.msra.mxu0 %v2645_v18  ;;  %2681 = vmatpush1.bf16.msra.mxu1 %v2680_v19  ;;  %v2695_v18 = vpack.c.bf16 %v679_v15, %v672_v14 }
 0x15f   : > { %v3149_v35 = vpop.trf.xlu0  ;;  %2648 = vmatprep.subr.bf16.mxu0 %v2647_v22  ;;  %2682 = vmatprep.subr.bf16.mxu1 %v2862_v2 }
 0x160   : > { %2506 = vmatprep.mubr.msk.f32.mxu0 %vm744_vm0, %v3149_v35  ;;  %2516 = vmatprep.mubr.msk.f32.mxu1 %vm744_vm0, %v3149_v35 }
 0x161   : > { %870 = vmatmul.mubr.f32.gmra.mrb[10].mxu0 %v3115_v10  ;;  %995 = vmatmul.mubr.f32.gmra.mrb[10].mxu1 %v3115_v10 }
 0x162   : > { %2650 = vmatpush1.bf16.msra.mxu0 %v2649_v32  ;;  %2684 = vmatpush1.bf16.msra.mxu1 %v2683_v33 }
 0x163   : > { %v3166_v48 = vpop.trf.xlu0  ;;  %2652 = vmatprep.subr.bf16.mxu0 %v2651_v36  ;;  %2685 = vmatprep.subr.bf16.mxu1 %v2862_v2 }
 0x164   : > { %2507 = vmatprep.mubr.msk.f32.mxu0 %vm744_vm0, %v3166_v48  ;;  %2517 = vmatprep.mubr.msk.f32.mxu1 %vm744_vm0, %v3166_v48 }
 0x165   : > { %876 = vmatmul.mubr.f32.gmra.mrb[12].mxu0 %v3142_v26  ;;  %1001 = vmatmul.mubr.f32.gmra.mrb[12].mxu1 %v3142_v26 }
 0x166   : > { %2654 = vmatpush1.bf16.msra.mxu0 %v2653_v44  ;;  %2687 = vmatpush1.bf16.msra.mxu1 %v2686_v45 }
 0x167   : > { %v3181_v60 = vpop.trf.xlu0  ;;  %2656 = vmatprep.subr.bf16.mxu0 %v2655_v49  ;;  %2688 = vmatprep.subr.bf16.mxu1 %v2862_v2 }
 0x168   : > { %2508 = vmatprep.mubr.msk.f32.mxu0 %vm744_vm0, %v3181_v60  ;;  %2518 = vmatprep.mubr.msk.f32.mxu1 %vm744_vm0, %v3181_v60 }
 0x169   : > { %882 = vmatmul.mubr.f32.gmra.mrb[14].mxu0 %v3163_v46  ;;  %1007 = vmatmul.mubr.f32.gmra.mrb[14].mxu1 %v3163_v46 }
 0x16a   : > { %2658 = vmatpush1.bf16.msra.mxu0 %v2657_v56  ;;  %2690 = vmatpush1.bf16.msra.mxu1 %v2689_v57 }
 0x16b   : > { %v736_v9 = vpop.trf.xlu0  ;;  %2660 = vmatprep.subr.bf16.mxu0 %v2659_v61  ;;  %2691 = vmatprep.subr.bf16.mxu1 %v2862_v2 }
 0x16c   : > { %2509 = vmatprep.mubr.msk.f32.mxu0 %vm744_vm0, %v736_v9  ;;  %2519 = vmatprep.mubr.msk.f32.mxu1 %vm744_vm0, %v736_v9 }
 0x16d   : > { %888 = vmatmul.mubr.f32.gmra.mrb[16].mxu0 %v3191_v3  ;;  %1013 = vmatmul.mubr.f32.gmra.mrb[16].mxu1 %v3191_v3 }
 0x16e   : > { %2662 = vmatpush1.bf16.msra.mxu0 %v2661_v6  ;;  %2693 = vmatpush1.bf16.msra.mxu1 %v2692_v7 }
 0x16f   : > { %v737_v19 = vpop.trf.xlu0  ;;  %2664 = vmatprep.subr.bf16.mxu0 %v2663_v12  ;;  %2694 = vmatprep.subr.bf16.mxu1 %v2862_v2 }
 0x170   : > { %2510 = vmatprep.mubr.msk.f32.mxu0 %vm744_vm0, %v737_v19  ;;  %2520 = vmatprep.mubr.msk.f32.mxu1 %vm744_vm0, %v737_v19 }
 0x171   : > { %894 = vmatmul.mubr.f32.gmra.mrb[18].mxu0 %v705_v16  ;;  %1019 = vmatmul.mubr.f32.gmra.mrb[18].mxu1 %v705_v16 }
 0x172   : > { %2666 = vmatpush1.bf16.msra.mxu0 %v2665_v17  ;;  %2696 = vmatpush1.bf16.msra.mxu1 %v2695_v18 }
 0x173   : > { %2521 = vmatprep.mubr.msk.f32.mxu0 %vm744_vm0, %v3069_v42  ;;  %2531 = vmatprep.mubr.msk.f32.mxu1 %vm744_vm0, %v3069_v42 }
 0x175   : > { %1090 = vmatmul.mubr.f32.vlgmr.msra.gmra.mrb[20].mxu0 %v3054_v29  ;;  %1215 = vmatmul.mubr.f32.vlgmr.msra.gmra.mrb[20].mxu1 %v3054_v29 }
 0x176   : > { %2522 = vmatprep.mubr.msk.f32.mxu0 %vm744_vm0, %v3083_v52  ;;  %2532 = vmatprep.mubr.msk.f32.mxu1 %vm744_vm0, %v3083_v52 }
 0x179   : > { %1096 = vmatmul.mubr.f32.gmra.mrb[22].mxu0 %v3056_v30  ;;  %1220 = vmatmul.mubr.f32.gmra.mrb[22].mxu1 %v3056_v30 }
 0x17a   : > { %2523 = vmatprep.mubr.msk.f32.mxu0 %vm744_vm0, %v3100_v63  ;;  %2533 = vmatprep.mubr.msk.f32.mxu1 %vm744_vm0, %v3100_v63 }
 0x17d   : > { %1102 = vmatmul.mubr.f32.gmra.mrb[24].mxu0 %v3058_v31  ;;  %1225 = vmatmul.mubr.f32.gmra.mrb[24].mxu1 %v3058_v31 }
 0x17e   : > { %2524 = vmatprep.mubr.msk.f32.mxu0 %vm744_vm0, %v3117_v11  ;;  %2534 = vmatprep.mubr.msk.f32.mxu1 %vm744_vm0, %v3117_v11 }
 0x181   : > { %1108 = vmatmul.mubr.f32.gmra.mrb[26].mxu0 %v3067_v41  ;;  %1230 = vmatmul.mubr.f32.gmra.mrb[26].mxu1 %v3067_v41 }
 0x182   : > { %2525 = vmatprep.mubr.msk.f32.mxu0 %vm744_vm0, %v3132_v21  ;;  %2535 = vmatprep.mubr.msk.f32.mxu1 %vm744_vm0, %v3132_v21 }
 0x185   : > { %1114 = vmatmul.mubr.f32.gmra.mrb[28].mxu0 %v3095_v59  ;;  %1235 = vmatmul.mubr.f32.gmra.mrb[28].mxu1 %v3095_v59 }
 0x186   : > { %2526 = vmatprep.mubr.msk.f32.mxu0 %vm744_vm0, %v3149_v35  ;;  %2536 = vmatprep.mubr.msk.f32.mxu1 %vm744_vm0, %v3149_v35 }
 0x189   : > { %1120 = vmatmul.mubr.f32.gmra.mrb[30].mxu0 %v3115_v10  ;;  %1240 = vmatmul.mubr.f32.gmra.mrb[30].mxu1 %v3115_v10 }
 0x18a   : > { %2527 = vmatprep.mubr.msk.f32.mxu0 %vm744_vm0, %v3166_v48  ;;  %2537 = vmatprep.mubr.msk.f32.mxu1 %vm744_vm0, %v3166_v48 }
 0x18d   : > { %1126 = vmatmul.mubr.f32.gmra.mrb[32].mxu0 %v3142_v26  ;;  %1245 = vmatmul.mubr.f32.gmra.mrb[32].mxu1 %v3142_v26 }
 0x18e   : > { %2528 = vmatprep.mubr.msk.f32.mxu0 %vm744_vm0, %v3181_v60  ;;  %2538 = vmatprep.mubr.msk.f32.mxu1 %vm744_vm0, %v3181_v60 }
 0x191   : > { %1132 = vmatmul.mubr.f32.gmra.mrb[34].mxu0 %v3163_v46  ;;  %1250 = vmatmul.mubr.f32.gmra.mrb[34].mxu1 %v3163_v46 }
 0x192   : > { %2529 = vmatprep.mubr.msk.f32.mxu0 %vm744_vm0, %v736_v9  ;;  %2539 = vmatprep.mubr.msk.f32.mxu1 %vm744_vm0, %v736_v9 }
 0x195   : > { %1138 = vmatmul.mubr.f32.gmra.mrb[36].mxu0 %v3191_v3  ;;  %1255 = vmatmul.mubr.f32.gmra.mrb[36].mxu1 %v3191_v3 }
 0x196   : > { %2530 = vmatprep.mubr.msk.f32.mxu0 %vm744_vm0, %v737_v19  ;;  %2540 = vmatprep.mubr.msk.f32.mxu1 %vm744_vm0, %v737_v19 }
 0x199   : > { %1144 = vmatmul.mubr.f32.gmra.mrb[38].mxu0 %v705_v16  ;;  %1260 = vmatmul.mubr.f32.gmra.mrb[38].mxu1 %v705_v16 }
 0x220   : > { %v3263_v2 = vpop.f32.mrb[0].mxu0  ;;  %v3265_v29 = vpop.f32.mrb[0].mxu1 }
 0x221   : > { %4546 = vst [vmem:[#allocation5_spill] sm:$0xff] %v3263_v2  ;;  %4547 = vst [vmem:[#allocation6_spill] sm:$0xff] %v3265_v29  ;;  %v3267_v30 = vpop.f32.mrb[1].mxu0  ;;  %v3269_v31 = vpop.f32.mrb[1].mxu1 }
 0x222   : > { %4548 = vst [vmem:[#allocation7_spill] sm:$0xff] %v3267_v30  ;;  %1269 = vst [vmem:[#allocation2] sm:$0xff] (!%p2541_p4), %v3263_v2 }
 0x223   : > { %1270 = vst [vmem:[#allocation2 + $0x8] sm:$0xff] (!%p2541_p4), %v3267_v30  ;;  %1271 = vst [vmem:[#allocation2 + $0x10] sm:$0xff] (!%p2541_p4), %v3265_v29 }
 0x224   : > { %v3271_v41 = vpop.f32.mrb[2].mxu0  ;;  %v3273_v42 = vpop.f32.mrb[2].mxu1  ;;  %1272 = vst [vmem:[#allocation2 + $0x18] sm:$0xff] (!%p2541_p4), %v3269_v31 }
 0x225   : > { %v3275_v52 = vpop.f32.mrb[3].mxu0  ;;  %v3277_v59 = vpop.f32.mrb[3].mxu1  ;;  %1277 = vst [vmem:[#allocation2 + $0x38] sm:$0xff] (!%p2541_p4), %v3271_v41  ;;  %1279 = vst [vmem:[#allocation2 + $0x48] sm:$0xff] (!%p2541_p4), %v3273_v42 }
 0x226   : > { %1278 = vst [vmem:[#allocation2 + $0x40] sm:$0xff] (!%p2541_p4), %v3275_v52  ;;  %1280 = vst [vmem:[#allocation2 + $0x50] sm:$0xff] (!%p2541_p4), %v3277_v59 }
 0x228   : > { %v3279_v63 = vpop.f32.mrb[4].mxu0  ;;  %v3281_v10 = vpop.f32.mrb[4].mxu1 }
 0x229   : > { %v3283_v11 = vpop.f32.mrb[5].mxu0  ;;  %v3285_v20 = vpop.f32.mrb[5].mxu1  ;;  %1284 = vst [vmem:[#allocation2 + $0x70] sm:$0xff] (!%p2541_p4), %v3279_v63  ;;  %1286 = vst [vmem:[#allocation2 + $0x80] sm:$0xff] (!%p2541_p4), %v3281_v10 }
 0x22a   : > { %1285 = vst [vmem:[#allocation2 + $0x78] sm:$0xff] (!%p2541_p4), %v3283_v11  ;;  %1287 = vst [vmem:[#allocation2 + $0x88] sm:$0xff] (!%p2541_p4), %v3285_v20 }
 0x22c   : > { %v3287_v21 = vpop.f32.mrb[6].mxu0  ;;  %v3289_v22 = vpop.f32.mrb[6].mxu1 }
 0x22d   : > { %v3291_v23 = vpop.f32.mrb[7].mxu0  ;;  %v3293_v24 = vpop.f32.mrb[7].mxu1  ;;  %1291 = vst [vmem:[#allocation2 + $0xa8] sm:$0xff] (!%p2541_p4), %v3287_v21  ;;  %1293 = vst [vmem:[#allocation2 + $0xb8] sm:$0xff] (!%p2541_p4), %v3289_v22 }
 0x22e   : > { %1292 = vst [vmem:[#allocation2 + $0xb0] sm:$0xff] (!%p2541_p4), %v3291_v23  ;;  %1294 = vst [vmem:[#allocation2 + $0xc0] sm:$0xff] (!%p2541_p4), %v3293_v24 }
 0x230   : > { %v3295_v25 = vpop.f32.mrb[8].mxu0  ;;  %v3297_v26 = vpop.f32.mrb[8].mxu1 }
 0x231   : > { %v3299_v27 = vpop.f32.mrb[9].mxu0  ;;  %v3301_v28 = vpop.f32.mrb[9].mxu1  ;;  %1298 = vst [vmem:[#allocation2 + $0xe0] sm:$0xff] (!%p2541_p4), %v3295_v25  ;;  %1300 = vst [vmem:[#allocation2 + $0xf0] sm:$0xff] (!%p2541_p4), %v3297_v26 }
 0x232   : > { %1299 = vst [vmem:[#allocation2 + $0xe8] sm:$0xff] (!%p2541_p4), %v3299_v27  ;;  %1301 = vst [vmem:[#allocation2 + $0xf8] sm:$0xff] (!%p2541_p4), %v3301_v28 }
 0x234   : > { %v3303_v32 = vpop.f32.mrb[10].mxu0  ;;  %v3305_v33 = vpop.f32.mrb[10].mxu1 }
 0x235   : > { %v3307_v34 = vpop.f32.mrb[11].mxu0  ;;  %v3309_v35 = vpop.f32.mrb[11].mxu1  ;;  %1305 = vst [vmem:[#allocation2 + $0x118] sm:$0xff] (!%p2541_p4), %v3303_v32  ;;  %1307 = vst [vmem:[#allocation2 + $0x128] sm:$0xff] (!%p2541_p4), %v3305_v33 }
 0x236   : > { %1306 = vst [vmem:[#allocation2 + $0x120] sm:$0xff] (!%p2541_p4), %v3307_v34  ;;  %1308 = vst [vmem:[#allocation2 + $0x130] sm:$0xff] (!%p2541_p4), %v3309_v35 }
 0x238   : > { %v3311_v36 = vpop.f32.mrb[12].mxu0  ;;  %v3313_v37 = vpop.f32.mrb[12].mxu1 }
 0x239   : > { %v3315_v38 = vpop.f32.mrb[13].mxu0  ;;  %v3317_v39 = vpop.f32.mrb[13].mxu1  ;;  %1312 = vst [vmem:[#allocation2 + $0x150] sm:$0xff] (!%p2541_p4), %v3311_v36  ;;  %1314 = vst [vmem:[#allocation2 + $0x160] sm:$0xff] (!%p2541_p4), %v3313_v37 }
 0x23a   : > { %1313 = vst [vmem:[#allocation2 + $0x158] sm:$0xff] (!%p2541_p4), %v3315_v38  ;;  %1315 = vst [vmem:[#allocation2 + $0x168] sm:$0xff] (!%p2541_p4), %v3317_v39 }
 0x23c   : > { %v3319_v40 = vpop.f32.mrb[14].mxu0  ;;  %v3321_v43 = vpop.f32.mrb[14].mxu1 }
 0x23d   : > { %v3323_v44 = vpop.f32.mrb[15].mxu0  ;;  %v3325_v45 = vpop.f32.mrb[15].mxu1  ;;  %1319 = vst [vmem:[#allocation2 + $0x188] sm:$0xff] (!%p2541_p4), %v3319_v40  ;;  %1321 = vst [vmem:[#allocation2 + $0x198] sm:$0xff] (!%p2541_p4), %v3321_v43 }
 0x23e   : > { %4549 = vst [vmem:[#allocation8_spill] sm:$0xff] %v3325_v45  ;;  %1320 = vst [vmem:[#allocation2 + $0x190] sm:$0xff] (!%p2541_p4), %v3323_v44 }
 0x23f   : > { %1322 = vst [vmem:[#allocation2 + $0x1a0] sm:$0xff] (!%p2541_p4), %v3325_v45 }
 0x240   : > { %v3327_v46 = vpop.f32.mrb[16].mxu0  ;;  %v3329_v47 = vpop.f32.mrb[16].mxu1 }
 0x241   : > { %4550 = vst [vmem:[#allocation9_spill] sm:$0xff] %v3327_v46  ;;  %4551 = vst [vmem:[#allocation10_spill] sm:$0xff] %v3329_v47  ;;  %v3331_v48 = vpop.f32.mrb[17].mxu0  ;;  %v3333_v49 = vpop.f32.mrb[17].mxu1 }
 0x242   : > { %4552 = vst [vmem:[#allocation11_spill] sm:$0xff] %v3331_v48  ;;  %4553 = vst [vmem:[#allocation12_spill] sm:$0xff] %v3333_v49 }
 0x243   : > { %1326 = vst [vmem:[#allocation2 + $0x1c0] sm:$0xff] (!%p2541_p4), %v3327_v46  ;;  %1327 = vst [vmem:[#allocation2 + $0x1c8] sm:$0xff] (!%p2541_p4), %v3331_v48 }
 0x244   : > { %v3335_v50 = vpop.f32.mrb[18].mxu0  ;;  %v3337_v51 = vpop.f32.mrb[18].mxu1  ;;  %1328 = vst [vmem:[#allocation2 + $0x1d0] sm:$0xff] (!%p2541_p4), %v3329_v47  ;;  %1329 = vst [vmem:[#allocation2 + $0x1d8] sm:$0xff] (!%p2541_p4), %v3333_v49 }
 0x245   : > { %4554 = vst [vmem:[#allocation13_spill] sm:$0xff] %v3335_v50  ;;  %4555 = vst [vmem:[#allocation14_spill] sm:$0xff] %v3337_v51  ;;  %v3339_v53 = vpop.f32.mrb[19].mxu0  ;;  %v3341_v54 = vpop.f32.mrb[19].mxu1 }
 0x246   : > { %4556 = vst [vmem:[#allocation15_spill] sm:$0xff] %v3339_v53  ;;  %4557 = vst [vmem:[#allocation16_spill] sm:$0xff] %v3341_v54 }
 0x247   : > { %1333 = vst [vmem:[#allocation2 + $0x1f8] sm:$0xff] (!%p2541_p4), %v3335_v50  ;;  %1334 = vst [vmem:[#allocation2 + $0x200] sm:$0xff] (!%p2541_p4), %v3339_v53 }
 0x248   : > { %v3343_v55 = vpop.f32.mrb[20].mxu0  ;;  %v3345_v56 = vpop.f32.mrb[20].mxu1 }
 0x249   : > { %4558 = vst [vmem:[#allocation17_spill] sm:$0xff] %v3345_v56  ;;  %v3347_v57 = vpop.f32.mrb[21].mxu0  ;;  %v1218_v58 = vpop.f32.mrb[21].mxu1  ;;  %1273 = vst [vmem:[#allocation2 + $0x20] sm:$0xff] (!%p2541_p4), %v3343_v55 }
 0x24a   : > { %4559 = vst [vmem:[#allocation18_spill] sm:$0xff] %v3347_v57  ;;  %1274 = vst [vmem:[#allocation2 + $0x28] sm:$0xff] (!%p2541_p4), %v3347_v57 }
 0x24c   : > { %v3349_v60 = vpop.f32.mrb[22].mxu0  ;;  %v3351_v61 = vpop.f32.mrb[22].mxu1 }
 0x24d   : > { %4560 = vst [vmem:[#allocation19_spill] sm:$0xff] %v3351_v61  ;;  %v3353_v62 = vpop.f32.mrb[23].mxu0  ;;  %v1223_v0 = vpop.f32.mrb[23].mxu1  ;;  %1281 = vst [vmem:[#allocation2 + $0x58] sm:$0xff] (!%p2541_p4), %v3349_v60 }
 0x24e   : > { %1282 = vst [vmem:[#allocation2 + $0x60] sm:$0xff] (!%p2541_p4), %v3353_v62 }
 0x250   : > { %v3355_v1 = vpop.f32.mrb[24].mxu0  ;;  %v3357_v3 = vpop.f32.mrb[24].mxu1 }
 0x251   : > { %4561 = vst [vmem:[#allocation20_spill] sm:$0xff] %v3357_v3  ;;  %v3359_v4 = vpop.f32.mrb[25].mxu0  ;;  %v1228_v5 = vpop.f32.mrb[25].mxu1  ;;  %1288 = vst [vmem:[#allocation2 + $0x90] sm:$0xff] (!%p2541_p4), %v3355_v1 }
 0x252   : > { %1289 = vst [vmem:[#allocation2 + $0x98] sm:$0xff] (!%p2541_p4), %v3359_v4 }
 0x254   : > { %v3361_v6 = vpop.f32.mrb[26].mxu0  ;;  %v3363_v7 = vpop.f32.mrb[26].mxu1  ;;  %v4579_v49 = vld [vmem:[#allocation19_spill] sm:$0xff] (!%p2541_p4) }
 0x255   : > { %4562 = vst [vmem:[#allocation21_spill] sm:$0xff] %v3363_v7  ;;  %v3365_v8 = vpop.f32.mrb[27].mxu0  ;;  %v1233_v9 = vpop.f32.mrb[27].mxu1  ;;  %1295 = vst [vmem:[#allocation2 + $0xc8] sm:$0xff] (!%p2541_p4), %v3361_v6 }
 0x256   : > { %1296 = vst [vmem:[#allocation2 + $0xd0] sm:$0xff] (!%p2541_p4), %v3365_v8  ;;  %1283 = vst.msk [vmem:[#allocation2 + $0x68] sm:$0xff] (!%p2541_p4), %vm1275_vm1, %v4579_v49 }
 0x258   : > { %v3367_v12 = vpop.f32.mrb[28].mxu0  ;;  %v3369_v13 = vpop.f32.mrb[28].mxu1 }
 0x259   : > { %4563 = vst [vmem:[#allocation22_spill] sm:$0xff] %v3369_v13  ;;  %v3371_v14 = vpop.f32.mrb[29].mxu0  ;;  %v1238_v15 = vpop.f32.mrb[29].mxu1  ;;  %1302 = vst [vmem:[#allocation2 + $0x100] sm:$0xff] (!%p2541_p4), %v3367_v12 }
 0x25a   : > { %1303 = vst [vmem:[#allocation2 + $0x108] sm:$0xff] (!%p2541_p4), %v3371_v14 }
 0x25c   : > { %v3373_v16 = vpop.f32.mrb[30].mxu0  ;;  %v3375_v17 = vpop.f32.mrb[30].mxu1  ;;  %v4581_v50 = vld [vmem:[#allocation21_spill] sm:$0xff] (!%p2541_p4) }
 0x25d   : > { %4564 = vst [vmem:[#allocation23_spill] sm:$0xff] %v3375_v17  ;;  %v3377_v18 = vpop.f32.mrb[31].mxu0  ;;  %v1243_v19 = vpop.f32.mrb[31].mxu1  ;;  %1309 = vst [vmem:[#allocation2 + $0x138] sm:$0xff] (!%p2541_p4), %v3373_v16 }
 0x25e   : > { %1310 = vst [vmem:[#allocation2 + $0x140] sm:$0xff] (!%p2541_p4), %v3377_v18  ;;  %1297 = vst.msk [vmem:[#allocation2 + $0xd8] sm:$0xff] (!%p2541_p4), %vm1275_vm1, %v4581_v50 }
 0x260   : > { %v3379_v58 = vpop.f32.mrb[32].mxu0  ;;  %v3381_v0 = vpop.f32.mrb[32].mxu1  ;;  %v4582_v53 = vld [vmem:[#allocation22_spill] sm:$0xff] (!%p2541_p4) }
 0x261   : > { %4565 = vst [vmem:[#allocation24_spill] sm:$0xff] %v3381_v0  ;;  %v3383_v5 = vpop.f32.mrb[33].mxu0  ;;  %v1248_v9 = vpop.f32.mrb[33].mxu1  ;;  %1316 = vst [vmem:[#allocation2 + $0x170] sm:$0xff] (!%p2541_p4), %v3379_v58 }
 0x262   : > { %4566 = vst [vmem:[#allocation25_spill] sm:$0xff] %v3383_v5  ;;  %1317 = vst [vmem:[#allocation2 + $0x178] sm:$0xff] (!%p2541_p4), %v3383_v5 }
 0x263   : > { %1304 = vst.msk [vmem:[#allocation2 + $0x110] sm:$0xff] (!%p2541_p4), %vm1275_vm1, %v4582_v53 }
 0x264   : > { %v3385_v7 = vpop.f32.mrb[34].mxu0  ;;  %v3387_v13 = vpop.f32.mrb[34].mxu1 }
 0x265   : > { %4567 = vst [vmem:[#allocation26_spill] sm:$0xff] %v3385_v7  ;;  %4568 = vst [vmem:[#allocation27_spill] sm:$0xff] %v3387_v13  ;;  %v3389_v3 = vpop.f32.mrb[35].mxu0  ;;  %v1253_v15 = vpop.f32.mrb[35].mxu1 }
 0x266   : > { %4569 = vst [vmem:[#allocation28_spill] sm:$0xff] %v3389_v3  ;;  %1323 = vst [vmem:[#allocation2 + $0x1a8] sm:$0xff] (!%p2541_p4), %v3385_v7  ;;  %v4576_v15 = vld [vmem:[#allocation14_spill] sm:$0xff] (!%p2541_p4) }
 0x267   : > { %1324 = vst [vmem:[#allocation2 + $0x1b0] sm:$0xff] (!%p2541_p4), %v3389_v3  ;;  %1335 = vst [vmem:[#allocation2 + $0x208] sm:$0xff] (!%p2541_p4), %v4576_v15  ;;  %v4583_v15 = vld [vmem:[#allocation23_spill] sm:$0xff] (!%p2541_p4) }
 0x268   : > { %v3391_v61 = vpop.f32.mrb[36].mxu0  ;;  %v3393_v17 = vpop.f32.mrb[36].mxu1  ;;  %1268 = sbr.rel (%p2541_p4) target bundleno = 625 (0x271), region = 44  ;;  %1311 = vst.msk [vmem:[#allocation2 + $0x148] sm:$0xff] (!%p2541_p4), %vm1275_vm1, %v4583_v15  ;;  %1325 = vst.msk [vmem:[#allocation2 + $0x1b8] sm:$0xff] (!%p2541_p4), %vm1275_vm1, %v3387_v13 }
 0x269   : > { %4570 = vst [vmem:[#allocation29_spill] sm:$0xff] %v3391_v61  ;;  %4571 = vst [vmem:[#allocation30_spill] sm:$0xff] %v3393_v17  ;;  %v3395_v56 = vpop.f32.mrb[37].mxu0  ;;  %v1258_v19 = vpop.f32.mrb[37].mxu1 }
 0x26a   : > { %4572 = vst [vmem:[#allocation31_spill] sm:$0xff] %v3395_v56  ;;  %1330 = vst [vmem:[#allocation2 + $0x1e0] sm:$0xff] (!%p2541_p4), %v3391_v61  ;;  %v4577_v19 = vld [vmem:[#allocation16_spill] sm:$0xff] (!%p2541_p4) }
 0x26b   : > { %1331 = vst [vmem:[#allocation2 + $0x1e8] sm:$0xff] (!%p2541_p4), %v3395_v56  ;;  %1336 = vst [vmem:[#allocation2 + $0x210] sm:$0xff] (!%p2541_p4), %v4577_v19  ;;  %v4580_v61 = vld [vmem:[#allocation20_spill] sm:$0xff] (!%p2541_p4) }
 0x26c   : > { %v3397_v54 = vpop.f32.mrb[38].mxu0  ;;  %v3399_v0 = vpop.f32.mrb[38].mxu1  ;;  %1290 = vst.msk [vmem:[#allocation2 + $0xa0] sm:$0xff] (!%p2541_p4), %vm1275_vm1, %v4580_v61  ;;  %v4584_v19 = vld [vmem:[#allocation24_spill] sm:$0xff] (!%p2541_p4)  ;;  %1332 = vst.msk [vmem:[#allocation2 + $0x1f0] sm:$0xff] (!%p2541_p4), %vm1275_vm1, %v3393_v17 }
 0x26d   : > { %4573 = vst [vmem:[#allocation32_spill] sm:$0xff] %v3397_v54  ;;  %4574 = vst [vmem:[#allocation33_spill] sm:$0xff] %v3399_v0  ;;  %v3401_v51 = vpop.f32.mrb[39].mxu0  ;;  %v1263_v9 = vpop.f32.mrb[39].mxu1 }
 0x26e   : > { %4575 = vst [vmem:[#allocation34_spill] sm:$0xff] %v3401_v51  ;;  %1337 = vst [vmem:[#allocation2 + $0x218] sm:$0xff] (!%p2541_p4), %v3397_v54  ;;  %v4578_v9 = vld [vmem:[#allocation17_spill] sm:$0xff] (!%p2541_p4) }
 0x26f   : > { %1338 = vst [vmem:[#allocation2 + $0x220] sm:$0xff] %v3401_v51  ;;  %1276 = vst.msk [vmem:[#allocation2 + $0x30] sm:$0xff] %vm1275_vm1, %v4578_v9 }
 0x270   : > { %1318 = vst.msk [vmem:[#allocation2 + $0x180] sm:$0xff] %vm1275_vm1, %v4584_v19  ;;  %1339 = vst.msk [vmem:[#allocation2 + $0x228] sm:$0xff] %vm1275_vm1, %v3399_v0 }
 0x271 PF: > { %p1340_p5 = scmp.gt.s32.totalorder %s2903_s19, 0  ;;  %p1341_p6 = scmp.lt.s32.totalorder %s2903_s19, 2 }
 0x273   : > { %p1342_p7 = pnand %p1341_p6, %p1340_p5 }
 0x274   : > { %v1346_v49 = vld [vmem:[#allocation2] sm:$0xff] (!%p1342_p7)  ;;  %v1347_v50 = vld [vmem:[#allocation2 + $0x8] sm:$0xff] (!%p1342_p7)  ;;  %v1348_v53 = vld [vmem:[#allocation2 + $0x10] sm:$0xff] (!%p1342_p7)  ;;  %vm1492_vm2 = vcmask (!%p1342_p7), 130048  }
 0x275   : > { %1345 = sbr.rel (%p1342_p7) target bundleno = 672 (0x2a0), region = 48  ;;  %v1416_v61 = vadd.f32 (!%p1342_p7), %v1346_v49, %v3263_v2  ;;  %v1417_v9 = vadd.f32 (!%p1342_p7), %v1347_v50, %v3267_v30  ;;  %v1418_v15 = vadd.f32 (!%p1342_p7), %v1348_v53, %v3265_v29  ;;  %v1349_v19 = vld [vmem:[#allocation2 + $0x18] sm:$0xff] (!%p1342_p7)  ;;  %v1350_v51 = vld [vmem:[#allocation2 + $0x20] sm:$0xff] (!%p1342_p7)  ;;  %v1351_v54 = vld [vmem:[#allocation2 + $0x28] sm:$0xff] (!%p1342_p7) }
 0x276   : > { %v1419_v0 = vadd.f32 (!%p1342_p7), %v1349_v19, %v3269_v31  ;;  %v1420_v17 = vadd.f32 (!%p1342_p7), %v1350_v51, %v3343_v55  ;;  %v1421_v56 = vadd.f32 (!%p1342_p7), %v1351_v54, %v3347_v57  ;;  %v1353_v48 = vld [vmem:[#allocation2 + $0x38] sm:$0xff] (!%p1342_p7)  ;;  %v1354_v46 = vld [vmem:[#allocation2 + $0x40] sm:$0xff] (!%p1342_p7)  ;;  %v4585_v49 = vld [vmem:[#allocation17_spill] sm:$0xff] (!%p1342_p7) }
 0x277   : > { %1486 = vst [vmem:[#allocation2] sm:$0xff] (!%p1342_p7), %v1416_v61  ;;  %1487 = vst [vmem:[#allocation2 + $0x8] sm:$0xff] (!%p1342_p7), %v1417_v9  ;;  %v1423_v53 = vadd.f32 (!%p1342_p7), %v1353_v48, %v3271_v41  ;;  %v1424_v29 = vadd.f32 (!%p1342_p7), %v1354_v46, %v3275_v52  ;;  %v1355_v30 = vld [vmem:[#allocation2 + $0x48] sm:$0xff] (!%p1342_p7)  ;;  %v1356_v2 = vld [vmem:[#allocation2 + $0x50] sm:$0xff] (!%p1342_p7) }
 0x278   : > { %v1352_v47 = vld [vmem:[#allocation2 + $0x30] sm:$0xff] (!%p1342_p7)  ;;  %1488 = vst [vmem:[#allocation2 + $0x10] sm:$0xff] (!%p1342_p7), %v1418_v15  ;;  %v1357_v19 = vld [vmem:[#allocation2 + $0x58] sm:$0xff] (!%p1342_p7)  ;;  %1489 = vst [vmem:[#allocation2 + $0x18] sm:$0xff] (!%p1342_p7), %v1419_v0  ;;  %v1425_v51 = vadd.f32 (!%p1342_p7), %v1355_v30, %v3273_v42  ;;  %v1426_v54 = vadd.f32 (!%p1342_p7), %v1356_v2, %v3277_v59 }
 0x279   : > { %v1422_v50 = vadd.f32 (!%p1342_p7), %v1352_v47, %v4585_v49  ;;  %1490 = vst [vmem:[#allocation2 + $0x20] sm:$0xff] (!%p1342_p7), %v1420_v17  ;;  %1491 = vst [vmem:[#allocation2 + $0x28] sm:$0xff] (!%p1342_p7), %v1421_v56  ;;  %v1427_v61 = vadd.f32 (!%p1342_p7), %v1357_v19, %v3349_v60  ;;  %v1358_v9 = vld [vmem:[#allocation2 + $0x60] sm:$0xff] (!%p1342_p7)  ;;  %v1359_v15 = vld [vmem:[#allocation2 + $0x68] sm:$0xff] (!%p1342_p7) }
 0x27a   : > { %v1360_v57 = vld [vmem:[#allocation2 + $0x70] sm:$0xff] (!%p1342_p7)  ;;  %1494 = vst [vmem:[#allocation2 + $0x38] sm:$0xff] (!%p1342_p7), %v1423_v53  ;;  %1495 = vst [vmem:[#allocation2 + $0x40] sm:$0xff] (!%p1342_p7), %v1424_v29  ;;  %v1428_v46 = vadd.f32 (!%p1342_p7), %v1358_v9, %v3353_v62  ;;  %v4586_v47 = vld [vmem:[#allocation19_spill] sm:$0xff] (!%p1342_p7) }
 0x27b   : > { %1493 = vst.msk [vmem:[#allocation2 + $0x30] sm:$0xff] (!%p1342_p7), %vm1492_vm2, %v1422_v50  ;;  %v1429_v48 = vadd.f32 (!%p1342_p7), %v1359_v15, %v4586_v47  ;;  %v1430_v17 = vadd.f32 (!%p1342_p7), %v1360_v57, %v3279_v63  ;;  %v1361_v56 = vld [vmem:[#allocation2 + $0x78] sm:$0xff] (!%p1342_p7)  ;;  %v1362_v0 = vld [vmem:[#allocation2 + $0x80] sm:$0xff] (!%p1342_p7)  ;;  %v1363_v30 = vld [vmem:[#allocation2 + $0x88] sm:$0xff] (!%p1342_p7) }
 0x27c   : > { %1496 = vst [vmem:[#allocation2 + $0x48] sm:$0xff] %v1425_v51  ;;  %1497 = vst [vmem:[#allocation2 + $0x50] sm:$0xff] %v1426_v54  ;;  %v1431_v2 = vadd.f32 %v1361_v56, %v3283_v11  ;;  %v1432_v49 = vadd.f32 %v1362_v0, %v3281_v10  ;;  %v1433_v50 = vadd.f32 %v1363_v30, %v3285_v20  ;;  %v1364_v53 = vld [vmem:[#allocation2 + $0x90] sm:$0xff]  ;;  %v1365_v29 = vld [vmem:[#allocation2 + $0x98] sm:$0xff] }
 0x27d   : > { %1498 = vst [vmem:[#allocation2 + $0x58] sm:$0xff] %v1427_v61  ;;  %v1366_v19 = vld [vmem:[#allocation2 + $0xa0] sm:$0xff]  ;;  %1499 = vst [vmem:[#allocation2 + $0x60] sm:$0xff] %v1428_v46  ;;  %v1434_v57 = vadd.f32 %v1364_v53, %v3355_v1  ;;  %v1435_v9 = vadd.f32 %v1365_v29, %v3359_v4  ;;  %v4587_v51 = vld [vmem:[#allocation20_spill] sm:$0xff] }
 0x27e   : > { %1500 = vst.msk [vmem:[#allocation2 + $0x68] sm:$0xff] %vm1492_vm2, %v1429_v48  ;;  %1501 = vst [vmem:[#allocation2 + $0x70] sm:$0xff] %v1430_v17  ;;  %v1436_v54 = vadd.f32 %v1366_v19, %v4587_v51  ;;  %v1367_v61 = vld [vmem:[#allocation2 + $0xa8] sm:$0xff]  ;;  %v1368_v15 = vld [vmem:[#allocation2 + $0xb0] sm:$0xff] }
 0x27f   : > { %v1369_v47 = vld [vmem:[#allocation2 + $0xb8] sm:$0xff]  ;;  %1502 = vst [vmem:[#allocation2 + $0x78] sm:$0xff] %v1431_v2  ;;  %1503 = vst [vmem:[#allocation2 + $0x80] sm:$0xff] %v1432_v49  ;;  %v1437_v56 = vadd.f32 %v1367_v61, %v3287_v21  ;;  %v1438_v0 = vadd.f32 %v1368_v15, %v3291_v23  ;;  %v1370_v48 = vld [vmem:[#allocation2 + $0xc0] sm:$0xff] }
 0x280   : > { %1504 = vst [vmem:[#allocation2 + $0x88] sm:$0xff] %v1433_v50  ;;  %v1439_v46 = vadd.f32 %v1369_v47, %v3289_v22  ;;  %v1371_v17 = vld [vmem:[#allocation2 + $0xc8] sm:$0xff]  ;;  %v1372_v30 = vld [vmem:[#allocation2 + $0xd0] sm:$0xff]  ;;  %1505 = vst [vmem:[#allocation2 + $0x90] sm:$0xff] %v1434_v57  ;;  %v1440_v53 = vadd.f32 %v1370_v48, %v3293_v24 }
 0x281   : > { %1506 = vst [vmem:[#allocation2 + $0x98] sm:$0xff] %v1435_v9  ;;  %1507 = vst.msk [vmem:[#allocation2 + $0xa0] sm:$0xff] %vm1492_vm2, %v1436_v54  ;;  %v1441_v29 = vadd.f32 %v1371_v17, %v3361_v6  ;;  %v1442_v2 = vadd.f32 %v1372_v30, %v3365_v8  ;;  %v1373_v49 = vld [vmem:[#allocation2 + $0xd8] sm:$0xff]  ;;  %v1374_v50 = vld [vmem:[#allocation2 + $0xe0] sm:$0xff] }
 0x282   : > { %v1375_v19 = vld [vmem:[#allocation2 + $0xe8] sm:$0xff]  ;;  %1508 = vst [vmem:[#allocation2 + $0xa8] sm:$0xff] %v1437_v56  ;;  %1509 = vst [vmem:[#allocation2 + $0xb0] sm:$0xff] %v1438_v0  ;;  %v4588_v51 = vld [vmem:[#allocation21_spill] sm:$0xff]  ;;  %v1444_v15 = vadd.f32 %v1374_v50, %v3295_v25 }
 0x283   : > { %1510 = vst [vmem:[#allocation2 + $0xb8] sm:$0xff] %v1439_v46  ;;  %v1443_v61 = vadd.f32 %v1373_v49, %v4588_v51  ;;  %v1445_v57 = vadd.f32 %v1375_v19, %v3299_v27  ;;  %v1376_v9 = vld [vmem:[#allocation2 + $0xf0] sm:$0xff]  ;;  %v1377_v54 = vld [vmem:[#allocation2 + $0xf8] sm:$0xff]  ;;  %v1378_v47 = vld [vmem:[#allocation2 + $0x100] sm:$0xff] }
 0x284   : > { %1511 = vst [vmem:[#allocation2 + $0xc0] sm:$0xff] %v1440_v53  ;;  %1512 = vst [vmem:[#allocation2 + $0xc8] sm:$0xff] %v1441_v29  ;;  %v1446_v48 = vadd.f32 %v1376_v9, %v3297_v26  ;;  %v1447_v17 = vadd.f32 %v1377_v54, %v3301_v28  ;;  %v1448_v56 = vadd.f32 %v1378_v47, %v3367_v12  ;;  %v1379_v0 = vld [vmem:[#allocation2 + $0x108] sm:$0xff]  ;;  %v1380_v46 = vld [vmem:[#allocation2 + $0x110] sm:$0xff] }
 0x285   : > { %1513 = vst [vmem:[#allocation2 + $0xd0] sm:$0xff] %v1442_v2  ;;  %v1381_v30 = vld [vmem:[#allocation2 + $0x118] sm:$0xff]  ;;  %1514 = vst.msk [vmem:[#allocation2 + $0xd8] sm:$0xff] %vm1492_vm2, %v1443_v61  ;;  %v1449_v49 = vadd.f32 %v1379_v0, %v3371_v14  ;;  %v1382_v29 = vld [vmem:[#allocation2 + $0x120] sm:$0xff] }
 0x286   : > { %1515 = vst [vmem:[#allocation2 + $0xe0] sm:$0xff] %v1444_v15  ;;  %1516 = vst [vmem:[#allocation2 + $0xe8] sm:$0xff] %v1445_v57  ;;  %v4589_v50 = vld [vmem:[#allocation22_spill] sm:$0xff]  ;;  %v1451_v53 = vadd.f32 %v1381_v30, %v3303_v32  ;;  %v1383_v2 = vld [vmem:[#allocation2 + $0x128] sm:$0xff]  ;;  %v1452_v9 = vadd.f32 %v1382_v29, %v3307_v34 }
 0x287   : > { %v1450_v19 = vadd.f32 %v1380_v46, %v4589_v50  ;;  %v1384_v51 = vld [vmem:[#allocation2 + $0x130] sm:$0xff]  ;;  %1517 = vst [vmem:[#allocation2 + $0xf0] sm:$0xff] %v1446_v48  ;;  %1518 = vst [vmem:[#allocation2 + $0xf8] sm:$0xff] %v1447_v17  ;;  %v1453_v54 = vadd.f32 %v1383_v2, %v3305_v33  ;;  %v1385_v15 = vld [vmem:[#allocation2 + $0x138] sm:$0xff] }
 0x288   : > { %1519 = vst [vmem:[#allocation2 + $0x100] sm:$0xff] %v1448_v56  ;;  %v1454_v61 = vadd.f32 %v1384_v51, %v3309_v35  ;;  %v1386_v57 = vld [vmem:[#allocation2 + $0x140] sm:$0xff]  ;;  %v1387_v47 = vld [vmem:[#allocation2 + $0x148] sm:$0xff]  ;;  %1520 = vst [vmem:[#allocation2 + $0x108] sm:$0xff] %v1449_v49  ;;  %v1455_v0 = vadd.f32 %v1385_v15, %v3373_v16 }
 0x289   : > { %1521 = vst.msk [vmem:[#allocation2 + $0x110] sm:$0xff] %vm1492_vm2, %v1450_v19  ;;  %1522 = vst [vmem:[#allocation2 + $0x118] sm:$0xff] %v1451_v53  ;;  %v1456_v46 = vadd.f32 %v1386_v57, %v3377_v18  ;;  %v4590_v48 = vld [vmem:[#allocation23_spill] sm:$0xff]  ;;  %v1388_v56 = vld [vmem:[#allocation2 + $0x150] sm:$0xff] }
 0x28a   : > { %v1457_v17 = vadd.f32 %v1387_v47, %v4590_v48  ;;  %v1389_v30 = vld [vmem:[#allocation2 + $0x158] sm:$0xff]  ;;  %v1390_v50 = vld [vmem:[#allocation2 + $0x160] sm:$0xff]  ;;  %1523 = vst [vmem:[#allocation2 + $0x120] sm:$0xff] %v1452_v9  ;;  %1524 = vst [vmem:[#allocation2 + $0x128] sm:$0xff] %v1453_v54  ;;  %v1458_v29 = vadd.f32 %v1388_v56, %v3311_v36 }
 0x28b   : > { %1525 = vst [vmem:[#allocation2 + $0x130] sm:$0xff] %v1454_v61  ;;  %v1459_v2 = vadd.f32 %v1389_v30, %v3315_v38  ;;  %v1460_v49 = vadd.f32 %v1390_v50, %v3313_v37  ;;  %v1391_v19 = vld [vmem:[#allocation2 + $0x168] sm:$0xff]  ;;  %v1392_v53 = vld [vmem:[#allocation2 + $0x170] sm:$0xff]  ;;  %v1393_v51 = vld [vmem:[#allocation2 + $0x178] sm:$0xff] }
 0x28c   : > { %1526 = vst [vmem:[#allocation2 + $0x138] sm:$0xff] %v1455_v0  ;;  %1527 = vst [vmem:[#allocation2 + $0x140] sm:$0xff] %v1456_v46  ;;  %v1461_v15 = vadd.f32 %v1391_v19, %v3317_v39  ;;  %v1462_v57 = vadd.f32 %v1392_v53, %v3379_v58  ;;  %v1463_v9 = vadd.f32 %v1393_v51, %v3383_v5  ;;  %v1394_v54 = vld [vmem:[#allocation2 + $0x180] sm:$0xff]  ;;  %v1395_v61 = vld [vmem:[#allocation2 + $0x188] sm:$0xff] }
 0x28d   : > { %1528 = vst.msk [vmem:[#allocation2 + $0x148] sm:$0xff] %vm1492_vm2, %v1457_v17  ;;  %v1396_v47 = vld [vmem:[#allocation2 + $0x190] sm:$0xff]  ;;  %1529 = vst [vmem:[#allocation2 + $0x150] sm:$0xff] %v1458_v29  ;;  %v4591_v48 = vld [vmem:[#allocation24_spill] sm:$0xff]  ;;  %v1465_v30 = vadd.f32 %v1395_v61, %v3319_v40 }
 0x28e   : > { %1530 = vst [vmem:[#allocation2 + $0x158] sm:$0xff] %v1459_v2  ;;  %1531 = vst [vmem:[#allocation2 + $0x160] sm:$0xff] %v1460_v49  ;;  %v1464_v56 = vadd.f32 %v1394_v54, %v4591_v48  ;;  %v1466_v0 = vadd.f32 %v1396_v47, %v3323_v44  ;;  %v1397_v46 = vld [vmem:[#allocation2 + $0x198] sm:$0xff]  ;;  %v1398_v17 = vld [vmem:[#allocation2 + $0x1a0] sm:$0xff] }
 0x28f   : > { %v1399_v50 = vld [vmem:[#allocation2 + $0x1a8] sm:$0xff]  ;;  %1532 = vst [vmem:[#allocation2 + $0x168] sm:$0xff] %v1461_v15  ;;  %1533 = vst [vmem:[#allocation2 + $0x170] sm:$0xff] %v1462_v57  ;;  %v1467_v19 = vadd.f32 %v1397_v46, %v3321_v43  ;;  %v1468_v53 = vadd.f32 %v1398_v17, %v3325_v45  ;;  %v1400_v2 = vld [vmem:[#allocation2 + $0x1b0] sm:$0xff] }
 0x290   : > { %1534 = vst [vmem:[#allocation2 + $0x178] sm:$0xff] %v1463_v9  ;;  %v1469_v29 = vadd.f32 %v1399_v50, %v3385_v7  ;;  %v1401_v49 = vld [vmem:[#allocation2 + $0x1b8] sm:$0xff]  ;;  %v1402_v51 = vld [vmem:[#allocation2 + $0x1c0] sm:$0xff]  ;;  %1535 = vst.msk [vmem:[#allocation2 + $0x180] sm:$0xff] %vm1492_vm2, %v1464_v56  ;;  %v1470_v54 = vadd.f32 %v1400_v2, %v3389_v3 }
 0x291   : > { %1536 = vst [vmem:[#allocation2 + $0x188] sm:$0xff] %v1465_v30  ;;  %1537 = vst [vmem:[#allocation2 + $0x190] sm:$0xff] %v1466_v0  ;;  %v1471_v61 = vadd.f32 %v1401_v49, %v3387_v13  ;;  %v4592_v15 = vld [vmem:[#allocation9_spill] sm:$0xff]  ;;  %v1403_v9 = vld [vmem:[#allocation2 + $0x1c8] sm:$0xff] }
 0x292   : > { %v1472_v57 = vadd.f32 %v1402_v51, %v4592_v15  ;;  %v1404_v47 = vld [vmem:[#allocation2 + $0x1d0] sm:$0xff]  ;;  %v1405_v48 = vld [vmem:[#allocation2 + $0x1d8] sm:$0xff]  ;;  %1538 = vst [vmem:[#allocation2 + $0x198] sm:$0xff] %v1467_v19  ;;  %1539 = vst [vmem:[#allocation2 + $0x1a0] sm:$0xff] %v1468_v53 }
 0x293   : > { %1540 = vst [vmem:[#allocation2 + $0x1a8] sm:$0xff] %v1469_v29  ;;  %v4593_v46 = vld [vmem:[#allocation11_spill] sm:$0xff]  ;;  %v4594_v50 = vld [vmem:[#allocation10_spill] sm:$0xff]  ;;  %v4595_v45 = vld [vmem:[#allocation12_spill] sm:$0xff] }
 0x294   : > { %v1473_v17 = vadd.f32 %v1403_v9, %v4593_v46  ;;  %v1474_v7 = vadd.f32 %v1404_v47, %v4594_v50  ;;  %v1475_v56 = vadd.f32 %v1405_v48, %v4595_v45  ;;  %v1406_v30 = vld [vmem:[#allocation2 + $0x1e0] sm:$0xff]  ;;  %v1407_v0 = vld [vmem:[#allocation2 + $0x1e8] sm:$0xff]  ;;  %v1408_v5 = vld [vmem:[#allocation2 + $0x1f0] sm:$0xff]  ;;  %1541 = vst [vmem:[#allocation2 + $0x1b0] sm:$0xff] %v1470_v54 }
 0x295   : > { %1542 = vst.msk [vmem:[#allocation2 + $0x1b8] sm:$0xff] %vm1492_vm2, %v1471_v61  ;;  %1543 = vst [vmem:[#allocation2 + $0x1c0] sm:$0xff] %v1472_v57  ;;  %v4596_v2 = vld [vmem:[#allocation29_spill] sm:$0xff]  ;;  %v4597_v51 = vld [vmem:[#allocation31_spill] sm:$0xff] }
 0x296   : > { %v1476_v49 = vadd.f32 %v1406_v30, %v4596_v2  ;;  %v1477_v15 = vadd.f32 %v1407_v0, %v4597_v51  ;;  %v4598_v19 = vld [vmem:[#allocation30_spill] sm:$0xff]  ;;  %v1410_v3 = vld [vmem:[#allocation2 + $0x200] sm:$0xff]  ;;  %v1411_v9 = vld [vmem:[#allocation2 + $0x208] sm:$0xff]  ;;  %1544 = vst [vmem:[#allocation2 + $0x1c8] sm:$0xff] %v1473_v17 }
 0x297   : > { %v1478_v53 = vadd.f32 %v1408_v5, %v4598_v19  ;;  %v1409_v29 = vld [vmem:[#allocation2 + $0x1f8] sm:$0xff]  ;;  %1545 = vst [vmem:[#allocation2 + $0x1d0] sm:$0xff] %v1474_v7  ;;  %1546 = vst [vmem:[#allocation2 + $0x1d8] sm:$0xff] %v1475_v56  ;;  %v4599_v45 = vld [vmem:[#allocation13_spill] sm:$0xff] }
 0x298   : > { %v1479_v47 = vadd.f32 %v1409_v29, %v4599_v45  ;;  %v4600_v48 = vld [vmem:[#allocation15_spill] sm:$0xff]  ;;  %v4601_v54 = vld [vmem:[#allocation14_spill] sm:$0xff]  ;;  %v1412_v61 = vld [vmem:[#allocation2 + $0x210] sm:$0xff]  ;;  %1547 = vst [vmem:[#allocation2 + $0x1e0] sm:$0xff] %v1476_v49 }
 0x299   : > { %v1480_v46 = vadd.f32 %v1410_v3, %v4600_v48  ;;  %v1481_v50 = vadd.f32 %v1411_v9, %v4601_v54  ;;  %v1413_v57 = vld [vmem:[#allocation2 + $0x218] sm:$0xff]  ;;  %v1414_v13 = vld [vmem:[#allocation2 + $0x220] sm:$0xff]  ;;  %1548 = vst [vmem:[#allocation2 + $0x1e8] sm:$0xff] %v1477_v15  ;;  %1549 = vst.msk [vmem:[#allocation2 + $0x1f0] sm:$0xff] %vm1492_vm2, %v1478_v53 }
 0x29a   : > { %v4602_v5 = vld [vmem:[#allocation16_spill] sm:$0xff]  ;;  %v4604_v17 = vld [vmem:[#allocation34_spill] sm:$0xff]  ;;  %1550 = vst [vmem:[#allocation2 + $0x1f8] sm:$0xff] %v1479_v47  ;;  %v4605_v3 = vld [vmem:[#allocation33_spill] sm:$0xff] }
 0x29b   : > { %v1482_v30 = vadd.f32 %v1412_v61, %v4602_v5  ;;  %v4603_v0 = vld [vmem:[#allocation32_spill] sm:$0xff]  ;;  %v1484_v7 = vadd.f32 %v1414_v13, %v4604_v17  ;;  %1551 = vst [vmem:[#allocation2 + $0x200] sm:$0xff] %v1480_v46  ;;  %1552 = vst [vmem:[#allocation2 + $0x208] sm:$0xff] %v1481_v50 }
 0x29c   : > { %v1483_v2 = vadd.f32 %v1413_v57, %v4603_v0  ;;  %v1415_v56 = vld [vmem:[#allocation2 + $0x228] sm:$0xff] }
 0x29d   : > { %v1485_v51 = vadd.f32 %v1415_v56, %v4605_v3  ;;  %1553 = vst [vmem:[#allocation2 + $0x210] sm:$0xff] %v1482_v30  ;;  %1555 = vst [vmem:[#allocation2 + $0x220] sm:$0xff] %v1484_v7 }
 0x29e   : > { %1554 = vst [vmem:[#allocation2 + $0x218] sm:$0xff] %v1483_v2 }
 0x29f   : > { %1556 = vst.msk [vmem:[#allocation2 + $0x228] sm:$0xff] %vm1492_vm2, %v1485_v51 }
 0x2a0 PF: > { %p2542_p8 = scmp.ne.s32.totalorder %s2903_s19, 2 }
 0x2a2   : > { %1560 = sbr.rel (%p2542_p8) target bundleno = 1203 (0x4b3), region = 52 }
 0x2a9   : > { %v1575_v49 = vld [vmem:[#allocation2 + $0x70] sm:$0xff]  ;;  %v1576_v15 = vld [vmem:[#allocation2 + $0x78] sm:$0xff]  ;;  %v1577_v19 = vld [vmem:[#allocation2 + $0x80] sm:$0xff]  ;;  %vm1706_vm3 = vcmask 130048  }
 0x2aa   : > { %v1578_v53 = vld [vmem:[#allocation2 + $0x88] sm:$0xff]  ;;  %v1579_v13 = vld [vmem:[#allocation2 + $0x90] sm:$0xff]  ;;  %v1580_v29 = vld [vmem:[#allocation2 + $0x98] sm:$0xff]  ;;  %v3568_v9 = vadd.f32 %v1575_v49, %v3279_v63  ;;  %v3571_v45 = vadd.f32 %v1576_v15, %v3283_v11  ;;  %v3574_v47 = vadd.f32 %v1577_v19, %v3281_v10 }
 0x2ab   : > { %v1581_v48 = vld [vmem:[#allocation2 + $0xa0] sm:$0xff]  ;;  %v3577_v46 = vadd.f32 %v1578_v53, %v3285_v20  ;;  %v1562_v50 = vld [vmem:[#allocation2 + $0x8] sm:$0xff]  ;;  %v1563_v63 = vld [vmem:[#allocation2 + $0x10] sm:$0xff]  ;;  %v3591_v20 = vadd.f32 %v1579_v13, %v3355_v1  ;;  %v3597_v15 = vadd.f32 %v1580_v29, %v3359_v4 }
 0x2ac   : > { %v1561_v54 = vld [vmem:[#allocation2] sm:$0xff]  ;;  %v4606_v61 = vld [vmem:[#allocation20_spill] sm:$0xff]  ;;  %v1720_v5 = vadd.f32 %v3571_v45, %v3568_v9  ;;  %v1564_v30 = vld [vmem:[#allocation2 + $0x18] sm:$0xff] }
 0x2ad   : > { %v3580_v57 = vadd.f32 %v1581_v48, %v4606_v61  ;;  %v1565_v0 = vld [vmem:[#allocation2 + $0x20] sm:$0xff]  ;;  %v4607_v11 = vld [vmem:[#allocation5_spill] sm:$0xff]  ;;  %v1566_v7 = vld [vmem:[#allocation2 + $0x28] sm:$0xff]  ;;  %v3601_v53 = vadd.f32 %v1564_v30, %v3269_v31 }
 0x2ae   : > { %v3585_v2 = vadd.f32 %v1561_v54, %v4607_v11  ;;  %v4608_v10 = vld [vmem:[#allocation7_spill] sm:$0xff]  ;;  %v1567_v56 = vld [vmem:[#allocation2 + $0x30] sm:$0xff]  ;;  %v4610_v3 = vld [vmem:[#allocation6_spill] sm:$0xff]  ;;  %v1721_v19 = vadd.f32 %v1720_v5, %v3574_v47  ;;  %v3621_v30 = vadd.f32 %v1565_v0, %v3343_v55 }
 0x2af   : > { %v3588_v17 = vadd.f32 %v1562_v50, %v4608_v10  ;;  %v3594_v51 = vadd.f32 %v1563_v63, %v4610_v3  ;;  %v1582_v49 = vld [vmem:[#allocation2 + $0xa8] sm:$0xff]  ;;  %v4611_v48 = vld [vmem:[#allocation17_spill] sm:$0xff]  ;;  %v1584_v13 = vld [vmem:[#allocation2 + $0xb8] sm:$0xff]  ;;  %v1725_v5 = vsel %vm1706_vm3, %v3580_v57, 0.0 }
 0x2b0   : > { %v3604_v54 = vadd.f32 %v1567_v56, %v4611_v48  ;;  %v1583_v1 = vld [vmem:[#allocation2 + $0xb0] sm:$0xff]  ;;  %v1585_v50 = vld [vmem:[#allocation2 + $0xc0] sm:$0xff]  ;;  %v1586_v63 = vld [vmem:[#allocation2 + $0xc8] sm:$0xff]  ;;  %v3609_v10 = vadd.f32 %v1582_v49, %v3287_v21  ;;  %v3615_v31 = vadd.f32 %v1584_v13, %v3289_v22  ;;  %v1722_v29 = vadd.f32 %v1721_v19, %v3577_v46 }
 0x2b1   : > { %4609 = vst [vmem:[#allocation35_spill] sm:$0xff] %v3588_v17  ;;  %v1701_v61 = vadd.f32 %v3588_v17, %v3585_v2  ;;  %v1588_v11 = vld [vmem:[#allocation2 + $0xd8] sm:$0xff]  ;;  %v3612_v4 = vadd.f32 %v1583_v1, %v3291_v23  ;;  %v1569_v21 = vld [vmem:[#allocation2 + $0x40] sm:$0xff]  ;;  %v1570_v49 = vld [vmem:[#allocation2 + $0x48] sm:$0xff]  ;;  %v3628_v22 = vadd.f32 %v1585_v50, %v3293_v24 }
 0x2b2   : > { %4612 = vst [vmem:[#allocation36_spill] sm:$0xff] %v3604_v54  ;;  %4613 = vst [vmem:[#allocation37_spill] sm:$0xff] %v3609_v10  ;;  %v4616_v56 = vld [vmem:[#allocation18_spill] sm:$0xff]  ;;  %v1587_v1 = vld [vmem:[#allocation2 + $0xd0] sm:$0xff]  ;;  %v1723_v0 = vadd.f32 %v1722_v29, %v3591_v20  ;;  %v3650_v29 = vadd.f32 %v1570_v49, %v3273_v42 }
 0x2b3   : > { %4614 = vst [vmem:[#allocation38_spill] sm:$0xff] %v3612_v4  ;;  %4615 = vst [vmem:[#allocation39_spill] sm:$0xff] %v3615_v31  ;;  %v3624_v3 = vadd.f32 %v1566_v7, %v4616_v56  ;;  %v1568_v48 = vld [vmem:[#allocation2 + $0x38] sm:$0xff]  ;;  %v1702_v23 = vadd.f32 %v1701_v61, %v3594_v51  ;;  %v4618_v13 = vld [vmem:[#allocation21_spill] sm:$0xff]  ;;  %v1729_v17 = vadd.f32 %v3612_v4, %v3609_v10  ;;  %v1707_v7 = vsel %vm1706_vm3, %v3604_v54, 0.0 }
 0x2b4   : > { %4617 = vst [vmem:[#allocation40_spill] sm:$0xff] %v3628_v22  ;;  %v3631_v19 = vadd.f32 %v1588_v11, %v4618_v13  ;;  %v1571_v55 = vld [vmem:[#allocation2 + $0x50] sm:$0xff]  ;;  %v3639_v56 = vadd.f32 %v1568_v48, %v3271_v41  ;;  %v3642_v61 = vadd.f32 %v1569_v21, %v3275_v52  ;;  %v1589_v24 = vld [vmem:[#allocation2 + $0xe0] sm:$0xff]  ;;  %v3646_v11 = vadd.f32 %v1586_v63, %v3361_v6  ;;  %v1572_v4 = vld [vmem:[#allocation2 + $0x58] sm:$0xff] }
 0x2b5   : > { %v1703_v50 = vadd.f32 %v1702_v23, %v3601_v53  ;;  %v1730_v13 = vadd.f32 %v1729_v17, %v3615_v31  ;;  %v1590_v10 = vld [vmem:[#allocation2 + $0xe8] sm:$0xff]  ;;  %v1591_v54 = vld [vmem:[#allocation2 + $0xf0] sm:$0xff]  ;;  %v1724_v41 = vadd.f32 %v1723_v0, %v3597_v15  ;;  %v3654_v48 = vadd.f32 %v1587_v1, %v3365_v8  ;;  %v1573_v42 = vld [vmem:[#allocation2 + $0x60] sm:$0xff] }
 0x2b6   : > { %4619 = vst [vmem:[#allocation41_spill] sm:$0xff] %v3631_v19  ;;  %4620 = vst [vmem:[#allocation42_spill] sm:$0xff] %v3642_v61  ;;  %v1734_v52 = vsel %vm1706_vm3, %v3631_v19, 0.0  ;;  %v1574_v21 = vld [vmem:[#allocation2 + $0x68] sm:$0xff]  ;;  %v3659_v6 = vadd.f32 %v1571_v55, %v3277_v59  ;;  %v1711_v49 = vadd.f32 %v3642_v61, %v3639_v56  ;;  %v1592_v23 = vld [vmem:[#allocation2 + $0xf8] sm:$0xff]  ;;  %v3666_v8 = vadd.f32 %v1589_v24, %v3295_v25 }
 0x2b7   : > { %v1704_v17 = vadd.f32 %v1703_v50, %v3621_v30  ;;  %v1731_v63 = vadd.f32 %v1730_v13, %v3628_v22  ;;  %v1595_v0 = vld [vmem:[#allocation2 + $0x110] sm:$0xff]  ;;  %v1726_v1 = vadd.f32 %v1725_v5, %v1724_v41  ;;  %v3669_v19 = vadd.f32 %v1572_v4, %v3349_v60  ;;  %v1596_v50 = vld [vmem:[#allocation2 + $0x118] sm:$0xff]  ;;  %v4621_v31 = vld [vmem:[#allocation19_spill] sm:$0xff] }
 0x2b8   : > { %v3672_v59 = vadd.f32 %v1590_v10, %v3299_v27  ;;  %v3675_v55 = vadd.f32 %v1591_v54, %v3297_v26  ;;  %v3680_v61 = vadd.f32 %v1574_v21, %v4621_v31  ;;  %v1712_v25 = vadd.f32 %v1711_v49, %v3650_v29  ;;  %v1593_v5 = vld [vmem:[#allocation2 + $0x100] sm:$0xff]  ;;  %v1598_v60 = vld [vmem:[#allocation2 + $0x128] sm:$0xff]  ;;  %v4622_v54 = vld [vmem:[#allocation22_spill] sm:$0xff] }
 0x2b9   : > { %v1705_v13 = vadd.f32 %v1704_v17, %v3624_v3  ;;  %v1732_v22 = vadd.f32 %v1731_v63, %v3646_v11  ;;  %v1597_v24 = vld [vmem:[#allocation2 + $0x120] sm:$0xff]  ;;  %1727 = vadd.xlane.f32.xlu1 %v1726_v1  ;;  %v3684_v27 = vadd.f32 %v1573_v42, %v3353_v62  ;;  %v1594_v10 = vld [vmem:[#allocation2 + $0x108] sm:$0xff]  ;;  %v3687_v26 = vadd.f32 %v1592_v23, %v3301_v28  ;;  %v1599_v63 = vld [vmem:[#allocation2 + $0x130] sm:$0xff] }
 0x2ba   : > { %v3690_v4 = vadd.f32 %v1595_v0, %v4622_v54  ;;  %v1738_v31 = vadd.f32 %v3672_v59, %v3666_v8  ;;  %v1713_v17 = vadd.f32 %v1712_v25, %v3659_v6  ;;  %v3697_v49 = vadd.f32 %v1596_v50, %v3303_v32  ;;  %v1602_v42 = vld [vmem:[#allocation2 + $0x148] sm:$0xff]  ;;  %v1600_v50 = vld [vmem:[#allocation2 + $0x138] sm:$0xff]  ;;  %v1605_v25 = vld [vmem:[#allocation2 + $0x160] sm:$0xff] }
 0x2bb   : > { %v1708_v41 = vadd.f32 %v1707_v7, %v1705_v13  ;;  %v1733_v21 = vadd.f32 %v1732_v22, %v3654_v48  ;;  %v3700_v62 = vadd.f32 %v1593_v5, %v3367_v12  ;;  %v3704_v23 = vadd.f32 %v1597_v24, %v3307_v34  ;;  %v1603_v7 = vld [vmem:[#allocation2 + $0x150] sm:$0xff]  ;;  %v1604_v22 = vld [vmem:[#allocation2 + $0x158] sm:$0xff]  ;;  %v1601_v5 = vld [vmem:[#allocation2 + $0x140] sm:$0xff] }
 0x2bc   : > { %v1739_v28 = vadd.f32 %v1738_v31, %v3675_v55  ;;  %v3707_v0 = vadd.f32 %v1598_v60, %v3305_v33  ;;  %v1714_v13 = vadd.f32 %v1713_v17, %v3669_v19  ;;  %v1716_v32 = vsel %vm1706_vm3, %v3680_v61, 0.0  ;;  %v1606_v60 = vld [vmem:[#allocation2 + $0x168] sm:$0xff]  ;;  %v1609_v54 = vld [vmem:[#allocation2 + $0x180] sm:$0xff] }
 0x2bd   : > { %1709 = vadd.xlane.f32.xlu0 %v1708_v41  ;;  %v1735_v1 = vadd.f32 %v1734_v52, %v1733_v21  ;;  %v3713_v12 = vadd.f32 %v1594_v10, %v3371_v14  ;;  %v1743_v33 = vsel %vm1706_vm3, %v3690_v4, 0.0  ;;  %v3719_v24 = vadd.f32 %v1599_v63, %v3309_v35  ;;  %v4623_v10 = vld [vmem:[#allocation23_spill] sm:$0xff]  ;;  %v1610_v17 = vld [vmem:[#allocation2 + $0x188] sm:$0xff] }
 0x2be   : > { %v1740_v34 = vadd.f32 %v1739_v28, %v3687_v26  ;;  %v1747_v52 = vadd.f32 %v3704_v23, %v3697_v49  ;;  %v1715_v14 = vadd.f32 %v1714_v13, %v3684_v27  ;;  %v3725_v31 = vadd.f32 %v1602_v42, %v4623_v10  ;;  %v1611_v13 = vld [vmem:[#allocation2 + $0x190] sm:$0xff]  ;;  %v1612_v42 = vld [vmem:[#allocation2 + $0x198] sm:$0xff] }
 0x2bf   : > { %1736 = vadd.xlane.f32.xlu1 %v1735_v1  ;;  %v3728_v41 = vadd.f32 %v1603_v7, %v3311_v36  ;;  %v3731_v21 = vadd.f32 %v1604_v22, %v3315_v38  ;;  %v3735_v63 = vadd.f32 %v1600_v50, %v3373_v16  ;;  %v3739_v1 = vadd.f32 %v1605_v25, %v3313_v37  ;;  %v1607_v7 = vld [vmem:[#allocation2 + $0x170] sm:$0xff]  ;;  %v4631_v22 = vld [vmem:[#allocation24_spill] sm:$0xff]  ;;  %v1613_v25 = vld [vmem:[#allocation2 + $0x1a0] sm:$0xff] }
 0x2c0   : > { %4624 = vst [vmem:[#allocation43_spill] sm:$0xff] %v3725_v31  ;;  %v1741_v35 = vadd.f32 %v1740_v34, %v3700_v62  ;;  %v1748_v28 = vadd.f32 %v1747_v52, %v3707_v0  ;;  %v1717_v10 = vadd.f32 %v1716_v32, %v1715_v14  ;;  %v3742_v36 = vadd.f32 %v1601_v5, %v3377_v18  ;;  %v1608_v52 = vld [vmem:[#allocation2 + $0x178] sm:$0xff] }
 0x2c1   : > { %4625 = vst [vmem:[#allocation44_spill] sm:$0xff] %v3728_v41  ;;  %4626 = vst [vmem:[#allocation45_spill] sm:$0xff] %v3731_v21  ;;  %v3745_v38 = vadd.f32 %v1606_v60, %v3317_v39  ;;  %v3748_v34 = vadd.f32 %v1609_v54, %v4631_v22  ;;  %v1756_v37 = vadd.f32 %v3731_v21, %v3728_v41  ;;  %v1624_v18 = vld [vmem:[#allocation2 + $0x1f8] sm:$0xff]  ;;  %v1752_v39 = vsel %vm1706_vm3, %v3725_v31, 0.0  ;;  %v1625_v54 = vld [vmem:[#allocation2 + $0x200] sm:$0xff] }
 0x2c2   : > { %4627 = vst [vmem:[#allocation46_spill] sm:$0xff] %v3735_v63  ;;  %4628 = vst [vmem:[#allocation47_spill] sm:$0xff] %v3739_v1  ;;  %v1742_v16 = vadd.f32 %v1741_v35, %v3713_v12  ;;  %v1749_v50 = vadd.f32 %v1748_v28, %v3719_v24  ;;  %v3755_v32 = vadd.f32 %v1610_v17, %v3319_v40  ;;  %1718 = vadd.xlane.f32.xlu0 %v1717_v10  ;;  %v1614_v17 = vld [vmem:[#allocation2 + $0x1a8] sm:$0xff]  ;;  %v1616_v10 = vld [vmem:[#allocation2 + $0x1b8] sm:$0xff] }
 0x2c3   : > { %4629 = vst [vmem:[#allocation48_spill] sm:$0xff] %v3742_v36  ;;  %4630 = vst [vmem:[#allocation49_spill] sm:$0xff] %v3745_v38  ;;  %v3760_v5 = vadd.f32 %v1611_v13, %v3323_v44  ;;  %v3763_v60 = vadd.f32 %v1612_v42, %v3321_v43  ;;  %v3767_v28 = vadd.f32 %v1607_v7, %v3379_v58  ;;  %v1626_v22 = vld [vmem:[#allocation2 + $0x208] sm:$0xff]  ;;  %v4635_v21 = vld [vmem:[#allocation25_spill] sm:$0xff] }
 0x2c4   : > { %4632 = vst [vmem:[#allocation50_spill] sm:$0xff] %v3748_v34  ;;  %4633 = vst [vmem:[#allocation51_spill] sm:$0xff] %v3755_v32  ;;  %v1744_v14 = vadd.f32 %v1743_v33, %v1742_v16  ;;  %v1750_v35 = vadd.f32 %v1749_v50, %v3735_v63  ;;  %v1757_v40 = vadd.f32 %v1756_v37, %v3739_v1  ;;  %v1615_v44 = vld [vmem:[#allocation2 + $0x1b0] sm:$0xff]  ;;  %v4636_v13 = vld [vmem:[#allocation8_spill] sm:$0xff]  ;;  %v1761_v50 = vsel %vm1706_vm3, %v3748_v34, 0.0 }
 0x2c5   : > { %4634 = vst [vmem:[#allocation52_spill] sm:$0xff] %v3760_v5  ;;  %v3771_v41 = vadd.f32 %v1608_v52, %v4635_v21  ;;  %v3774_v31 = vadd.f32 %v1613_v25, %v4636_v13  ;;  %v1765_v43 = vadd.f32 %v3760_v5, %v3755_v32  ;;  %v1627_v33 = vld [vmem:[#allocation2 + $0x210] sm:$0xff]  ;;  %v4640_v21 = vld [vmem:[#allocation15_spill] sm:$0xff]  ;;  %v1618_v25 = vld [vmem:[#allocation2 + $0x1c8] sm:$0xff] }
 0x2c6   : > { %v4638_v42 = vld [vmem:[#allocation13_spill] sm:$0xff]  ;;  %v1751_v58 = vadd.f32 %v1750_v35, %v3742_v36  ;;  %v1758_v7 = vadd.f32 %v1757_v40, %v3745_v38  ;;  %v3786_v52 = vadd.f32 %v1625_v54, %v4640_v21  ;;  %v1617_v37 = vld [vmem:[#allocation2 + $0x1c0] sm:$0xff]  ;;  %1745 = vadd.xlane.f32.xlu0 %v1744_v14  ;;  %v4642_v13 = vld [vmem:[#allocation26_spill] sm:$0xff] }
 0x2c7   : > { %4637 = vst [vmem:[#allocation53_spill] sm:$0xff] %v3774_v31  ;;  %v3779_v16 = vadd.f32 %v1624_v18, %v4638_v42  ;;  %v3789_v1 = vadd.f32 %v1614_v17, %v4642_v13  ;;  %v4643_v5 = vld [vmem:[#allocation27_spill] sm:$0xff]  ;;  %v1766_v18 = vadd.f32 %v1765_v43, %v3763_v60  ;;  %v4645_v35 = vld [vmem:[#allocation14_spill] sm:$0xff]  ;;  %v1619_v40 = vld [vmem:[#allocation2 + $0x1d0] sm:$0xff] }
 0x2c8   : > { %4641 = vst [vmem:[#allocation55_spill] sm:$0xff] %v3786_v52  ;;  %v3792_v32 = vadd.f32 %v1616_v10, %v4643_v5  ;;  %v3796_v42 = vadd.f32 %v1626_v22, %v4645_v35  ;;  %v1753_v38 = vadd.f32 %v1752_v39, %v1751_v58  ;;  %v1759_v34 = vadd.f32 %v1758_v7, %v3767_v28  ;;  %v4646_v54 = vld [vmem:[#allocation28_spill] sm:$0xff]  ;;  %v1628_v36 = vld [vmem:[#allocation2 + $0x218] sm:$0xff]  ;;  %v4648_v22 = vld [vmem:[#allocation9_spill] sm:$0xff] }
 0x2c9   : > { %4639 = vst [vmem:[#allocation54_spill] sm:$0xff] %v3779_v16  ;;  %v3800_v21 = vadd.f32 %v1615_v44, %v4646_v54  ;;  %v4647_v14 = vld [vmem:[#allocation16_spill] sm:$0xff]  ;;  %v1767_v17 = vadd.f32 %v1766_v18, %v3774_v31  ;;  %v1783_v10 = vadd.f32 %v3786_v52, %v3779_v16  ;;  %v1620_v43 = vld [vmem:[#allocation2 + $0x1d8] sm:$0xff]  ;;  %v3809_v13 = vadd.f32 %v1617_v37, %v4648_v22  ;;  %v4649_v39 = vld [vmem:[#allocation11_spill] sm:$0xff] }
 0x2ca   : > { %4644 = vst [vmem:[#allocation56_spill] sm:$0xff] %v3792_v32  ;;  %v3803_v63 = vadd.f32 %v1627_v33, %v4647_v14  ;;  %v1630_v5 = vld [vmem:[#allocation2 + $0x228] sm:$0xff]  ;;  %v3812_v58 = vadd.f32 %v1618_v25, %v4649_v39  ;;  %1754 = vadd.xlane.f32.xlu1 %v1753_v38  ;;  %v1760_v44 = vadd.f32 %v1759_v34, %v3771_v41  ;;  %v1629_v7 = vld [vmem:[#allocation2 + $0x220] sm:$0xff]  ;;  %v4650_v35 = vld [vmem:[#allocation10_spill] sm:$0xff]  ;;  %v1770_v54 = vsel %vm1706_vm3, %v3792_v32, 0.0 }
 0x2cb   : > { %v3816_v33 = vadd.f32 %v1619_v40, %v4650_v35  ;;  %v1768_v18 = vadd.f32 %v1767_v17, %v3789_v1  ;;  %v4651_v14 = vld [vmem:[#allocation32_spill] sm:$0xff]  ;;  %v1784_v37 = vadd.f32 %v1783_v10, %v3796_v42  ;;  %v1621_v22 = vld [vmem:[#allocation2 + $0x1e0] sm:$0xff]  ;;  %v4652_v39 = vld [vmem:[#allocation33_spill] sm:$0xff] }
 0x2cc   : > { %v3822_v52 = vadd.f32 %v1628_v36, %v4651_v14  ;;  %v1762_v25 = vadd.f32 %v1761_v50, %v1760_v44  ;;  %v3826_v38 = vadd.f32 %v1630_v5, %v4652_v39  ;;  %v1623_v34 = vld [vmem:[#allocation2 + $0x1f0] sm:$0xff]  ;;  %v4653_v16 = vld [vmem:[#allocation12_spill] sm:$0xff]  ;;  %v1774_v40 = vadd.f32 %v3812_v58, %v3809_v13  ;;  %v4654_v35 = vld [vmem:[#allocation34_spill] sm:$0xff] }
 0x2cd   : > { %v3829_v31 = vadd.f32 %v1620_v43, %v4653_v16  ;;  %v1769_v17 = vadd.f32 %v1768_v18, %v3800_v21  ;;  %v3835_v32 = vadd.f32 %v1629_v7, %v4654_v35  ;;  %v1785_v36 = vadd.f32 %v1784_v37, %v3803_v63  ;;  %v1622_v10 = vld [vmem:[#allocation2 + $0x1e8] sm:$0xff]  ;;  %v4655_v50 = vld [vmem:[#allocation29_spill] sm:$0xff]  ;;  %v4656_v43 = vld [vmem:[#allocation30_spill] sm:$0xff] }
 0x2ce   : > { %1763 = vadd.xlane.f32.xlu0 %v1762_v25  ;;  %v3839_v44 = vadd.f32 %v1621_v22, %v4655_v50  ;;  %v1775_v5 = vadd.f32 %v1774_v40, %v3816_v33  ;;  %v3844_v39 = vadd.f32 %v1623_v34, %v4656_v43  ;;  %v1788_v18 = vsel %vm1706_vm3, %v3826_v38, 0.0  ;;  %v4657_v7 = vld [vmem:[#allocation31_spill] sm:$0xff] }
 0x2cf   : > { %v1771_v14 = vadd.f32 %v1770_v54, %v1769_v17  ;;  %v1786_v16 = vadd.f32 %v1785_v36, %v3822_v52  ;;  %v3849_v35 = vadd.f32 %v1622_v10, %v4657_v7  ;;  %v2863_v36 = vmov 0  }
 0x2d0   : > { %v1776_v37 = vadd.f32 %v1775_v5, %v3829_v31  ;;  %v1779_v54 = vsel %vm1706_vm3, %v3844_v39, 0.0  ;;  %2801 = vset.pattern.permute.xlu1 %v2863_v36  ;;  %2802 = vset.pattern.permute.xlu0 %v2863_v36 }
 0x2d1   : > { %1772 = vadd.xlane.f32.xlu1 %v1771_v14  ;;  %v1787_v22 = vadd.f32 %v1786_v16, %v3835_v32 }
 0x2d2   : > { %v1777_v25 = vadd.f32 %v1776_v37, %v3839_v44 }
 0x2d3   : > { %v1789_v40 = vadd.f32 %v1788_v18, %v1787_v22 }
 0x2d4   : > { %v1778_v34 = vadd.f32 %v1777_v25, %v3849_v35 }
 0x2d5   : > { %1790 = vadd.xlane.f32.xlu1 %v1789_v40 }
 0x2d6   : > { %v1780_v17 = vadd.f32 %v1779_v54, %v1778_v34 }
 0x2d8   : > { %1781 = vadd.xlane.f32.xlu0 %v1780_v17 }
 0x346   : > { %v1728_v10 = vpop.xlane.xlu1 %1727 }
 0x347   : > { %v1794_v50 = vmul.f32 0.0012755102, %v1728_v10 }
 0x349   : > { %v3858_v14 = vsub.f32 %v3568_v9, %v1794_v50  ;;  %v3861_v16 = vsub.f32 %v3571_v45, %v1794_v50  ;;  %v3864_v18 = vsub.f32 %v3574_v47, %v1794_v50  ;;  %v3867_v7 = vsub.f32 %v3577_v46, %v1794_v50  ;;  %v4665_v47 = vld [vmem:[#allocation35_spill] sm:$0xff] }
 0x34a   : > { %v1710_v5 = vpop.xlane.xlu0 %1709  ;;  %v3870_v37 = vsub.f32 %v3591_v20, %v1794_v50  ;;  %v3873_v22 = vsub.f32 %v3597_v15, %v1794_v50  ;;  %v3876_v25 = vsub.f32 %v3580_v57, %v1794_v50 }
 0x34b   : > { %4658 = vst [vmem:[#allocation57_spill] sm:$0xff] %v3858_v14  ;;  %4659 = vst [vmem:[#allocation58_spill] sm:$0xff] %v3861_v16  ;;  %v1792_v43 = vmul.f32 0.0012755102, %v1710_v5  ;;  %v1886_v9 = vmul.f32 %v3858_v14, %v3858_v14  ;;  %v1887_v20 = vmul.f32 %v3861_v16, %v3861_v16  ;;  %v1888_v10 = vmul.f32 %v3864_v18, %v3864_v18 }
 0x34c   : > { %4660 = vst [vmem:[#allocation59_spill] sm:$0xff] %v3864_v18  ;;  %4661 = vst [vmem:[#allocation60_spill] sm:$0xff] %v3867_v7  ;;  %v1737_v45 = vpop.xlane.xlu1 %1736  ;;  %v1892_v14 = vmul.f32 %v3876_v25, %v3876_v25 }
 0x34d   : > { %4662 = vst [vmem:[#allocation61_spill] sm:$0xff] %v3870_v37  ;;  %4663 = vst [vmem:[#allocation62_spill] sm:$0xff] %v3873_v22  ;;  %v3881_v40 = vsub.f32 %v3585_v2, %v1792_v43  ;;  %v3884_v54 = vsub.f32 %v4665_v47, %v1792_v43  ;;  %v3887_v46 = vsub.f32 %v3594_v51, %v1792_v43  ;;  %v4670_v2 = vld [vmem:[#allocation36_spill] sm:$0xff] }
 0x34e   : > { %4664 = vst [vmem:[#allocation63_spill] sm:$0xff] %v3876_v25  ;;  %v3892_v15 = vsub.f32 %v3601_v53, %v1792_v43  ;;  %v3895_v57 = vsub.f32 %v3621_v30, %v1792_v43  ;;  %v3898_v34 = vsub.f32 %v3624_v3, %v1792_v43  ;;  %v3901_v17 = vsub.f32 %v4670_v2, %v1792_v43 }
 0x34f   : > { %4666 = vst [vmem:[#allocation35_spill] sm:$0xff] %v3884_v54  ;;  %4667 = vst [vmem:[#allocation64_spill] sm:$0xff] %v3887_v46  ;;  %v1872_v36 = vmul.f32 %v3881_v40, %v3881_v40  ;;  %v1873_v51 = vmul.f32 %v3884_v54, %v3884_v54  ;;  %v1889_v53 = vmul.f32 %v3867_v7, %v3867_v7  ;;  %v1795_v30 = vmul.f32 0.0012755102, %v1737_v45  ;;  %v1719_v50 = vpop.xlane.xlu0 %1718 }
 0x350   : > { %4668 = vst [vmem:[#allocation65_spill] sm:$0xff] %v3892_v15  ;;  %4669 = vst [vmem:[#allocation66_spill] sm:$0xff] %v3898_v34  ;;  %v1874_v3 = vmul.f32 %v3887_v46, %v3887_v46  ;;  %v1878_v5 = vmul.f32 %v3901_v17, %v3901_v17  ;;  %v1890_v43 = vmul.f32 %v3870_v37, %v3870_v37  ;;  %v1793_v47 = vmul.f32 0.0012755102, %v1719_v50 }
 0x351   : > { %4671 = vst [vmem:[#allocation36_spill] sm:$0xff] %v3901_v17  ;;  %v1875_v2 = vmul.f32 %v3892_v15, %v3892_v15  ;;  %v1876_v18 = vmul.f32 %v3895_v57, %v3895_v57  ;;  %v1942_v16 = vadd.f32 %v1873_v51, %v1872_v36  ;;  %v1877_v45 = vmul.f32 %v3898_v34, %v3898_v34  ;;  %v4672_v15 = vld [vmem:[#allocation42_spill] sm:$0xff] }
 0x352   : > { %v1891_v7 = vmul.f32 %v3873_v22, %v3873_v22  ;;  %v1960_v17 = vadd.f32 %v1887_v20, %v1886_v9  ;;  %v1947_v50 = vsel %vm1706_vm3, %v1878_v5, 0.0  ;;  %v3929_v37 = vsub.f32 %v3639_v56, %v1793_v47  ;;  %v4676_v56 = vld [vmem:[#allocation37_spill] sm:$0xff] }
 0x353   : > { %v1943_v46 = vadd.f32 %v1942_v16, %v1874_v3  ;;  %v3932_v54 = vsub.f32 %v4672_v15, %v1793_v47  ;;  %v1746_v36 = vpop.xlane.xlu0 %1745  ;;  %v3935_v34 = vsub.f32 %v3650_v29, %v1793_v47  ;;  %v3938_v22 = vsub.f32 %v3659_v6, %v1793_v47  ;;  %v4678_v15 = vld [vmem:[#allocation38_spill] sm:$0xff] }
 0x354   : > { %v1961_v51 = vadd.f32 %v1960_v17, %v1888_v10  ;;  %v3941_v25 = vsub.f32 %v3669_v19, %v1793_v47  ;;  %v3944_v9 = vsub.f32 %v3680_v61, %v1793_v47  ;;  %v3947_v20 = vsub.f32 %v4676_v56, %v1795_v30 }
 0x355   : > { %4673 = vst [vmem:[#allocation42_spill] sm:$0xff] %v3935_v34  ;;  %4674 = vst [vmem:[#allocation67_spill] sm:$0xff] %v3938_v22  ;;  %v1944_v16 = vadd.f32 %v1943_v46, %v1875_v2  ;;  %v3950_v3 = vsub.f32 %v4678_v15, %v1795_v30  ;;  %v3953_v29 = vsub.f32 %v3684_v27, %v1793_v47  ;;  %v1796_v46 = vmul.f32 0.0012755102, %v1746_v36  ;;  %v4680_v36 = vld [vmem:[#allocation39_spill] sm:$0xff] }
 0x356   : > { %4675 = vst [vmem:[#allocation68_spill] sm:$0xff] %v3941_v25  ;;  %4677 = vst [vmem:[#allocation37_spill] sm:$0xff] %v3947_v20  ;;  %v1962_v17 = vadd.f32 %v1961_v51, %v1889_v53  ;;  %v1879_v6 = vmul.f32 %v3929_v37, %v3929_v37  ;;  %v1880_v19 = vmul.f32 %v3932_v54, %v3932_v54  ;;  %v1965_v61 = vsel %vm1706_vm3, %v1892_v14, 0.0  ;;  %v4681_v14 = vld [vmem:[#allocation40_spill] sm:$0xff] }
 0x357   : > { %4679 = vst [vmem:[#allocation38_spill] sm:$0xff] %v3950_v3  ;;  %v1945_v10 = vadd.f32 %v1944_v16, %v1876_v18  ;;  %v1881_v5 = vmul.f32 %v3935_v34, %v3935_v34  ;;  %v1755_v2 = vpop.xlane.xlu1 %1754  ;;  %v1882_v53 = vmul.f32 %v3938_v22, %v3938_v22  ;;  %v1883_v27 = vmul.f32 %v3941_v25, %v3941_v25 }
 0x358   : > { %v1963_v56 = vadd.f32 %v1962_v17, %v1890_v43  ;;  %v1951_v47 = vadd.f32 %v1880_v19, %v1879_v6  ;;  %v1885_v15 = vmul.f32 %v3944_v9, %v3944_v9  ;;  %v3969_v18 = vsub.f32 %v4680_v36, %v1795_v30 }
 0x359   : > { %v1946_v51 = vadd.f32 %v1945_v10, %v1877_v45  ;;  %v3972_v16 = vsub.f32 %v4681_v14, %v1795_v30  ;;  %v1884_v43 = vmul.f32 %v3953_v29, %v3953_v29  ;;  %v3977_v22 = vsub.f32 %v3646_v11, %v1795_v30  ;;  %v4682_v45 = vld [vmem:[#allocation41_spill] sm:$0xff] }
 0x35a   : > { %v1964_v34 = vadd.f32 %v1963_v56, %v1891_v7  ;;  %v1952_v17 = vadd.f32 %v1951_v47, %v1881_v5  ;;  %v3980_v19 = vsub.f32 %v4682_v45, %v1795_v30  ;;  %v1893_v10 = vmul.f32 %v3947_v20, %v3947_v20 }
 0x35b   : > { %v1764_v25 = vpop.xlane.xlu0 %1763  ;;  %v1948_v6 = vadd.f32 %v1947_v50, %v1946_v51  ;;  %v1894_v36 = vmul.f32 %v3950_v3, %v3950_v3  ;;  %v1797_v14 = vmul.f32 0.0012755102, %v1755_v2  ;;  %v3987_v56 = vsub.f32 %v3654_v48, %v1795_v30 }
 0x35c   : > { %v1953_v7 = vadd.f32 %v1952_v17, %v1882_v53  ;;  %v1895_v11 = vmul.f32 %v3969_v18, %v3969_v18  ;;  %v3991_v5 = vmul.f32 0.0012755102, %v1764_v25  ;;  %v1966_v50 = vadd.f32 %v1965_v61, %v1964_v34 }
 0x35d   : > { %1949 = vadd.xlane.f32.xlu0 %v1948_v6  ;;  %v1956_v47 = vsel %vm1706_vm3, %v1885_v15, 0.0  ;;  %v1896_v51 = vmul.f32 %v3972_v16, %v3972_v16  ;;  %v1969_v3 = vadd.f32 %v1894_v36, %v1893_v10  ;;  %v3997_v2 = vsub.f32 %v3666_v8, %v1796_v46 }
 0x35e   : > { %v1773_v45 = vpop.xlane.xlu1 %1772  ;;  %v1954_v20 = vadd.f32 %v1953_v7, %v1883_v27  ;;  %v4000_v48 = vsub.f32 %v3672_v59, %v1796_v46  ;;  %v1897_v25 = vmul.f32 %v3977_v22, %v3977_v22  ;;  %v1899_v34 = vmul.f32 %v3980_v19, %v3980_v19 }
 0x35f   : > { %v4007_v30 = vsub.f32 %v3675_v55, %v1796_v46  ;;  %v4010_v61 = vsub.f32 %v3687_v26, %v1796_v46  ;;  %v1898_v8 = vmul.f32 %v3987_v56, %v3987_v56  ;;  %v1970_v27 = vadd.f32 %v1969_v3, %v1895_v11 }
 0x360   : > { %v1955_v53 = vadd.f32 %v1954_v20, %v1884_v43  ;;  %v4015_v59 = vsub.f32 %v3700_v62, %v1796_v46  ;;  %v4018_v15 = vsub.f32 %v3690_v4, %v1796_v46  ;;  %v1900_v17 = vmul.f32 %v3997_v2, %v3997_v2 }
 0x361   : > { %1967 = vadd.xlane.f32.xlu0 %v1966_v50  ;;  %v1901_v55 = vmul.f32 %v4000_v48, %v4000_v48  ;;  %v1902_v26 = vmul.f32 %v4007_v30, %v4007_v30  ;;  %v4026_v20 = vmul.f32 0.0012755102, %v1773_v45  ;;  %v1971_v6 = vadd.f32 %v1970_v27, %v1896_v51  ;;  %v4684_v27 = vld [vmem:[#allocation46_spill] sm:$0xff] }
 0x362   : > { %v1791_v43 = vpop.xlane.xlu1 %1790  ;;  %v1957_v3 = vadd.f32 %v1956_v47, %v1955_v53  ;;  %v4029_v62 = vsub.f32 %v3713_v12, %v1796_v46  ;;  %v1974_v4 = vsel %vm1706_vm3, %v1899_v34, 0.0  ;;  %v1903_v10 = vmul.f32 %v4010_v61, %v4010_v61 }
 0x363   : > { %v1906_v36 = vmul.f32 %v4018_v15, %v4018_v15  ;;  %v1978_v7 = vadd.f32 %v1901_v55, %v1900_v17  ;;  %v1972_v11 = vadd.f32 %v1971_v6, %v1897_v25  ;;  %v4037_v50 = vsub.f32 %v3697_v49, %v1797_v14  ;;  %v4686_v17 = vld [vmem:[#allocation43_spill] sm:$0xff] }
 0x364   : > { %1958 = vadd.xlane.f32.xlu1 %v1957_v3  ;;  %v4040_v47 = vsub.f32 %v3704_v23, %v1797_v14  ;;  %v4043_v12 = vsub.f32 %v3707_v0, %v1797_v14  ;;  %v4045_v46 = vmul.f32 0.0012755102, %v1791_v43  ;;  %v1904_v45 = vmul.f32 %v4015_v59, %v4015_v59 }
 0x365   : > { %4683 = vst [vmem:[#allocation39_spill] sm:$0xff] %v4037_v50  ;;  %v1782_v51 = vpop.xlane.xlu0 %1781  ;;  %v1979_v34 = vadd.f32 %v1978_v7, %v1902_v26  ;;  %v4050_v53 = vsub.f32 %v3719_v24, %v1797_v14  ;;  %v1973_v25 = vadd.f32 %v1972_v11, %v1898_v8  ;;  %v1905_v49 = vmul.f32 %v4029_v62, %v4029_v62  ;;  %v4688_v7 = vld [vmem:[#allocation48_spill] sm:$0xff] }
 0x366   : > { %v4055_v23 = vsub.f32 %v4684_v27, %v1797_v14  ;;  %v4058_v0 = vsub.f32 %v4686_v17, %v1797_v14  ;;  %v1907_v43 = vmul.f32 %v4037_v50, %v4037_v50  ;;  %v1908_v26 = vmul.f32 %v4040_v47, %v4040_v47  ;;  %v4689_v17 = vld [vmem:[#allocation44_spill] sm:$0xff] }
 0x367   : > { %v1980_v55 = vadd.f32 %v1979_v34, %v1903_v10  ;;  %v1909_v24 = vmul.f32 %v4043_v12, %v4043_v12  ;;  %v4066_v8 = vmul.f32 0.0012755102, %v1782_v51  ;;  %v1975_v3 = vadd.f32 %v1974_v4, %v1973_v25  ;;  %v4691_v4 = vld [vmem:[#allocation45_spill] sm:$0xff] }
 0x368   : > { %4685 = vst [vmem:[#allocation40_spill] sm:$0xff] %v4055_v23  ;;  %4687 = vst [vmem:[#allocation41_spill] sm:$0xff] %v4058_v0  ;;  %v1983_v6 = vsel %vm1706_vm3, %v1906_v36, 0.0  ;;  %v4070_v11 = vsub.f32 %v4688_v7, %v1797_v14  ;;  %v1910_v10 = vmul.f32 %v4050_v53, %v4050_v53  ;;  %v1987_v34 = vadd.f32 %v1908_v26, %v1907_v43  ;;  %v4693_v14 = vld [vmem:[#allocation47_spill] sm:$0xff] }
 0x369   : > { %v1981_v27 = vadd.f32 %v1980_v55, %v1904_v45  ;;  %v4076_v50 = vsub.f32 %v4689_v17, %v3991_v5  ;;  %1976 = vadd.xlane.f32.xlu1 %v1975_v3  ;;  %v1911_v51 = vmul.f32 %v4055_v23, %v4055_v23  ;;  %v4082_v25 = vsub.f32 %v4691_v4, %v3991_v5  ;;  %v4694_v45 = vld [vmem:[#allocation49_spill] sm:$0xff]  ;;  %v4696_v17 = vld [vmem:[#allocation50_spill] sm:$0xff] }
 0x36a   : > { %v4086_v36 = vsub.f32 %v4693_v14, %v3991_v5  ;;  %v4090_v55 = vsub.f32 %v4694_v45, %v3991_v5  ;;  %v1913_v26 = vmul.f32 %v4058_v0, %v4058_v0  ;;  %v1988_v3 = vadd.f32 %v1987_v34, %v1909_v24 }
 0x36b   : > { %4690 = vst [vmem:[#allocation46_spill] sm:$0xff] %v4076_v50  ;;  %4692 = vst [vmem:[#allocation43_spill] sm:$0xff] %v4082_v25  ;;  %v1982_v43 = vadd.f32 %v1981_v27, %v1905_v49  ;;  %v4096_v7 = vsub.f32 %v3767_v28, %v3991_v5  ;;  %v4100_v4 = vsub.f32 %v4696_v17, %v3991_v5 }
 0x36c   : > { %v1914_v14 = vmul.f32 %v4076_v50, %v4076_v50  ;;  %v1915_v45 = vmul.f32 %v4082_v25, %v4082_v25  ;;  %v1916_v49 = vmul.f32 %v4086_v36, %v4086_v36  ;;  %v1912_v24 = vmul.f32 %v4070_v11, %v4070_v11  ;;  %v4698_v25 = vld [vmem:[#allocation51_spill] sm:$0xff] }
 0x36d   : > { %4695 = vst [vmem:[#allocation48_spill] sm:$0xff] %v4096_v7  ;;  %4697 = vst [vmem:[#allocation44_spill] sm:$0xff] %v4100_v4  ;;  %v1984_v27 = vadd.f32 %v1983_v6, %v1982_v43  ;;  %v1989_v34 = vadd.f32 %v1988_v3, %v1910_v10  ;;  %v4112_v28 = vsub.f32 %v3771_v41, %v3991_v5  ;;  %v4700_v43 = vld [vmem:[#allocation52_spill] sm:$0xff]  ;;  %v4702_v5 = vld [vmem:[#allocation53_spill] sm:$0xff] }
 0x36e   : > { %v1917_v17 = vmul.f32 %v4090_v55, %v4090_v55  ;;  %v1920_v50 = vmul.f32 %v4100_v4, %v4100_v4  ;;  %v1996_v0 = vadd.f32 %v1915_v45, %v1914_v14  ;;  %v4120_v23 = vsub.f32 %v4698_v25, %v4026_v20 }
 0x36f   : > { %1985 = vadd.xlane.f32.xlu0 %v1984_v27  ;;  %v1990_v6 = vadd.f32 %v1989_v34, %v1911_v51  ;;  %v4124_v10 = vsub.f32 %v4700_v43, %v4026_v20  ;;  %v4128_v41 = vsub.f32 %v3763_v60, %v4026_v20  ;;  %v4132_v3 = vsub.f32 %v4702_v5, %v4026_v20 }
 0x370   : > { %4699 = vst [vmem:[#allocation45_spill] sm:$0xff] %v4120_v23  ;;  %v1992_v14 = vsel %vm1706_vm3, %v1913_v26, 0.0  ;;  %v1918_v25 = vmul.f32 %v4096_v7, %v4096_v7  ;;  %v1997_v45 = vadd.f32 %v1996_v0, %v1916_v49  ;;  %v4139_v51 = vsub.f32 %v3789_v1, %v4026_v20  ;;  %v4703_v0 = vld [vmem:[#allocation56_spill] sm:$0xff] }
 0x371   : > { %4701 = vst [vmem:[#allocation47_spill] sm:$0xff] %v4124_v10  ;;  %v1991_v27 = vadd.f32 %v1990_v6, %v1912_v24  ;;  %v4143_v34 = vsub.f32 %v3800_v21, %v4026_v20  ;;  %v1921_v60 = vmul.f32 %v4120_v23, %v4120_v23  ;;  %v1922_v43 = vmul.f32 %v4124_v10, %v4124_v10  ;;  %v4704_v10 = vld [vmem:[#allocation54_spill] sm:$0xff] }
 0x372   : > { %v1919_v26 = vmul.f32 %v4112_v28, %v4112_v28  ;;  %v1998_v5 = vadd.f32 %v1997_v45, %v1917_v17  ;;  %v4153_v49 = vsub.f32 %v4703_v0, %v4026_v20  ;;  %v1923_v1 = vmul.f32 %v4128_v41, %v4128_v41  ;;  %v4705_v17 = vld [vmem:[#allocation55_spill] sm:$0xff] }
 0x373   : > { %v1993_v24 = vadd.f32 %v1992_v14, %v1991_v27  ;;  %v2001_v21 = vsel %vm1706_vm3, %v1920_v50, 0.0  ;;  %v1924_v6 = vmul.f32 %v4132_v3, %v4132_v3  ;;  %v2005_v23 = vadd.f32 %v1922_v43, %v1921_v60 }
 0x374   : > { %v1999_v4 = vadd.f32 %v1998_v5, %v1918_v25  ;;  %v4162_v7 = vsub.f32 %v4704_v10, %v4045_v46  ;;  %v4166_v45 = vsub.f32 %v4705_v17, %v4045_v46  ;;  %v4170_v20 = vsub.f32 %v3796_v42, %v4045_v46 }
 0x375   : > { %1994 = vadd.xlane.f32.xlu1 %v1993_v24  ;;  %v1925_v50 = vmul.f32 %v4139_v51, %v4139_v51  ;;  %v1926_v14 = vmul.f32 %v4143_v34, %v4143_v34  ;;  %v2006_v25 = vadd.f32 %v2005_v23, %v1923_v1  ;;  %v4178_v10 = vsub.f32 %v3803_v63, %v4045_v46 }
 0x376   : > { %v2000_v27 = vadd.f32 %v1999_v4, %v1919_v26  ;;  %v1927_v60 = vmul.f32 %v4153_v49, %v4153_v49  ;;  %v4184_v42 = vsub.f32 %v3822_v52, %v4045_v46  ;;  %v1935_v43 = vmul.f32 %v4162_v7, %v4162_v7 }
 0x377   : > { %v2007_v5 = vadd.f32 %v2006_v25, %v1924_v6  ;;  %v4190_v0 = vsub.f32 %v3826_v38, %v4045_v46  ;;  %v1936_v63 = vmul.f32 %v4166_v45, %v4166_v45  ;;  %v1937_v23 = vmul.f32 %v4170_v20, %v4170_v20 }
 0x378   : > { %v2002_v4 = vadd.f32 %v2001_v21, %v2000_v27  ;;  %v4198_v26 = vsub.f32 %v3835_v32, %v4045_v46  ;;  %v1938_v52 = vmul.f32 %v4178_v10, %v4178_v10  ;;  %v4204_v38 = vsub.f32 %v3809_v13, %v4066_v8 }
 0x379   : > { %v2008_v1 = vadd.f32 %v2007_v5, %v1925_v50  ;;  %v2023_v24 = vadd.f32 %v1936_v63, %v1935_v43  ;;  %v4208_v6 = vsub.f32 %v3812_v58, %v4066_v8  ;;  %v2010_v21 = vsel %vm1706_vm3, %v1927_v60, 0.0 }
 0x37a   : > { %4706 = vst [vmem:[#allocation49_spill] sm:$0xff] %v4204_v38  ;;  %2003 = vadd.xlane.f32.xlu0 %v2002_v4  ;;  %v4213_v32 = vsub.f32 %v3816_v33, %v4066_v8  ;;  %v4217_v46 = vsub.f32 %v3829_v31, %v4066_v8  ;;  %v1939_v13 = vmul.f32 %v4184_v42, %v4184_v42 }
 0x37b   : > { %4707 = vst [vmem:[#allocation50_spill] sm:$0xff] %v4208_v6  ;;  %v2009_v17 = vadd.f32 %v2008_v1, %v1926_v14  ;;  %v1941_v50 = vmul.f32 %v4190_v0, %v4190_v0  ;;  %v2024_v58 = vadd.f32 %v2023_v24, %v1937_v23  ;;  %v4225_v25 = vsub.f32 %v3839_v44, %v4066_v8 }
 0x37c   : > { %4708 = vst [vmem:[#allocation51_spill] sm:$0xff] %v4213_v32  ;;  %4709 = vst [vmem:[#allocation52_spill] sm:$0xff] %v4217_v46  ;;  %v1928_v33 = vmul.f32 %v4204_v38, %v4204_v38  ;;  %v1929_v27 = vmul.f32 %v4208_v6, %v4208_v6  ;;  %v1930_v31 = vmul.f32 %v4213_v32, %v4213_v32 }
 0x37d   : > { %4710 = vst [vmem:[#allocation53_spill] sm:$0xff] %v4225_v25  ;;  %v2011_v14 = vadd.f32 %v2010_v21, %v2009_v17  ;;  %v1940_v60 = vmul.f32 %v4198_v26, %v4198_v26  ;;  %v2025_v43 = vadd.f32 %v2024_v58, %v1938_v52  ;;  %v4237_v5 = vsub.f32 %v3844_v39, %v4066_v8 }
 0x37e   : > { %v4241_v44 = vsub.f32 %v3849_v35, %v4066_v8  ;;  %v1931_v63 = vmul.f32 %v4217_v46, %v4217_v46  ;;  %v2014_v23 = vadd.f32 %v1929_v27, %v1928_v33  ;;  %v2028_v1 = vsel %vm1706_vm3, %v1941_v50, 0.0  ;;  %v2202_v50 = vld [vmem:[%s4468_s4] sm:$0xff] }
 0x37f   : > { %4711 = vst [vmem:[#allocation56_spill] sm:$0xff] %v4237_v5  ;;  %2012 = vadd.xlane.f32.xlu1 %v2011_v14  ;;  %v2026_v4 = vadd.f32 %v2025_v43, %v1939_v13  ;;  %v1932_v24 = vmul.f32 %v4225_v25, %v4225_v25  ;;  %v1934_v39 = vmul.f32 %v4237_v5, %v4237_v5  ;;  %v2206_v14 = vld [vmem:[%s4468_s4 + $0x20] sm:$0xff]  ;;  %v2208_v43 = vld [vmem:[%s4468_s4 + $0x30] sm:$0xff] }
 0x380   : > { %4712 = vst [vmem:[#allocation54_spill] sm:$0xff] %v4241_v44  ;;  %v2015_v52 = vadd.f32 %v2014_v23, %v1930_v31  ;;  %v1933_v35 = vmul.f32 %v4241_v44, %v4241_v44  ;;  %v2204_v31 = vld [vmem:[%s4468_s4 + $0x10] sm:$0xff]  ;;  %v2207_v23 = vld [vmem:[%s4468_s4 + $0x28] sm:$0xff] }
 0x381   : > { %v2027_v21 = vadd.f32 %v2026_v4, %v1940_v60  ;;  %v2019_v33 = vsel %vm1706_vm3, %v1934_v39, 0.0  ;;  %v2203_v60 = vld [vmem:[%s4468_s4 + $0x8] sm:$0xff]  ;;  %v2209_v4 = vld [vmem:[%s4468_s4 + $0x38] sm:$0xff] }
 0x382   : > { %v2016_v8 = vadd.f32 %v2015_v52, %v1931_v63  ;;  %v2205_v63 = vld [vmem:[%s4468_s4 + $0x18] sm:$0xff] }
 0x383   : > { %v2029_v17 = vadd.f32 %v2028_v1, %v2027_v21 }
 0x384   : > { %v2017_v58 = vadd.f32 %v2016_v8, %v1932_v24 }
 0x385   : > { %2030 = vadd.xlane.f32.xlu1 %v2029_v17 }
 0x386   : > { %v2018_v13 = vadd.f32 %v2017_v58, %v1933_v35 }
 0x388   : > { %v2020_v27 = vadd.f32 %v2019_v33, %v2018_v13  ;;  %v2042_v13 = vld [vmem:[%s4467_s3] sm:$0xff] }
 0x38a   : > { %2021 = vadd.xlane.f32.xlu0 %v2020_v27 }
 0x396   : > { %2214 = vperm.xlu1 %2801, %v2202_v50  }
 0x39a   : > { %2224 = vperm.xlu1 %2801, %v2204_v31  }
 0x39e   : > { %2234 = vperm.xlu1 %2801, %v2206_v14  }
 0x3a0   : > { %2219 = vperm.xlu0 %2802, %v2203_v60  }
 0x3a2   : > { %2244 = vperm.xlu1 %2801, %v2208_v43  }
 0x3a4   : > { %2229 = vperm.xlu0 %2802, %v2205_v63   ;;  %v2043_v63 = vld [vmem:[%s4467_s3 + $0x8] sm:$0xff] }
 0x3a8   : > { %2239 = vperm.xlu0 %2802, %v2207_v23  }
 0x3ac   : > { %2249 = vperm.xlu0 %2802, %v2209_v4  }
 0x3ea   : > { %v1950_v1 = vpop.xlane.xlu0 %1949 }
 0x3eb   : > { %v2032_v24 = vmul.f32 0.0012755102, %v1950_v1 }
 0x3ed   : > { %v2052_v52 = vadd.f32 0.001, %v2032_v24 }
 0x3ee   : > { %v1968_v21 = vpop.xlane.xlu0 %1967 }
 0x3ef   : > { %2803 = vrsqrt.f32 %v2052_v52  ;;  %v2034_v39 = vmul.f32 0.0012755102, %v1968_v21  ;;  %v2044_v21 = vld [vmem:[%s4467_s3 + $0x10] sm:$0xff] }
 0x3f1   : > { %v1959_v35 = vpop.xlane.xlu1 %1958  ;;  %v2054_v58 = vadd.f32 0.001, %v2034_v39 }
 0x3f2   : > { %v2033_v8 = vmul.f32 0.0012755102, %v1959_v35 }
 0x3f4   : > { %v2053_v17 = vadd.f32 0.001, %v2033_v8 }
 0x3f6   : > { %2805 = vrsqrt.f32 %v2053_v17  ;;  %v1977_v33 = vpop.xlane.xlu1 %1976 }
 0x3f7   : > { %2807 = vrsqrt.f32 %v2054_v58  ;;  %v2035_v27 = vmul.f32 0.0012755102, %v1977_v33  ;;  %v2045_v58 = vld [vmem:[%s4467_s3 + $0x18] sm:$0xff] }
 0x3f9   : > { %v2804_v50 = vpop.eup %2803  ;;  %v2055_v31 = vadd.f32 0.001, %v2035_v27 }
 0x3fa   : > { %v2072_v14 = vmul.f32 %v2804_v50, %v2042_v13 }
 0x3fb   : > { %2809 = vrsqrt.f32 %v2055_v31  ;;  %v2046_v31 = vld [vmem:[%s4467_s3 + $0x20] sm:$0xff] }
 0x3fc   : > { %v1986_v60 = vpop.xlane.xlu0 %1985  ;;  %2084 = vperm.xlu0 %2802, %v2072_v14  }
 0x3fd   : > { %v2036_v43 = vmul.f32 0.0012755102, %v1986_v60 }
 0x3ff   : > { %v2056_v23 = vadd.f32 0.001, %v2036_v43 }
 0x400   : > { %v2806_v4 = vpop.eup %2805 }
 0x401   : > { %2811 = vrsqrt.f32 %v2056_v23  ;;  %v2073_v1 = vmul.f32 %v2806_v4, %v2043_v63  ;;  %v2808_v24 = vpop.eup %2807  ;;  %v2047_v4 = vld [vmem:[%s4467_s3 + $0x28] sm:$0xff] }
 0x402   : > { %v1995_v52 = vpop.xlane.xlu1 %1994  ;;  %v2074_v8 = vmul.f32 %v2808_v24, %v2044_v21 }
 0x403   : > { %v2037_v39 = vmul.f32 0.0012755102, %v1995_v52  ;;  %2089 = vperm.xlu1 %2801, %v2073_v1  }
 0x405   : > { %v2057_v35 = vadd.f32 0.001, %v2037_v39  ;;  %v2810_v17 = vpop.eup %2809  ;;  %v2048_v39 = vld [vmem:[%s4467_s3 + $0x30] sm:$0xff] }
 0x406   : > { %v2075_v27 = vmul.f32 %v2810_v17, %v2045_v58 }
 0x407   : > { %2813 = vrsqrt.f32 %v2057_v35  ;;  %v2004_v33 = vpop.xlane.xlu0 %2003  ;;  %2094 = vperm.xlu1 %2801, %v2074_v8  }
 0x408   : > { %v2038_v13 = vmul.f32 0.0012755102, %v2004_v33 }
 0x40a   : > { %v2058_v50 = vadd.f32 0.001, %v2038_v13  ;;  %v2049_v13 = vld [vmem:[%s4467_s3 + $0x38] sm:$0xff] }
 0x40b   : > { %v2812_v14 = vpop.eup %2811  ;;  %2099 = vperm.xlu1 %2801, %v2075_v27  }
 0x40c   : > { %2815 = vrsqrt.f32 %v2058_v50  ;;  %v2013_v60 = vpop.xlane.xlu1 %2012  ;;  %v2076_v63 = vmul.f32 %v2812_v14, %v2046_v31  ;;  %v2051_v14 = vld [vmem:[%s4467_s3 + $0x48] sm:$0xff] }
 0x40d   : > { %v2039_v43 = vmul.f32 0.0012755102, %v2013_v60 }
 0x40f   : > { %v2059_v23 = vadd.f32 0.001, %v2039_v43  ;;  %2104 = vperm.xlu1 %2801, %v2076_v63   ;;  %v2050_v63 = vld [vmem:[%s4467_s3 + $0x40] sm:$0xff] }
 0x411   : > { %v2814_v1 = vpop.eup %2813  ;;  %2817 = vrsqrt.f32 %v2059_v23  ;;  %v2211_v23 = vld [vmem:[%s4468_s4 + $0x48] sm:$0xff] }
 0x412   : > { %v2031_v24 = vpop.xlane.xlu1 %2030  ;;  %v2077_v52 = vmul.f32 %v2814_v1, %v2047_v4 }
 0x413   : > { %v2041_v21 = vmul.f32 0.0012755102, %v2031_v24  ;;  %v2210_v24 = vld [vmem:[%s4468_s4 + $0x40] sm:$0xff] }
 0x414   : > { %2109 = vperm.xlu1 %2801, %v2077_v52  }
 0x415   : > { %v2061_v35 = vadd.f32 0.001, %v2041_v21 }
 0x416   : > { %v2816_v8 = vpop.eup %2815 }
 0x417   : > { %2819 = vrsqrt.f32 %v2061_v35  ;;  %v2022_v17 = vpop.xlane.xlu0 %2021  ;;  %v2078_v58 = vmul.f32 %v2816_v8, %v2048_v39  ;;  %v2215_v39 = vpop.permute.xlu1 %2214 }
 0x418   : > { %v2040_v33 = vmul.f32 0.0012755102, %v2022_v17 }
 0x419   : > { %2114 = vperm.xlu1 %2801, %v2078_v58  }
 0x41a   : > { %v2060_v27 = vadd.f32 0.001, %v2040_v33 }
 0x41b   : > { %v2818_v50 = vpop.eup %2817  ;;  %v2225_v8 = vpop.permute.xlu1 %2224 }
 0x41c   : > { %2821 = vrsqrt.f32 %v2060_v27  ;;  %v2079_v31 = vmul.f32 %v2818_v50, %v2049_v13  ;;  %v4713_v27 = vld [vmem:[#allocation35_spill] sm:$0xff] }
 0x41e   : > { %2119 = vperm.xlu1 %2801, %v2079_v31   ;;  %v4714_v31 = vld [vmem:[#allocation64_spill] sm:$0xff] }
 0x41f   : > { %v2220_v52 = vpop.permute.xlu0 %2219  ;;  %v4319_v58 = vpop.permute.xlu1 %2234 }
 0x421   : > { %v2820_v60 = vpop.eup %2819 }
 0x422   : > { %v2081_v43 = vmul.f32 %v2820_v60, %v2051_v14  ;;  %v4715_v60 = vld [vmem:[#allocation65_spill] sm:$0xff] }
 0x423   : > { %v4313_v21 = vpop.permute.xlu0 %2229  ;;  %v4328_v5 = vpop.permute.xlu1 %2244 }
 0x424   : > { %2129 = vperm.xlu0 %2802, %v2081_v43  }
 0x426   : > { %v2822_v4 = vpop.eup %2821 }
 0x427   : > { %v2080_v1 = vmul.f32 %v2822_v4, %v2050_v63  ;;  %v4315_v35 = vpop.permute.xlu0 %2239 }
 0x428   : > { %2259 = vperm.xlu0 %2802, %v2211_v23   ;;  %v4716_v23 = vld [vmem:[#allocation66_spill] sm:$0xff] }
 0x429   : > { %2124 = vperm.xlu1 %2801, %v2080_v1   ;;  %v4717_v1 = vld [vmem:[#allocation36_spill] sm:$0xff] }
 0x42b   : > { %v4317_v17 = vpop.permute.xlu0 %2249 }
 0x42d   : > { %2254 = vperm.xlu1 %2801, %v2210_v24  }
 0x47b   : > { %v2085_v33 = vpop.permute.xlu0 %2084 }
 0x47c   : > { %v2132_v13 = vmul.f32 %v2085_v33, %v3881_v40  ;;  %v2133_v50 = vmul.f32 %v2085_v33, %v4713_v27  ;;  %v2134_v14 = vmul.f32 %v2085_v33, %v4714_v31  ;;  %v2135_v43 = vmul.f32 %v2085_v33, %v4715_v60  ;;  %v4719_v31 = vld [vmem:[#allocation67_spill] sm:$0xff]  ;;  %v4720_v60 = vld [vmem:[#allocation68_spill] sm:$0xff] }
 0x47d   : > { %v2136_v63 = vmul.f32 %v2085_v33, %v3895_v57  ;;  %v2137_v4 = vmul.f32 %v2085_v33, %v4716_v23  ;;  %v2138_v24 = vmul.f32 %v2085_v33, %v4717_v1  ;;  %v4722_v1 = vld [vmem:[#allocation58_spill] sm:$0xff] }
 0x47e   : > { %v2262_v44 = vadd.f32 %v2215_v39, %v2132_v13  ;;  %v2263_v25 = vadd.f32 %v2215_v39, %v2133_v50  ;;  %v2264_v46 = vadd.f32 %v2215_v39, %v2134_v14  ;;  %v2265_v32 = vadd.f32 %v2215_v39, %v2135_v43  ;;  %v4718_v13 = vld [vmem:[#allocation42_spill] sm:$0xff] }
 0x47f   : > { %v2266_v6 = vadd.f32 %v2215_v39, %v2136_v63  ;;  %v2267_v40 = vadd.f32 %v2215_v39, %v2137_v4  ;;  %v2268_v38 = vadd.f32 %v2215_v39, %v2138_v24 }
 0x480   : > { %2332 = vst [vmem:[#allocation2] sm:$0xff] %v2262_v44  ;;  %2333 = vst [vmem:[#allocation2 + $0x8] sm:$0xff] %v2263_v25 }
 0x481   : > { %2334 = vst [vmem:[#allocation2 + $0x10] sm:$0xff] %v2264_v46  ;;  %2335 = vst [vmem:[#allocation2 + $0x18] sm:$0xff] %v2265_v32 }
 0x482   : > { %2336 = vst [vmem:[#allocation2 + $0x20] sm:$0xff] %v2266_v6  ;;  %2337 = vst [vmem:[#allocation2 + $0x28] sm:$0xff] %v2267_v40  ;;  %v2090_v57 = vpop.permute.xlu1 %2089  ;;  %v4723_v40 = vld [vmem:[#allocation59_spill] sm:$0xff] }
 0x483   : > { %2338 = vst.msk [vmem:[#allocation2 + $0x30] sm:$0xff] %vm1706_vm3, %v2268_v38  ;;  %v2139_v33 = vmul.f32 %v2090_v57, %v3929_v37  ;;  %v2140_v27 = vmul.f32 %v2090_v57, %v3932_v54  ;;  %v2141_v50 = vmul.f32 %v2090_v57, %v4718_v13  ;;  %v2142_v14 = vmul.f32 %v2090_v57, %v4719_v31  ;;  %v4721_v54 = vld [vmem:[#allocation57_spill] sm:$0xff]  ;;  %v4724_v13 = vld [vmem:[#allocation60_spill] sm:$0xff] }
 0x484   : > { %v2143_v43 = vmul.f32 %v2090_v57, %v4720_v60  ;;  %v2144_v44 = vmul.f32 %v2090_v57, %v3953_v29  ;;  %v2145_v46 = vmul.f32 %v2090_v57, %v3944_v9  ;;  %v4725_v57 = vld [vmem:[#allocation61_spill] sm:$0xff] }
 0x485   : > { %v2269_v32 = vadd.f32 %v2220_v52, %v2139_v33  ;;  %v2270_v6 = vadd.f32 %v2220_v52, %v2140_v27  ;;  %v2271_v25 = vadd.f32 %v2220_v52, %v2141_v50  ;;  %v2272_v39 = vadd.f32 %v2220_v52, %v2142_v14  ;;  %v4727_v50 = vld [vmem:[#allocation63_spill] sm:$0xff] }
 0x486   : > { %v2273_v38 = vadd.f32 %v2220_v52, %v2143_v43  ;;  %v2274_v63 = vadd.f32 %v2220_v52, %v2144_v44  ;;  %v2275_v23 = vadd.f32 %v2220_v52, %v2145_v46  ;;  %v2095_v37 = vpop.permute.xlu1 %2094  ;;  %v4726_v52 = vld [vmem:[#allocation62_spill] sm:$0xff] }
 0x487   : > { %2339 = vst [vmem:[#allocation2 + $0x38] sm:$0xff] %v2269_v32  ;;  %2340 = vst [vmem:[#allocation2 + $0x40] sm:$0xff] %v2270_v6  ;;  %v2146_v4 = vmul.f32 %v2095_v37, %v4721_v54  ;;  %v2147_v24 = vmul.f32 %v2095_v37, %v4722_v1  ;;  %v2148_v29 = vmul.f32 %v2095_v37, %v4723_v40 }
 0x488   : > { %2341 = vst [vmem:[#allocation2 + $0x48] sm:$0xff] %v2271_v25  ;;  %2342 = vst [vmem:[#allocation2 + $0x50] sm:$0xff] %v2272_v39  ;;  %v2149_v9 = vmul.f32 %v2095_v37, %v4724_v13  ;;  %v2150_v33 = vmul.f32 %v2095_v37, %v4725_v57  ;;  %v2151_v27 = vmul.f32 %v2095_v37, %v4726_v52  ;;  %v4728_v39 = vld [vmem:[#allocation37_spill] sm:$0xff] }
 0x489   : > { %2343 = vst [vmem:[#allocation2 + $0x58] sm:$0xff] %v2273_v38  ;;  %2344 = vst [vmem:[#allocation2 + $0x60] sm:$0xff] %v2274_v63  ;;  %v2152_v31 = vmul.f32 %v2095_v37, %v4727_v50  ;;  %v2276_v14 = vadd.f32 %v2225_v8, %v2146_v4  ;;  %v2277_v60 = vadd.f32 %v2225_v8, %v2147_v24  ;;  %v4729_v63 = vld [vmem:[#allocation38_spill] sm:$0xff] }
 0x48a   : > { %2345 = vst.msk [vmem:[#allocation2 + $0x68] sm:$0xff] %vm1706_vm3, %v2275_v23  ;;  %v2278_v43 = vadd.f32 %v2225_v8, %v2148_v29  ;;  %v2279_v44 = vadd.f32 %v2225_v8, %v2149_v9  ;;  %v2280_v46 = vadd.f32 %v2225_v8, %v2150_v33  ;;  %v2281_v32 = vadd.f32 %v2225_v8, %v2151_v27  ;;  %v2100_v25 = vpop.permute.xlu1 %2099 }
 0x48b   : > { %v2282_v6 = vadd.f32 %v2225_v8, %v2152_v31  ;;  %2346 = vst [vmem:[#allocation2 + $0x70] sm:$0xff] %v2276_v14  ;;  %2347 = vst [vmem:[#allocation2 + $0x78] sm:$0xff] %v2277_v60  ;;  %v2153_v38 = vmul.f32 %v2100_v25, %v4728_v39  ;;  %v2154_v23 = vmul.f32 %v2100_v25, %v4729_v63 }
 0x48c   : > { %2348 = vst [vmem:[#allocation2 + $0x80] sm:$0xff] %v2278_v43  ;;  %2349 = vst [vmem:[#allocation2 + $0x88] sm:$0xff] %v2279_v44  ;;  %v2155_v54 = vmul.f32 %v2100_v25, %v3969_v18  ;;  %v2156_v37 = vmul.f32 %v2100_v25, %v3972_v16  ;;  %v2157_v4 = vmul.f32 %v2100_v25, %v3977_v22 }
 0x48d   : > { %2350 = vst [vmem:[#allocation2 + $0x90] sm:$0xff] %v2280_v46  ;;  %2351 = vst [vmem:[#allocation2 + $0x98] sm:$0xff] %v2281_v32  ;;  %v2158_v8 = vmul.f32 %v2100_v25, %v3987_v56  ;;  %v2159_v1 = vmul.f32 %v2100_v25, %v3980_v19  ;;  %v2283_v24 = vadd.f32 %v4313_v21, %v2153_v38  ;;  %v4731_v46 = vld [vmem:[#allocation40_spill] sm:$0xff] }
 0x48e   : > { %2352 = vst.msk [vmem:[#allocation2 + $0xa0] sm:$0xff] %vm1706_vm3, %v2282_v6  ;;  %v2284_v40 = vadd.f32 %v4313_v21, %v2154_v23  ;;  %v2285_v29 = vadd.f32 %v4313_v21, %v2155_v54  ;;  %v2286_v18 = vadd.f32 %v4313_v21, %v2156_v37  ;;  %v2287_v16 = vadd.f32 %v4313_v21, %v2157_v4  ;;  %v2105_v57 = vpop.permute.xlu1 %2104  ;;  %v4732_v6 = vld [vmem:[#allocation41_spill] sm:$0xff]  ;;  %v4733_v54 = vld [vmem:[#allocation46_spill] sm:$0xff]  ;;  %v4734_v4 = vld [vmem:[#allocation43_spill] sm:$0xff] }
 0x48f   : > { %v2288_v13 = vadd.f32 %v4313_v21, %v2158_v8  ;;  %v2289_v9 = vadd.f32 %v4313_v21, %v2159_v1  ;;  %2353 = vst [vmem:[#allocation2 + $0xa8] sm:$0xff] %v2283_v24  ;;  %v2160_v22 = vmul.f32 %v2105_v57, %v3997_v2  ;;  %v2161_v19 = vmul.f32 %v2105_v57, %v4000_v48 }
 0x490   : > { %2354 = vst [vmem:[#allocation2 + $0xb0] sm:$0xff] %v2284_v40  ;;  %2355 = vst [vmem:[#allocation2 + $0xb8] sm:$0xff] %v2285_v29  ;;  %v2162_v56 = vmul.f32 %v2105_v57, %v4007_v30  ;;  %v2163_v33 = vmul.f32 %v2105_v57, %v4010_v61  ;;  %v2164_v52 = vmul.f32 %v2105_v57, %v4015_v59  ;;  %v4735_v40 = vld [vmem:[#allocation48_spill] sm:$0xff] }
 0x491   : > { %2356 = vst [vmem:[#allocation2 + $0xc0] sm:$0xff] %v2286_v18  ;;  %2357 = vst [vmem:[#allocation2 + $0xc8] sm:$0xff] %v2287_v16  ;;  %v2165_v21 = vmul.f32 %v2105_v57, %v4029_v62  ;;  %v2166_v27 = vmul.f32 %v2105_v57, %v4018_v15  ;;  %v2290_v50 = vadd.f32 %v4319_v58, %v2160_v22  ;;  %v4730_v15 = vld [vmem:[#allocation39_spill] sm:$0xff]  ;;  %v4736_v18 = vld [vmem:[#allocation44_spill] sm:$0xff] }
 0x492   : > { %2358 = vst [vmem:[#allocation2 + $0xd0] sm:$0xff] %v2288_v13  ;;  %2359 = vst.msk [vmem:[#allocation2 + $0xd8] sm:$0xff] %vm1706_vm3, %v2289_v9  ;;  %v2291_v2 = vadd.f32 %v4319_v58, %v2161_v19  ;;  %v2292_v48 = vadd.f32 %v4319_v58, %v2162_v56  ;;  %v2293_v30 = vadd.f32 %v4319_v58, %v2163_v33  ;;  %v4737_v56 = vld [vmem:[#allocation45_spill] sm:$0xff] }
 0x493   : > { %v2294_v61 = vadd.f32 %v4319_v58, %v2164_v52  ;;  %v2295_v31 = vadd.f32 %v4319_v58, %v2165_v21  ;;  %v2296_v14 = vadd.f32 %v4319_v58, %v2166_v27  ;;  %2360 = vst [vmem:[#allocation2 + $0xe0] sm:$0xff] %v2290_v50  ;;  %v2110_v59 = vpop.permute.xlu1 %2109  ;;  %v4738_v52 = vld [vmem:[#allocation47_spill] sm:$0xff] }
 0x494   : > { %2361 = vst [vmem:[#allocation2 + $0xe8] sm:$0xff] %v2291_v2  ;;  %2362 = vst [vmem:[#allocation2 + $0xf0] sm:$0xff] %v2292_v48  ;;  %v2167_v62 = vmul.f32 %v2110_v59, %v4730_v15  ;;  %v2168_v60 = vmul.f32 %v2110_v59, %v4040_v47  ;;  %v2169_v43 = vmul.f32 %v2110_v59, %v4043_v12 }
 0x495   : > { %2363 = vst [vmem:[#allocation2 + $0xf8] sm:$0xff] %v2293_v30  ;;  %2364 = vst [vmem:[#allocation2 + $0x100] sm:$0xff] %v2294_v61  ;;  %v2170_v44 = vmul.f32 %v2110_v59, %v4050_v53  ;;  %v2171_v32 = vmul.f32 %v2110_v59, %v4731_v46  ;;  %v2172_v58 = vmul.f32 %v2110_v59, %v4070_v11 }
 0x496   : > { %2365 = vst [vmem:[#allocation2 + $0x108] sm:$0xff] %v2295_v31  ;;  %2366 = vst.msk [vmem:[#allocation2 + $0x110] sm:$0xff] %vm1706_vm3, %v2296_v14  ;;  %v2173_v25 = vmul.f32 %v2110_v59, %v4732_v6  ;;  %v2297_v39 = vadd.f32 %v4315_v35, %v2167_v62  ;;  %v2298_v38 = vadd.f32 %v4315_v35, %v2168_v60 }
 0x497   : > { %v2299_v63 = vadd.f32 %v4315_v35, %v2169_v43  ;;  %v2300_v23 = vadd.f32 %v4315_v35, %v2170_v44  ;;  %v2301_v47 = vadd.f32 %v4315_v35, %v2171_v32  ;;  %v2302_v12 = vadd.f32 %v4315_v35, %v2172_v58 }
 0x498   : > { %v2303_v53 = vadd.f32 %v4315_v35, %v2173_v25  ;;  %2367 = vst [vmem:[#allocation2 + $0x118] sm:$0xff] %v2297_v39  ;;  %2368 = vst [vmem:[#allocation2 + $0x120] sm:$0xff] %v2298_v38  ;;  %v2115_v11 = vpop.permute.xlu1 %2114 }
 0x499   : > { %2369 = vst [vmem:[#allocation2 + $0x128] sm:$0xff] %v2299_v63  ;;  %2370 = vst [vmem:[#allocation2 + $0x130] sm:$0xff] %v2300_v23  ;;  %v2174_v37 = vmul.f32 %v2115_v11, %v4733_v54  ;;  %v2175_v8 = vmul.f32 %v2115_v11, %v4734_v4  ;;  %v2176_v1 = vmul.f32 %v2115_v11, %v4086_v36  ;;  %v4742_v63 = vld [vmem:[#allocation52_spill] sm:$0xff] }
 0x49a   : > { %2371 = vst [vmem:[#allocation2 + $0x138] sm:$0xff] %v2301_v47  ;;  %2372 = vst [vmem:[#allocation2 + $0x140] sm:$0xff] %v2302_v12  ;;  %v2177_v24 = vmul.f32 %v2115_v11, %v4090_v55  ;;  %v2178_v29 = vmul.f32 %v2115_v11, %v4735_v40  ;;  %v2179_v35 = vmul.f32 %v2115_v11, %v4112_v28  ;;  %v4743_v47 = vld [vmem:[#allocation53_spill] sm:$0xff]  ;;  %v4745_v54 = vld [vmem:[#allocation56_spill] sm:$0xff] }
 0x49b   : > { %2373 = vst.msk [vmem:[#allocation2 + $0x148] sm:$0xff] %vm1706_vm3, %v2303_v53  ;;  %v2180_v16 = vmul.f32 %v2115_v11, %v4736_v18  ;;  %v2304_v13 = vadd.f32 %v4328_v5, %v2174_v37  ;;  %v2305_v9 = vadd.f32 %v4328_v5, %v2175_v8  ;;  %v2306_v57 = vadd.f32 %v4328_v5, %v2176_v1  ;;  %v4744_v53 = vld [vmem:[#allocation54_spill] sm:$0xff] }
 0x49c   : > { %v2307_v22 = vadd.f32 %v4328_v5, %v2177_v24  ;;  %v2308_v19 = vadd.f32 %v4328_v5, %v2178_v29  ;;  %v2309_v36 = vadd.f32 %v4328_v5, %v2179_v35 }
 0x49d   : > { %v2310_v55 = vadd.f32 %v4328_v5, %v2180_v16  ;;  %2374 = vst [vmem:[#allocation2 + $0x150] sm:$0xff] %v2304_v13  ;;  %2375 = vst [vmem:[#allocation2 + $0x158] sm:$0xff] %v2305_v9  ;;  %v2120_v28 = vpop.permute.xlu1 %2119 }
 0x49e   : > { %2376 = vst [vmem:[#allocation2 + $0x160] sm:$0xff] %v2306_v57  ;;  %2377 = vst [vmem:[#allocation2 + $0x168] sm:$0xff] %v2307_v22  ;;  %v2181_v33 = vmul.f32 %v2120_v28, %v4737_v56  ;;  %v2182_v21 = vmul.f32 %v2120_v28, %v4738_v52  ;;  %v2183_v27 = vmul.f32 %v2120_v28, %v4128_v41 }
 0x49f   : > { %2378 = vst [vmem:[#allocation2 + $0x170] sm:$0xff] %v2308_v19  ;;  %2379 = vst [vmem:[#allocation2 + $0x178] sm:$0xff] %v2309_v36  ;;  %v2184_v50 = vmul.f32 %v2120_v28, %v4132_v3  ;;  %v2185_v2 = vmul.f32 %v2120_v28, %v4139_v51  ;;  %v2186_v5 = vmul.f32 %v2120_v28, %v4143_v34 }
 0x4a0   : > { %2380 = vst.msk [vmem:[#allocation2 + $0x180] sm:$0xff] %vm1706_vm3, %v2310_v55  ;;  %v2187_v48 = vmul.f32 %v2120_v28, %v4153_v49  ;;  %v2311_v30 = vadd.f32 %v4317_v17, %v2181_v33  ;;  %v2312_v61 = vadd.f32 %v4317_v17, %v2182_v21  ;;  %v2313_v31 = vadd.f32 %v4317_v17, %v2183_v27 }
 0x4a1   : > { %v2314_v14 = vadd.f32 %v4317_v17, %v2184_v50  ;;  %v2315_v59 = vadd.f32 %v4317_v17, %v2185_v2  ;;  %v2316_v41 = vadd.f32 %v4317_v17, %v2186_v5 }
 0x4a2   : > { %v2317_v3 = vadd.f32 %v4317_v17, %v2187_v48  ;;  %2381 = vst [vmem:[#allocation2 + $0x188] sm:$0xff] %v2311_v30  ;;  %2382 = vst [vmem:[#allocation2 + $0x190] sm:$0xff] %v2312_v61 }
 0x4a3   : > { %2383 = vst [vmem:[#allocation2 + $0x198] sm:$0xff] %v2313_v31  ;;  %2384 = vst [vmem:[#allocation2 + $0x1a0] sm:$0xff] %v2314_v14  ;;  %v2130_v51 = vpop.permute.xlu0 %2129 }
 0x4a4   : > { %2385 = vst [vmem:[#allocation2 + $0x1a8] sm:$0xff] %v2315_v59  ;;  %2386 = vst [vmem:[#allocation2 + $0x1b0] sm:$0xff] %v2316_v41  ;;  %v2195_v34 = vmul.f32 %v2130_v51, %v4162_v7  ;;  %v2196_v49 = vmul.f32 %v2130_v51, %v4166_v45  ;;  %v2197_v15 = vmul.f32 %v2130_v51, %v4170_v20  ;;  %v4739_v45 = vld [vmem:[#allocation49_spill] sm:$0xff] }
 0x4a5   : > { %2387 = vst.msk [vmem:[#allocation2 + $0x1b8] sm:$0xff] %vm1706_vm3, %v2317_v3  ;;  %v2198_v62 = vmul.f32 %v2130_v51, %v4178_v10  ;;  %v2199_v60 = vmul.f32 %v2130_v51, %v4184_v42  ;;  %v2200_v17 = vmul.f32 %v2130_v51, %v4198_v26  ;;  %v2201_v43 = vmul.f32 %v2130_v51, %v4190_v0  ;;  %v4740_v10 = vld [vmem:[#allocation50_spill] sm:$0xff]  ;;  %v4741_v0 = vld [vmem:[#allocation51_spill] sm:$0xff] }
 0x4a7   : > { %v2260_v44 = vpop.permute.xlu0 %2259 }
 0x4a8   : > { %v2325_v46 = vadd.f32 %v2260_v44, %v2195_v34  ;;  %v2326_v32 = vadd.f32 %v2260_v44, %v2196_v49  ;;  %v2327_v58 = vadd.f32 %v2260_v44, %v2197_v15  ;;  %v2328_v6 = vadd.f32 %v2260_v44, %v2198_v62  ;;  %v2125_v25 = vpop.permute.xlu1 %2124 }
 0x4a9   : > { %v2329_v39 = vadd.f32 %v2260_v44, %v2199_v60  ;;  %v2330_v7 = vadd.f32 %v2260_v44, %v2200_v17  ;;  %v2331_v38 = vadd.f32 %v2260_v44, %v2201_v43  ;;  %v2188_v20 = vmul.f32 %v2125_v25, %v4739_v45 }
 0x4aa   : > { %2395 = vst [vmem:[#allocation2 + $0x1f8] sm:$0xff] %v2325_v46  ;;  %2396 = vst [vmem:[#allocation2 + $0x200] sm:$0xff] %v2326_v32  ;;  %v2189_v42 = vmul.f32 %v2125_v25, %v4740_v10  ;;  %v2190_v26 = vmul.f32 %v2125_v25, %v4741_v0  ;;  %v2191_v23 = vmul.f32 %v2125_v25, %v4742_v63 }
 0x4ab   : > { %2397 = vst [vmem:[#allocation2 + $0x208] sm:$0xff] %v2327_v58  ;;  %2398 = vst [vmem:[#allocation2 + $0x210] sm:$0xff] %v2328_v6  ;;  %v2192_v12 = vmul.f32 %v2125_v25, %v4743_v47  ;;  %v2193_v11 = vmul.f32 %v2125_v25, %v4744_v53  ;;  %v2194_v37 = vmul.f32 %v2125_v25, %v4745_v54 }
 0x4ac   : > { %2399 = vst [vmem:[#allocation2 + $0x218] sm:$0xff] %v2329_v39  ;;  %2400 = vst [vmem:[#allocation2 + $0x220] sm:$0xff] %v2330_v7  ;;  %v2255_v4 = vpop.permute.xlu1 %2254 }
 0x4ad   : > { %2401 = vst.msk [vmem:[#allocation2 + $0x228] sm:$0xff] %vm1706_vm3, %v2331_v38  ;;  %v2318_v8 = vadd.f32 %v2255_v4, %v2188_v20  ;;  %v2319_v1 = vadd.f32 %v2255_v4, %v2189_v42  ;;  %v2320_v24 = vadd.f32 %v2255_v4, %v2190_v26  ;;  %v2321_v40 = vadd.f32 %v2255_v4, %v2191_v23 }
 0x4ae   : > { %v2322_v29 = vadd.f32 %v2255_v4, %v2192_v12  ;;  %v2323_v35 = vadd.f32 %v2255_v4, %v2193_v11  ;;  %v2324_v18 = vadd.f32 %v2255_v4, %v2194_v37 }
 0x4af   : > { %2388 = vst [vmem:[#allocation2 + $0x1c0] sm:$0xff] %v2318_v8  ;;  %2389 = vst [vmem:[#allocation2 + $0x1c8] sm:$0xff] %v2319_v1 }
 0x4b0   : > { %2390 = vst [vmem:[#allocation2 + $0x1d0] sm:$0xff] %v2320_v24  ;;  %2391 = vst [vmem:[#allocation2 + $0x1d8] sm:$0xff] %v2321_v40 }
 0x4b1   : > { %2392 = vst [vmem:[#allocation2 + $0x1e0] sm:$0xff] %v2322_v29  ;;  %2393 = vst [vmem:[#allocation2 + $0x1e8] sm:$0xff] %v2323_v35 }
 0x4b2   : > { %2394 = vst.msk [vmem:[#allocation2 + $0x1f0] sm:$0xff] %vm1706_vm3, %v2324_v18 }
 0x4b3 PF: > { %p2702_p9 = scmp.eq.s32.totalorder %s2903_s19, 2  ;;  %s2864_s26 = smov [#allocation2]  }
 0x4b4   : > { %s2408_s27 = sshll.u32 %s2864_s26, 4  ;;  %s2409_s27 = int_to_ptr.vmem [resolvable:$true] %s2408_s27 }
 0x4b5   : > { %s2823_s28 = scalar_lea.vmem %s2409_s27, 8960  ;;  %p2830_p13 = scmp.lt.s32.totalorder %s2409_s27, %s2409_s27 }
 0x4b6   : > { %p2824_p10 = scmp.ne.s32.totalorder %s2409_s27, %s2823_s28  ;;  %p2831_p0 = scmp.lt.s32.totalorder %s2823_s28, %s2823_s28 }
 0x4b8   : > { %p2825_p11 = pnand %p2824_p10, %p2702_p9  ;;  %p2832_p1 = por %p2831_p0, %p2830_p13 }
 0x4ba   : > { %p2826_p12 = pneg %p2825_p11 }
 0x4bc   : > { %p2833_p2 = pnand %p2832_p1, %p2826_p12 }
 0x4be   : > { %2836 = shalt.err (!%p2833_p2)
}
 0x4bf   : > { %s2837_s6 = scalar_lea.hbm %s4469_s5, 8960 }
 0x4c0   : > { %p2838_p3 = scmp.ne.s32.totalorder %s4469_s5, %s2837_s6  ;;  %p2843_p6 = scmp.lt.u32.totalorder %s2837_s6, %s4469_s5 }
 0x4c2   : > { %p2839_p4 = pnand %p2838_p3, %p2702_p9 }
 0x4c4   : > { %p2840_p5 = pneg %p2839_p4 }
 0x4c6   : > { %p2845_p7 = pnand %p2843_p6, %p2840_p5 }
 0x4c8   : > { %2848 = shalt.err (!%p2845_p7)
}
 0x4c9   : > { %s2865_s11 = smov 896   ;;  %s2866_s12 = smov 56  }
 0x4ca   : > { %2699 = dma.vmem_to_hbm [thread:$0]  (%p2702_p9), %s2409_s27, 8960, %s4469_s5, [#allocation3], %s2865_s11, %s2865_s11, %s2866_s12  }
 0x4cb   : > { %2854 = dma.done.wait (%p2702_p9), [#allocation3], 8960  }
 0x4cc   : > { %2856 = vsyncadd (%p2702_p9), [#allocation3], 4294958336 }
 0x4cd PF: > { %s16_s18 = sadd.s32 1, %s2859_s18  }
 0x4ce   : > { %p13_p8 = scmp.ge.s32.totalorder %s16_s18, 5  }
 0x4d0   :  { %15 = sbr.rel (!%p13_p8) target bundleno = 1 (0x1), region = 85 }
 0x4d7   :  { %2424 = vsyncpa [#allocation3], 1 }
 0x4d8   :  { %2426 = vsyncpa [#allocation3 + $0x1], 1 }

</bundles_post_ra>
